<compile_context>
chip_gen: v6e
topology: v6e:2x2x1
jax: 0.10.0
libtpu: 0.0.40
codegen_flags: <defaults>
</compile_context>

<pallas_src>
import jax
import jax.numpy as jnp
from jax.experimental import pallas as pl
from jax.experimental.pallas import tpu as pltpu


# ------------------------------ helpers --------------------------------------
def _round_up(n, m):
    return ((n + m - 1) // m) * m


def _m_tiling(M, tile_m):
    """Return (padded M, tile) with sublane-friendly sizes."""
    Mp = _round_up(M, 16)
    if Mp <= tile_m:
        return Mp, Mp
    Mp = _round_up(M, tile_m)
    return Mp, tile_m


def _pad_bias(b, n):
    return jnp.pad(b.astype(jnp.float32), (0, n - b.shape[0])).reshape(1, n)


# ------------------------- Pallas kernel bodies -------------------------------
def _mm_bias_relu_kernel(x_ref, w_ref, b_ref, o_ref):
    # x:(TM,Kp) bf16  w:(Kp,Np) bf16  b:(1,Np) f32  o:(TM,Np) bf16
    acc = jnp.dot(x_ref[...], w_ref[...], preferred_element_type=jnp.float32)
    acc = jnp.maximum(acc + b_ref[...], 0.0)
    o_ref[...] = acc.astype(o_ref.dtype)


def _dense_heads_kernel(x_ref, w1_ref, b1_ref, w2_ref, b2_ref, w3_ref, b3_ref,
                        o_ref):
    # Fused fc1 -> [policy|value] hidden -> [logits|value] (3 chained MXU dots,
    # intermediates never leave VMEM).
    h = jnp.dot(x_ref[...], w1_ref[...], preferred_element_type=jnp.float32)
    h = jnp.maximum(h + b1_ref[...], 0.0).astype(jnp.bfloat16)
    g = jnp.dot(h, w2_ref[...], preferred_element_type=jnp.float32)
    g = jnp.maximum(g + b2_ref[...], 0.0).astype(jnp.bfloat16)
    y = jnp.dot(g, w3_ref[...], preferred_element_type=jnp.float32)
    o_ref[...] = y + b3_ref[...]


# --------------------------- Pallas call wrappers ------------------------------
def matmul_bias_relu(x, w, b, *, tile_m=512):
    """y = relu(x @ w + b). x:(M,K) bf16, w:(Kp,Np) bf16 pre-padded, b:(1,Np) f32."""
    M, K = x.shape
    Kp, Np = w.shape
    assert K <= Kp, (K, Kp)
    if K != Kp:                                   # weight K was padded at init
        x = jnp.pad(x, ((0, 0), (0, Kp - K)))
    Mp, tm = _m_tiling(M, tile_m)
    if Mp != M:
        x = jnp.pad(x, ((0, Mp - M), (0, 0)))

    cost = pl.CostEstimate(
        flops=2 * Mp * Kp * Np,
        transcendentals=0,
        bytes_accessed=(Mp * Kp + Kp * Np + Mp * Np) * 2 + Np * 4,
    )
    out = pl.pallas_call(
        _mm_bias_relu_kernel,
        out_shape=jax.ShapeDtypeStruct((Mp, Np), jnp.bfloat16),
        grid=(Mp // tm,),
        in_specs=[
            pl.BlockSpec((tm, Kp), lambda i: (i, 0)),
            pl.BlockSpec((Kp, Np), lambda i: (0, 0)),
            pl.BlockSpec((1, Np), lambda i: (0, 0)),
        ],
        out_specs=pl.BlockSpec((tm, Np), lambda i: (i, 0)),
        compiler_params=pltpu.CompilerParams(dimension_semantics=("parallel",)),
        cost_estimate=cost,
    )(x, w, b)
    return out[:M]


def dense_heads(x, w1, b1, w2, b2, w3, b3, *, tile_m=256):
    """Fused fc1 + policy/value heads. Returns (M, 128) f32: [logits | value | 0s]."""
    M, K = x.shape
    Kp, N1 = w1.shape
    N2 = w2.shape[1]
    N3 = w3.shape[1]
    assert K <= Kp, (K, Kp)
    if K != Kp:
        x = jnp.pad(x, ((0, 0), (0, Kp - K)))
    Mp, tm = _m_tiling(M, tile_m)
    if Mp != M:
        x = jnp.pad(x, ((0, Mp - M), (0, 0)))

    cost = pl.CostEstimate(
        flops=2 * Mp * (Kp * N1 + N1 * N2 + N2 * N3),
        transcendentals=0,
        bytes_accessed=(Mp * Kp + Kp * N1 + N1 * N2 + N2 * N3) * 2
        + (N1 + N2 + N3 + Mp * N3) * 4,
    )
    out = pl.pallas_call(
        _dense_heads_kernel,
        out_shape=jax.ShapeDtypeStruct((Mp, N3), jnp.float32),
        grid=(Mp // tm,),
        in_specs=[
            pl.BlockSpec((tm, Kp), lambda i: (i, 0)),
            pl.BlockSpec((Kp, N1), lambda i: (0, 0)),
            pl.BlockSpec((1, N1), lambda i: (0, 0)),
            pl.BlockSpec((N1, N2), lambda i: (0, 0)),
            pl.BlockSpec((1, N2), lambda i: (0, 0)),
            pl.BlockSpec((N2, N3), lambda i: (0, 0)),
            pl.BlockSpec((1, N3), lambda i: (0, 0)),
        ],
        out_specs=pl.BlockSpec((tm, N3), lambda i: (i, 0)),
        compiler_params=pltpu.CompilerParams(dimension_semantics=("parallel",)),
        cost_estimate=cost,
    )(x, w1, b1, w2, b2, w3, b3)
    return out[:M]


# --------------------------- conv via im2col ----------------------------------
def im2col(x_nhwc, KH, KW, stride, c_real):
    """Extract patches in (kh, kw, c) order. x:(B,H,W,C) bf16 (C may be padded)."""
    x = x_nhwc[..., :c_real]
    B, H, W, C = x.shape
    OH = (H - KH) // stride + 1
    OW = (W - KW) // stride + 1
    cols = []
    for i in range(KH):
        for j in range(KW):
            cols.append(
                x[:, i : i + stride * OH : stride, j : j + stride * OW : stride, :]
            )
    patches = jnp.concatenate(cols, axis=-1).reshape(B * OH * OW, KH * KW * C)
    return patches, OH, OW


# ------------------------------ parameters ------------------------------------
def init_params(key, num_actions):
    # TODO(synk): torch orthogonal_ init not reproduced; deterministic scaled
    # normal init is used instead (init does not affect forward semantics).
    ks = jax.random.split(key, 12)

    def w(k, shape, scale=0.05):
        return scale * jax.random.normal(k, shape, dtype=jnp.float32)

    return {
        "c1w": w(ks[0], (32, 4, 8, 8)),
        "c1b": jnp.zeros((32,), jnp.float32),
        "c2w": w(ks[1], (64, 32, 4, 4)),
        "c2b": jnp.zeros((64,), jnp.float32),
        "c3w": w(ks[2], (64, 64, 3, 3)),
        "c3b": jnp.zeros((64,), jnp.float32),
        "fc1w": w(ks[3], (512, 64 * 7 * 7), 0.02),
        "fc1b": jnp.zeros((512,), jnp.float32),
        "pw1": w(ks[4], (128, 512)),
        "pb1": w(ks[5], (128,), 0.01),
        "pw2": w(ks[6], (num_actions, 128)),
        "pb2": w(ks[7], (num_actions,), 0.01),
        "vw1": w(ks[8], (128, 512)),
        "vb1": w(ks[9], (128,), 0.01),
        "vw2": w(ks[10], (1, 128)),
        "vb2": w(ks[11], (1,), 0.01),
    }


def _prep_conv_weight(w_oihw, n_pad=128):
    """(O,C,KH,KW) torch weight -> (Kp, n_pad) bf16 matrix, patch order (kh,kw,c)."""
    O, C, KH, KW = w_oihw.shape
    K = KH * KW * C
    w = jnp.transpose(w_oihw, (2, 3, 1, 0)).reshape(K, O)
    Kp = _round_up(K, 128)
    w = jnp.pad(w, ((0, Kp - K), (0, n_pad - O)))
    return w.astype(jnp.bfloat16)


def prepare_params(raw, num_actions):
    """One-time weight prep: transpose/pad/permute/fuse + bf16 cast."""
    A = num_actions
    assert A <= 127, "head packing assumes num_actions + 1 <= 128"

    # fc1: permute rows from torch channel-major (c,h,w) flatten order to the
    # NHWC (h,w,c) flatten order used by the kernel; pad K 3136 -> 3200.
    fc1 = raw["fc1w"].reshape(512, 64, 7, 7)            # (O, C, H, W)
    fc1 = jnp.transpose(fc1, (2, 3, 1, 0)).reshape(7 * 7 * 64, 512)
    fc1 = jnp.pad(fc1, ((0, 64), (0, 0)))               # (3200, 512)

    # Heads, layer 1: [policy | value] hidden in one matmul.
    hw1 = jnp.concatenate([raw["pw1"].T, raw["vw1"].T], axis=1)       # (512, 256)
    hb1 = jnp.concatenate([raw["pb1"], raw["vb1"]]).reshape(1, 256)

    # Heads, layer 2: block-diagonal packing -> cols [0:A]=logits, col A=value.
    hw2 = jnp.zeros((256, 128), jnp.float32)
    hw2 = hw2.at[:128, :A].set(raw["pw2"].T)
    hw2 = hw2.at[128:, A : A + 1].set(raw["vw2"].T)
    hb2 = jnp.zeros((128,), jnp.float32).at[:A].set(raw["pb2"]).at[A].set(raw["vb2"][0])

    return {
        "c1w": _prep_conv_weight(raw["c1w"]),
        "c1b": _pad_bias(raw["c1b"], 128),
        "c2w": _prep_conv_weight(raw["c2w"]),
        "c2b": _pad_bias(raw["c2b"], 128),
        "c3w": _prep_conv_weight(raw["c3w"]),
        "c3b": _pad_bias(raw["c3b"], 128),
        "fc1w": fc1.astype(jnp.bfloat16),
        "fc1b": raw["fc1b"].reshape(1, 512).astype(jnp.float32),
        "hw1": hw1.astype(jnp.bfloat16),
        "hb1": hb1.astype(jnp.float32),
        "hw2": hw2.astype(jnp.bfloat16),
        "hb2": hb2.reshape(1, 128),
    }


# -------------------------------- forward -------------------------------------
def ppo_forward(x_nchw, p, num_actions):
    B = x_nchw.shape[0]
    # NCHW -> NHWC, bf16 activations throughout the conv trunk.
    x = jnp.transpose(x_nchw, (0, 2, 3, 1)).astype(jnp.bfloat16)      # (B,84,84,4)

    pat, OH, OW = im2col(x, 8, 8, 4, 4)
    x = matmul_bias_relu(pat, p["c1w"], p["c1b"]).reshape(B, OH, OW, 128)   # 20x20

    pat, OH, OW = im2col(x, 4, 4, 2, 32)
    x = matmul_bias_relu(pat, p["c2w"], p["c2b"]).reshape(B, OH, OW, 128)   # 9x9

    pat, OH, OW = im2col(x, 3, 3, 1, 64)
    x = matmul_bias_relu(pat, p["c3w"], p["c3b"]).reshape(B, OH, OW, 128)   # 7x7

    # Flatten in (h, w, c) order — fc1 weight rows were permuted at init so this
    # matches PyTorch's NCHW nn.Flatten exactly (no runtime transpose).
    flat = x[..., :64].reshape(B, 7 * 7 * 64)                         # (B, 3136)

    out = dense_heads(flat, p["fc1w"], p["fc1b"], p["hw1"], p["hb1"],
                      p["hw2"], p["hb2"])                             # (B, 128) f32
    policy_logits = out[:, :num_actions]
    value = out[:, num_actions : num_actions + 1]
    return policy_logits, value


# --------------------------------- main ---------------------------------------
if __name__ == "__main__":
    num_actions = 6  # Pong action space
    key = jax.random.PRNGKey(0)
    k_params, k_x = jax.random.split(key)

    # Spatial size is fixed to 84x84 by Linear(64*7*7, 512); keep batch small.
    x = jax.random.normal(k_x, (2, 4, 84, 84), dtype=jnp.float32)
    raw = init_params(k_params, num_actions)
    params = prepare_params(raw, num_actions)

    fwd = jax.jit(ppo_forward, static_argnums=2)
    logits, value = fwd(x, params, num_actions)
    jax.block_until_ready((logits, value))

    assert logits.shape == (2, num_actions), logits.shape
    assert value.shape == (2, 1), value.shape
    print("KERNEL_OK")
</pallas_src>

<mosaic_0001>
module attributes {stable_mosaic.version = 11 : i64} {
  func.func @_mm_bias_relu_kernel(%arg0: i32, %arg1: memref<512x256xbf16, #tpu.memory_space<vmem>>, %arg2: memref<256x128xbf16, #tpu.memory_space<vmem>>, %arg3: memref<1x128xf32, #tpu.memory_space<vmem>>, %arg4: memref<512x128xbf16, #tpu.memory_space<vmem>>) attributes {dimension_semantics = [#tpu.dimension_semantics<parallel>], iteration_bounds = array<i64: 2>, scalar_prefetch = 0 : i64, scratch_operands = 0 : i64, tpu.core_type = #tpu.core_type<tc>, window_params = [{transform_indices = @transform_0, window_bounds = array<i64: 512, 256>}, {pipeline_mode = #tpu.pipeline_mode<synchronous>, transform_indices = @transform_1, window_bounds = array<i64: 256, 128>}, {pipeline_mode = #tpu.pipeline_mode<synchronous>, transform_indices = @transform_2, window_bounds = array<i64: 1, 128>}, {transform_indices = @transform_3, window_bounds = array<i64: 512, 128>}]} {
    %c0 = arith.constant 0 : index
    %c0_0 = arith.constant 0 : index
    %0 = vector.load %arg1[%c0, %c0_0] : memref<512x256xbf16, #tpu.memory_space<vmem>>, vector<512x256xbf16>
    %c0_1 = arith.constant 0 : index
    %c0_2 = arith.constant 0 : index
    %1 = vector.load %arg2[%c0_1, %c0_2] : memref<256x128xbf16, #tpu.memory_space<vmem>>, vector<256x128xbf16>
    %cst = arith.constant dense<0.000000e+00> : vector<512x128xf32>
    %2 = tpu.matmul %0, %1, %cst {dimension_numbers = #tpu.dot_dimension_numbers<[1], [0], [0], [1], [0, 0, 1, 1], [], []>} : vector<512x256xbf16>, vector<256x128xbf16>, vector<512x128xf32> -> vector<512x128xf32>
    %c0_3 = arith.constant 0 : index
    %c0_4 = arith.constant 0 : index
    %3 = vector.load %arg3[%c0_3, %c0_4] : memref<1x128xf32, #tpu.memory_space<vmem>>, vector<1x128xf32>
    %4 = vector.broadcast %3 : vector<1x128xf32> to vector<512x128xf32>
    %5 = arith.addf %2, %4 : vector<512x128xf32>
    %cst_5 = arith.constant 0.000000e+00 : f32
    %6 = vector.broadcast %cst_5 : f32 to vector<512x128xf32>
    %7 = arith.maximumf %5, %6 : vector<512x128xf32>
    %8 = arith.truncf %7 : vector<512x128xf32> to vector<512x128xbf16>
    %c0_6 = arith.constant 0 : index
    %c0_7 = arith.constant 0 : index
    %9 = vector.load %arg4[%c0_6, %c0_7] : memref<512x128xbf16, #tpu.memory_space<vmem>>, vector<512x128xbf16>
    tpu.vector_store %arg4[%c0_6, %c0_7], %8 {strides = array<i32>} : memref<512x128xbf16, #tpu.memory_space<vmem>>, vector<512x128xbf16>,
    return
  }
  func.func @transform_0(%arg0: i32) -> (i32, i32) {
    %c0_i32 = arith.constant 0 : i32
    %c0_i32_0 = arith.constant 0 : i32
    return %arg0, %c0_i32 : i32, i32
  }
  func.func @transform_1(%arg0: i32) -> (i32, i32) {
    %c0_i32 = arith.constant 0 : i32
    %c0_i32_0 = arith.constant 0 : i32
    %c0_i32_1 = arith.constant 0 : i32
    return %c0_i32, %c0_i32_0 : i32, i32
  }
  func.func @transform_2(%arg0: i32) -> (i32, i32) {
    %c0_i32 = arith.constant 0 : i32
    %c0_i32_0 = arith.constant 0 : i32
    %c0_i32_1 = arith.constant 0 : i32
    return %c0_i32, %c0_i32_0 : i32, i32
  }
  func.func @transform_3(%arg0: i32) -> (i32, i32) {
    %c0_i32 = arith.constant 0 : i32
    %c0_i32_0 = arith.constant 0 : i32
    return %arg0, %c0_i32 : i32, i32
  }
}

module attributes {stable_mosaic.version = 11 : i64} {
  func.func @_mm_bias_relu_kernel(%arg0: i32, %arg1: memref<176x512xbf16, #tpu.memory_space<vmem>>, %arg2: memref<512x128xbf16, #tpu.memory_space<vmem>>, %arg3: memref<1x128xf32, #tpu.memory_space<vmem>>, %arg4: memref<176x128xbf16, #tpu.memory_space<vmem>>) attributes {dimension_semantics = [#tpu.dimension_semantics<parallel>], iteration_bounds = array<i64: 1>, scalar_prefetch = 0 : i64, scratch_operands = 0 : i64, tpu.core_type = #tpu.core_type<tc>, window_params = [{transform_indices = @transform_0, window_bounds = array<i64: 176, 512>}, {pipeline_mode = #tpu.pipeline_mode<synchronous>, transform_indices = @transform_1, window_bounds = array<i64: 512, 128>}, {pipeline_mode = #tpu.pipeline_mode<synchronous>, transform_indices = @transform_2, window_bounds = array<i64: 1, 128>}, {transform_indices = @transform_3, window_bounds = array<i64: 176, 128>}]} {
    %c0 = arith.constant 0 : index
    %c0_0 = arith.constant 0 : index
    %0 = vector.load %arg1[%c0, %c0_0] : memref<176x512xbf16, #tpu.memory_space<vmem>>, vector<176x512xbf16>
    %c0_1 = arith.constant 0 : index
    %c0_2 = arith.constant 0 : index
    %1 = vector.load %arg2[%c0_1, %c0_2] : memref<512x128xbf16, #tpu.memory_space<vmem>>, vector<512x128xbf16>
    %cst = arith.constant dense<0.000000e+00> : vector<176x128xf32>
    %2 = tpu.matmul %0, %1, %cst {dimension_numbers = #tpu.dot_dimension_numbers<[1], [0], [0], [1], [0, 0, 1, 1], [], []>} : vector<176x512xbf16>, vector<512x128xbf16>, vector<176x128xf32> -> vector<176x128xf32>
    %c0_3 = arith.constant 0 : index
    %c0_4 = arith.constant 0 : index
    %3 = vector.load %arg3[%c0_3, %c0_4] : memref<1x128xf32, #tpu.memory_space<vmem>>, vector<1x128xf32>
    %4 = vector.broadcast %3 : vector<1x128xf32> to vector<176x128xf32>
    %5 = arith.addf %2, %4 : vector<176x128xf32>
    %cst_5 = arith.constant 0.000000e+00 : f32
    %6 = vector.broadcast %cst_5 : f32 to vector<176x128xf32>
    %7 = arith.maximumf %5, %6 : vector<176x128xf32>
    %8 = arith.truncf %7 : vector<176x128xf32> to vector<176x128xbf16>
    %c0_6 = arith.constant 0 : index
    %c0_7 = arith.constant 0 : index
    %9 = vector.load %arg4[%c0_6, %c0_7] : memref<176x128xbf16, #tpu.memory_space<vmem>>, vector<176x128xbf16>
    tpu.vector_store %arg4[%c0_6, %c0_7], %8 {strides = array<i32>} : memref<176x128xbf16, #tpu.memory_space<vmem>>, vector<176x128xbf16>,
    return
  }
  func.func @transform_0(%arg0: i32) -> (i32, i32) {
    %c0_i32 = arith.constant 0 : i32
    %c0_i32_0 = arith.constant 0 : i32
    return %arg0, %c0_i32 : i32, i32
  }
  func.func @transform_1(%arg0: i32) -> (i32, i32) {
    %c0_i32 = arith.constant 0 : i32
    %c0_i32_0 = arith.constant 0 : i32
    %c0_i32_1 = arith.constant 0 : i32
    return %c0_i32, %c0_i32_0 : i32, i32
  }
  func.func @transform_2(%arg0: i32) -> (i32, i32) {
    %c0_i32 = arith.constant 0 : i32
    %c0_i32_0 = arith.constant 0 : i32
    %c0_i32_1 = arith.constant 0 : i32
    return %c0_i32, %c0_i32_0 : i32, i32
  }
  func.func @transform_3(%arg0: i32) -> (i32, i32) {
    %c0_i32 = arith.constant 0 : i32
    %c0_i32_0 = arith.constant 0 : i32
    return %arg0, %c0_i32 : i32, i32
  }
}

module attributes {stable_mosaic.version = 11 : i64} {
  func.func @_mm_bias_relu_kernel(%arg0: i32, %arg1: memref<112x640xbf16, #tpu.memory_space<vmem>>, %arg2: memref<640x128xbf16, #tpu.memory_space<vmem>>, %arg3: memref<1x128xf32, #tpu.memory_space<vmem>>, %arg4: memref<112x128xbf16, #tpu.memory_space<vmem>>) attributes {dimension_semantics = [#tpu.dimension_semantics<parallel>], iteration_bounds = array<i64: 1>, scalar_prefetch = 0 : i64, scratch_operands = 0 : i64, tpu.core_type = #tpu.core_type<tc>, window_params = [{transform_indices = @transform_0, window_bounds = array<i64: 112, 640>}, {pipeline_mode = #tpu.pipeline_mode<synchronous>, transform_indices = @transform_1, window_bounds = array<i64: 640, 128>}, {pipeline_mode = #tpu.pipeline_mode<synchronous>, transform_indices = @transform_2, window_bounds = array<i64: 1, 128>}, {transform_indices = @transform_3, window_bounds = array<i64: 112, 128>}]} {
    %c0 = arith.constant 0 : index
    %c0_0 = arith.constant 0 : index
    %0 = vector.load %arg1[%c0, %c0_0] : memref<112x640xbf16, #tpu.memory_space<vmem>>, vector<112x640xbf16>
    %c0_1 = arith.constant 0 : index
    %c0_2 = arith.constant 0 : index
    %1 = vector.load %arg2[%c0_1, %c0_2] : memref<640x128xbf16, #tpu.memory_space<vmem>>, vector<640x128xbf16>
    %cst = arith.constant dense<0.000000e+00> : vector<112x128xf32>
    %2 = tpu.matmul %0, %1, %cst {dimension_numbers = #tpu.dot_dimension_numbers<[1], [0], [0], [1], [0, 0, 1, 1], [], []>} : vector<112x640xbf16>, vector<640x128xbf16>, vector<112x128xf32> -> vector<112x128xf32>
    %c0_3 = arith.constant 0 : index
    %c0_4 = arith.constant 0 : index
    %3 = vector.load %arg3[%c0_3, %c0_4] : memref<1x128xf32, #tpu.memory_space<vmem>>, vector<1x128xf32>
    %4 = vector.broadcast %3 : vector<1x128xf32> to vector<112x128xf32>
    %5 = arith.addf %2, %4 : vector<112x128xf32>
    %cst_5 = arith.constant 0.000000e+00 : f32
    %6 = vector.broadcast %cst_5 : f32 to vector<112x128xf32>
    %7 = arith.maximumf %5, %6 : vector<112x128xf32>
    %8 = arith.truncf %7 : vector<112x128xf32> to vector<112x128xbf16>
    %c0_6 = arith.constant 0 : index
    %c0_7 = arith.constant 0 : index
    %9 = vector.load %arg4[%c0_6, %c0_7] : memref<112x128xbf16, #tpu.memory_space<vmem>>, vector<112x128xbf16>
    tpu.vector_store %arg4[%c0_6, %c0_7], %8 {strides = array<i32>} : memref<112x128xbf16, #tpu.memory_space<vmem>>, vector<112x128xbf16>,
    return
  }
  func.func @transform_0(%arg0: i32) -> (i32, i32) {
    %c0_i32 = arith.constant 0 : i32
    %c0_i32_0 = arith.constant 0 : i32
    return %arg0, %c0_i32 : i32, i32
  }
  func.func @transform_1(%arg0: i32) -> (i32, i32) {
    %c0_i32 = arith.constant 0 : i32
    %c0_i32_0 = arith.constant 0 : i32
    %c0_i32_1 = arith.constant 0 : i32
    return %c0_i32, %c0_i32_0 : i32, i32
  }
  func.func @transform_2(%arg0: i32) -> (i32, i32) {
    %c0_i32 = arith.constant 0 : i32
    %c0_i32_0 = arith.constant 0 : i32
    %c0_i32_1 = arith.constant 0 : i32
    return %c0_i32, %c0_i32_0 : i32, i32
  }
  func.func @transform_3(%arg0: i32) -> (i32, i32) {
    %c0_i32 = arith.constant 0 : i32
    %c0_i32_0 = arith.constant 0 : i32
    return %arg0, %c0_i32 : i32, i32
  }
}

module attributes {stable_mosaic.version = 11 : i64} {
  func.func @_dense_heads_kernel(%arg0: i32, %arg1: memref<16x3200xbf16, #tpu.memory_space<vmem>>, %arg2: memref<3200x512xbf16, #tpu.memory_space<vmem>>, %arg3: memref<1x512xf32, #tpu.memory_space<vmem>>, %arg4: memref<512x256xbf16, #tpu.memory_space<vmem>>, %arg5: memref<1x256xf32, #tpu.memory_space<vmem>>, %arg6: memref<256x128xbf16, #tpu.memory_space<vmem>>, %arg7: memref<1x128xf32, #tpu.memory_space<vmem>>, %arg8: memref<16x128xf32, #tpu.memory_space<vmem>>) attributes {dimension_semantics = [#tpu.dimension_semantics<parallel>], iteration_bounds = array<i64: 1>, scalar_prefetch = 0 : i64, scratch_operands = 0 : i64, tpu.core_type = #tpu.core_type<tc>, window_params = [{transform_indices = @transform_0, window_bounds = array<i64: 16, 3200>}, {pipeline_mode = #tpu.pipeline_mode<synchronous>, transform_indices = @transform_1, window_bounds = array<i64: 3200, 512>}, {pipeline_mode = #tpu.pipeline_mode<synchronous>, transform_indices = @transform_2, window_bounds = array<i64: 1, 512>}, {pipeline_mode = #tpu.pipeline_mode<synchronous>, transform_indices = @transform_3, window_bounds = array<i64: 512, 256>}, {pipeline_mode = #tpu.pipeline_mode<synchronous>, transform_indices = @transform_4, window_bounds = array<i64: 1, 256>}, {pipeline_mode = #tpu.pipeline_mode<synchronous>, transform_indices = @transform_5, window_bounds = array<i64: 256, 128>}, {pipeline_mode = #tpu.pipeline_mode<synchronous>, transform_indices = @transform_6, window_bounds = array<i64: 1, 128>}, {transform_indices = @transform_7, window_bounds = array<i64: 16, 128>}]} {
    %c0 = arith.constant 0 : index
    %c0_0 = arith.constant 0 : index
    %0 = vector.load %arg1[%c0, %c0_0] : memref<16x3200xbf16, #tpu.memory_space<vmem>>, vector<16x3200xbf16>
    %c0_1 = arith.constant 0 : index
    %c0_2 = arith.constant 0 : index
    %1 = vector.load %arg2[%c0_1, %c0_2] : memref<3200x512xbf16, #tpu.memory_space<vmem>>, vector<3200x512xbf16>
    %cst = arith.constant dense<0.000000e+00> : vector<16x512xf32>
    %2 = tpu.matmul %0, %1, %cst {dimension_numbers = #tpu.dot_dimension_numbers<[1], [0], [0], [1], [0, 0, 1, 1], [], []>} : vector<16x3200xbf16>, vector<3200x512xbf16>, vector<16x512xf32> -> vector<16x512xf32>
    %c0_3 = arith.constant 0 : index
    %c0_4 = arith.constant 0 : index
    %3 = vector.load %arg3[%c0_3, %c0_4] : memref<1x512xf32, #tpu.memory_space<vmem>>, vector<1x512xf32>
    %4 = vector.broadcast %3 : vector<1x512xf32> to vector<16x512xf32>
    %5 = arith.addf %2, %4 : vector<16x512xf32>
    %cst_5 = arith.constant 0.000000e+00 : f32
    %6 = vector.broadcast %cst_5 : f32 to vector<16x512xf32>
    %7 = arith.maximumf %5, %6 : vector<16x512xf32>
    %8 = arith.truncf %7 : vector<16x512xf32> to vector<16x512xbf16>
    %c0_6 = arith.constant 0 : index
    %c0_7 = arith.constant 0 : index
    %9 = vector.load %arg4[%c0_6, %c0_7] : memref<512x256xbf16, #tpu.memory_space<vmem>>, vector<512x256xbf16>
    %cst_8 = arith.constant dense<0.000000e+00> : vector<16x256xf32>
    %10 = tpu.matmul %8, %9, %cst_8 {dimension_numbers = #tpu.dot_dimension_numbers<[1], [0], [0], [1], [0, 0, 1, 1], [], []>} : vector<16x512xbf16>, vector<512x256xbf16>, vector<16x256xf32> -> vector<16x256xf32>
    %c0_9 = arith.constant 0 : index
    %c0_10 = arith.constant 0 : index
    %11 = vector.load %arg5[%c0_9, %c0_10] : memref<1x256xf32, #tpu.memory_space<vmem>>, vector<1x256xf32>
    %12 = vector.broadcast %11 : vector<1x256xf32> to vector<16x256xf32>
    %13 = arith.addf %10, %12 : vector<16x256xf32>
    %cst_11 = arith.constant 0.000000e+00 : f32
    %14 = vector.broadcast %cst_11 : f32 to vector<16x256xf32>
    %15 = arith.maximumf %13, %14 : vector<16x256xf32>
    %16 = arith.truncf %15 : vector<16x256xf32> to vector<16x256xbf16>
    %c0_12 = arith.constant 0 : index
    %c0_13 = arith.constant 0 : index
    %17 = vector.load %arg6[%c0_12, %c0_13] : memref<256x128xbf16, #tpu.memory_space<vmem>>, vector<256x128xbf16>
    %cst_14 = arith.constant dense<0.000000e+00> : vector<16x128xf32>
    %18 = tpu.matmul %16, %17, %cst_14 {dimension_numbers = #tpu.dot_dimension_numbers<[1], [0], [0], [1], [0, 0, 1, 1], [], []>} : vector<16x256xbf16>, vector<256x128xbf16>, vector<16x128xf32> -> vector<16x128xf32>
    %c0_15 = arith.constant 0 : index
    %c0_16 = arith.constant 0 : index
    %19 = vector.load %arg7[%c0_15, %c0_16] : memref<1x128xf32, #tpu.memory_space<vmem>>, vector<1x128xf32>
    %20 = vector.broadcast %19 : vector<1x128xf32> to vector<16x128xf32>
    %21 = arith.addf %18, %20 : vector<16x128xf32>
    %c0_17 = arith.constant 0 : index
    %c0_18 = arith.constant 0 : index
    %22 = vector.load %arg8[%c0_17, %c0_18] : memref<16x128xf32, #tpu.memory_space<vmem>>, vector<16x128xf32>
    tpu.vector_store %arg8[%c0_17, %c0_18], %21 {strides = array<i32>} : memref<16x128xf32, #tpu.memory_space<vmem>>, vector<16x128xf32>,
    return
  }
  func.func @transform_0(%arg0: i32) -> (i32, i32) {
    %c0_i32 = arith.constant 0 : i32
    %c0_i32_0 = arith.constant 0 : i32
    return %arg0, %c0_i32 : i32, i32
  }
  func.func @transform_1(%arg0: i32) -> (i32, i32) {
    %c0_i32 = arith.constant 0 : i32
    %c0_i32_0 = arith.constant 0 : i32
    %c0_i32_1 = arith.constant 0 : i32
    return %c0_i32, %c0_i32_0 : i32, i32
  }
  func.func @transform_2(%arg0: i32) -> (i32, i32) {
    %c0_i32 = arith.constant 0 : i32
    %c0_i32_0 = arith.constant 0 : i32
    %c0_i32_1 = arith.constant 0 : i32
    return %c0_i32, %c0_i32_0 : i32, i32
  }
  func.func @transform_3(%arg0: i32) -> (i32, i32) {
    %c0_i32 = arith.constant 0 : i32
    %c0_i32_0 = arith.constant 0 : i32
    %c0_i32_1 = arith.constant 0 : i32
    return %c0_i32, %c0_i32_0 : i32, i32
  }
  func.func @transform_4(%arg0: i32) -> (i32, i32) {
    %c0_i32 = arith.constant 0 : i32
    %c0_i32_0 = arith.constant 0 : i32
    %c0_i32_1 = arith.constant 0 : i32
    return %c0_i32, %c0_i32_0 : i32, i32
  }
  func.func @transform_5(%arg0: i32) -> (i32, i32) {
    %c0_i32 = arith.constant 0 : i32
    %c0_i32_0 = arith.constant 0 : i32
    %c0_i32_1 = arith.constant 0 : i32
    return %c0_i32, %c0_i32_0 : i32, i32
  }
  func.func @transform_6(%arg0: i32) -> (i32, i32) {
    %c0_i32 = arith.constant 0 : i32
    %c0_i32_0 = arith.constant 0 : i32
    %c0_i32_1 = arith.constant 0 : i32
    return %c0_i32, %c0_i32_0 : i32, i32
  }
  func.func @transform_7(%arg0: i32) -> (i32, i32) {
    %c0_i32 = arith.constant 0 : i32
    %c0_i32_0 = arith.constant 0 : i32
    return %arg0, %c0_i32 : i32, i32
  }
}

</mosaic_0001>

<bundles_post_ra>
// kernel: ppo_forward.4
= control target key start
LH: loop header
LB: loop body
LE: loop exit
PB: predicated region body
PF: predicated region fallthrough
CT: control target
= control target key end

     0   :  { %s2021_s12 = smov 0   ;;  %s2291_s0 = inlined_call_operand.vmem [shape: bf16[1024,256], index: 0, kind: input, shape index: {}]   ;;  %s2292_s1 = inlined_call_operand.vmem [shape: bf16[256,128], index: 1, kind: input, shape index: {}]   ;;  %s2293_s2 = inlined_call_operand.vmem [shape: f32[1,128], index: 2, kind: input, shape index: {}]   ;;  %s2294_s3 = inlined_call_operand.vmem [shape: bf16[1024,128], index: 3, kind: output, shape index: {}]  }
   0x1 LB: > { %s1426_s13 = sadd.s32 4294967295, %s1998_s12   ;;  %p1430_p0 = scmp.ge.s32.totalorder %s1998_s12, 1  ;;  %s1998_s12 = sphi %s2021_s12, %s13_s12  }
   0x2   : > { %p139_p1 = scmp.lt.s32.totalorder %s1998_s12, 3 }
   0x4   : > { %p140_p2 = pnand %p1430_p0, %p139_p1 }
   0x5   : > { %s1431_s16 = sshll.u32 (!%p140_p2), %s1426_s13, 6 }
   0x6   : > { %143 = sbr.rel (%p140_p2) target bundleno = 400 (0x190), region = 32  ;;  %p165_p3 = scmp.lt.s32.totalorder (!%p140_p2), %s1431_s16, 127 }
   0xb   : > { %v1880_v0 = vld [vmem:[%s2292_s1 + $0x38] sm:$0xff]   ;;  %v2000_v1 = vmov 0   ;;  %v1881_v2 = vld [vmem:[%s2292_s1 + $0x30] sm:$0xff]   ;;  %v1882_v3 = vld [vmem:[%s2292_s1 + $0x28] sm:$0xff]   ;;  %s2296_s16 = smov (!%p165_p3, %s1431_s16), 127 }
   0xc   : > { %697 = vmatprep.subr.bf16.mxu0 %v2000_v1  ;;  %1839 = vmatprep.subr.bf16.mxu1 %v2000_v1  ;;  %v1883_v4 = vld [vmem:[%s2292_s1 + $0x20] sm:$0xff]   ;;  %s1583_s23 = sshll.u32 %s2296_s16, 3  ;;  %v1884_v5 = vld [vmem:[%s2292_s1 + $0x18] sm:$0xff]   ;;  %v1885_v7 = vld [vmem:[%s2292_s1 + $0x10] sm:$0xff]   ;;  %s1435_s29 = sshll.u32 %s2296_s16, 2 }
   0xd   : > { %698 = vmatpush1.bf16.msra.mxu0 %v1880_v0  ;;  %1855 = vmatpush1.bf16.msra.mxu1 %v1880_v0  ;;  %s2058_s28 = scalar_lea.vmem %s2291_s0, %s1583_s23  ;;  %v1886_v9 = vld [vmem:[%s2292_s1 + $0x8] sm:$0xff]   ;;  %v1887_v10 = vld [vmem:[%s2292_s1] sm:$0xff]   ;;  %v1888_v11 = vld [vmem:[%s2292_s1 + $0x78] sm:$0xff]   ;;  %s2194_s4 = scalar_lea.vmem %s2294_s3, %s1435_s29 }
   0xe   : > { %699 = vmatprep.subr.bf16.mxu0 %v2000_v1  ;;  %1840 = vmatprep.subr.bf16.mxu1 %v2000_v1  ;;  %v1898_v6 = vld [vmem:[%s2058_s28 + $0x4] ss:$8 sps:$4 sm:$0xff]   ;;  %v1889_v12 = vld [vmem:[%s2292_s1 + $0x70] sm:$0xff]   ;;  %v1892_v15 = vld [vmem:[%s2292_s1 + $0x58] sm:$0xff]  }
   0xf   : > { %v1901_v8 = vld [vmem:[%s2058_s28 + $0x104] ss:$8 sps:$4 sm:$0xff]   ;;  %729 = vmatprep.mubr.bf16.mxu0 %v1898_v6  ;;  %v1893_v16 = vld [vmem:[%s2292_s1 + $0x50] sm:$0xff]   ;;  %v1896_v19 = vld [vmem:[%s2058_s28] ss:$8 sps:$4 sm:$0xff]  }
  0x10   : > { %857 = vmatprep.mubr.bf16.mxu1 %v1901_v8  ;;  %v1890_v13 = vld [vmem:[%s2292_s1 + $0x68] sm:$0xff]   ;;  %v1891_v14 = vld [vmem:[%s2292_s1 + $0x60] sm:$0xff]   ;;  %v1902_v21 = vld [vmem:[%s2058_s28 + $0x14] ss:$8 sps:$4 sm:$0xff]  }
  0x11   : > { %700 = vmatpush1.bf16.msra.mxu0 %v1881_v2  ;;  %1856 = vmatpush1.bf16.msra.mxu1 %v1881_v2  ;;  %v1894_v17 = vld [vmem:[%s2292_s1 + $0x48] sm:$0xff]   ;;  %v1895_v18 = vld [vmem:[%s2292_s1 + $0x40] sm:$0xff]   ;;  %v1904_v22 = vld [vmem:[%s2058_s28 + $0x114] ss:$8 sps:$4 sm:$0xff]  }
  0x12   : > { %701 = vmatprep.subr.bf16.mxu0 %v2000_v1  ;;  %1841 = vmatprep.subr.bf16.mxu1 %v2000_v1  ;;  %v1899_v20 = vld [vmem:[%s2058_s28 + $0x100] ss:$8 sps:$4 sm:$0xff]   ;;  %v1906_v23 = vld [vmem:[%s2058_s28 + $0x10] ss:$8 sps:$4 sm:$0xff]   ;;  %v1908_v25 = vld [vmem:[%s2058_s28 + $0x24] ss:$8 sps:$4 sm:$0xff]  }
  0x13   : > { %v1907_v24 = vld [vmem:[%s2058_s28 + $0x110] ss:$8 sps:$4 sm:$0xff]   ;;  %v1910_v26 = vld [vmem:[%s2058_s28 + $0x124] ss:$8 sps:$4 sm:$0xff]   ;;  %v1912_v27 = vld [vmem:[%s2058_s28 + $0x20] ss:$8 sps:$4 sm:$0xff]  }
  0x14   : > { %v1913_v28 = vld [vmem:[%s2058_s28 + $0x120] ss:$8 sps:$4 sm:$0xff]   ;;  %v1914_v29 = vld [vmem:[%s2058_s28 + $0x34] ss:$8 sps:$4 sm:$0xff]   ;;  %v1918_v31 = vld [vmem:[%s2058_s28 + $0x30] ss:$8 sps:$4 sm:$0xff]  }
  0x15   : > { %702 = vmatpush1.bf16.msra.mxu0 %v1882_v3  ;;  %1857 = vmatpush1.bf16.msra.mxu1 %v1882_v3  ;;  %v1916_v30 = vld [vmem:[%s2058_s28 + $0x134] ss:$8 sps:$4 sm:$0xff]   ;;  %v1919_v32 = vld [vmem:[%s2058_s28 + $0x130] ss:$8 sps:$4 sm:$0xff]   ;;  %v1920_v33 = vld [vmem:[%s2058_s28 + $0x44] ss:$8 sps:$4 sm:$0xff]  }
  0x16   : > { %703 = vmatprep.subr.bf16.mxu0 %v2000_v1  ;;  %1842 = vmatprep.subr.bf16.mxu1 %v2000_v1  ;;  %v1922_v34 = vld [vmem:[%s2058_s28 + $0x144] ss:$8 sps:$4 sm:$0xff]   ;;  %v1924_v35 = vld [vmem:[%s2058_s28 + $0x40] ss:$8 sps:$4 sm:$0xff]   ;;  %v1926_v37 = vld [vmem:[%s2058_s28 + $0x54] ss:$8 sps:$4 sm:$0xff]  }
  0x17   : > { %v1925_v36 = vld [vmem:[%s2058_s28 + $0x140] ss:$8 sps:$4 sm:$0xff]   ;;  %v1928_v38 = vld [vmem:[%s2058_s28 + $0x154] ss:$8 sps:$4 sm:$0xff]   ;;  %v1930_v39 = vld [vmem:[%s2058_s28 + $0x50] ss:$8 sps:$4 sm:$0xff]  }
  0x18   : > { %v1931_v40 = vld [vmem:[%s2058_s28 + $0x150] ss:$8 sps:$4 sm:$0xff]   ;;  %v1932_v41 = vld [vmem:[%s2058_s28 + $0x64] ss:$8 sps:$4 sm:$0xff]   ;;  %v1936_v43 = vld [vmem:[%s2058_s28 + $0x60] ss:$8 sps:$4 sm:$0xff]  }
  0x19   : > { %704 = vmatpush1.bf16.msra.mxu0 %v1883_v4  ;;  %1858 = vmatpush1.bf16.msra.mxu1 %v1883_v4  ;;  %v1934_v42 = vld [vmem:[%s2058_s28 + $0x164] ss:$8 sps:$4 sm:$0xff]   ;;  %v1937_v44 = vld [vmem:[%s2058_s28 + $0x160] ss:$8 sps:$4 sm:$0xff]   ;;  %v1938_v45 = vld [vmem:[%s2058_s28 + $0x74] ss:$8 sps:$4 sm:$0xff]  }
  0x1a   : > { %705 = vmatprep.subr.bf16.mxu0 %v2000_v1  ;;  %1843 = vmatprep.subr.bf16.mxu1 %v2000_v1  ;;  %v1940_v46 = vld [vmem:[%s2058_s28 + $0x174] ss:$8 sps:$4 sm:$0xff]   ;;  %v1942_v47 = vld [vmem:[%s2058_s28 + $0x70] ss:$8 sps:$4 sm:$0xff]   ;;  %v1944_v49 = vld [vmem:[%s2058_s28 + $0x84] ss:$8 sps:$4 sm:$0xff]  }
  0x1b   : > { %v1943_v48 = vld [vmem:[%s2058_s28 + $0x170] ss:$8 sps:$4 sm:$0xff]   ;;  %v1946_v50 = vld [vmem:[%s2058_s28 + $0x184] ss:$8 sps:$4 sm:$0xff]   ;;  %v1948_v51 = vld [vmem:[%s2058_s28 + $0x80] ss:$8 sps:$4 sm:$0xff]  }
  0x1c   : > { %v1949_v52 = vld [vmem:[%s2058_s28 + $0x180] ss:$8 sps:$4 sm:$0xff]   ;;  %v1950_v53 = vld [vmem:[%s2058_s28 + $0x94] ss:$8 sps:$4 sm:$0xff]   ;;  %v1954_v55 = vld [vmem:[%s2058_s28 + $0x90] ss:$8 sps:$4 sm:$0xff]  }
  0x1d   : > { %706 = vmatpush1.bf16.msra.mxu0 %v1884_v5  ;;  %1859 = vmatpush1.bf16.msra.mxu1 %v1884_v5  ;;  %v1952_v54 = vld [vmem:[%s2058_s28 + $0x194] ss:$8 sps:$4 sm:$0xff]   ;;  %v1955_v56 = vld [vmem:[%s2058_s28 + $0x190] ss:$8 sps:$4 sm:$0xff]   ;;  %v1956_v57 = vld [vmem:[%s2058_s28 + $0xa4] ss:$8 sps:$4 sm:$0xff]  }
  0x1e   : > { %707 = vmatprep.subr.bf16.mxu0 %v2000_v1  ;;  %1844 = vmatprep.subr.bf16.mxu1 %v2000_v1  ;;  %v1958_v58 = vld [vmem:[%s2058_s28 + $0x1a4] ss:$8 sps:$4 sm:$0xff]   ;;  %v1960_v59 = vld [vmem:[%s2058_s28 + $0xa0] ss:$8 sps:$4 sm:$0xff]   ;;  %v1962_v61 = vld [vmem:[%s2058_s28 + $0xb4] ss:$8 sps:$4 sm:$0xff]  }
  0x1f   : > { %v1961_v60 = vld [vmem:[%s2058_s28 + $0x1a0] ss:$8 sps:$4 sm:$0xff]   ;;  %v1964_v62 = vld [vmem:[%s2058_s28 + $0x1b4] ss:$8 sps:$4 sm:$0xff]   ;;  %v1966_v63 = vld [vmem:[%s2058_s28 + $0xb0] ss:$8 sps:$4 sm:$0xff]  }
  0x20   : > { %v1967_v0 = vld [vmem:[%s2058_s28 + $0x1b0] ss:$8 sps:$4 sm:$0xff]   ;;  %v1970_v2 = vld [vmem:[%s2058_s28 + $0x1c4] ss:$8 sps:$4 sm:$0xff]   ;;  %v1972_v3 = vld [vmem:[%s2058_s28 + $0xc0] ss:$8 sps:$4 sm:$0xff]  }
  0x21   : > { %708 = vmatpush1.bf16.msra.mxu0 %v1885_v7  ;;  %1860 = vmatpush1.bf16.msra.mxu1 %v1885_v7  ;;  %v1973_v4 = vld [vmem:[%s2058_s28 + $0x1c0] ss:$8 sps:$4 sm:$0xff]   ;;  %v1974_v5 = vld [vmem:[%s2058_s28 + $0xd4] ss:$8 sps:$4 sm:$0xff]   ;;  %v1978_v7 = vld [vmem:[%s2058_s28 + $0xd0] ss:$8 sps:$4 sm:$0xff]  }
  0x22   : > { %709 = vmatprep.subr.bf16.mxu0 %v2000_v1  ;;  %1845 = vmatprep.subr.bf16.mxu1 %v2000_v1  ;;  %v1976_v6 = vld [vmem:[%s2058_s28 + $0x1d4] ss:$8 sps:$4 sm:$0xff]   ;;  %v1979_v8 = vld [vmem:[%s2058_s28 + $0x1d0] ss:$8 sps:$4 sm:$0xff]  }
  0x25   : > { %710 = vmatpush1.bf16.msra.mxu0 %v1886_v9  ;;  %1861 = vmatpush1.bf16.msra.mxu1 %v1886_v9  ;;  %v1980_v9 = vld [vmem:[%s2058_s28 + $0xe4] ss:$8 sps:$4 sm:$0xff]  }
  0x26   : > { %711 = vmatprep.subr.bf16.mxu0 %v2000_v1  ;;  %1846 = vmatprep.subr.bf16.mxu1 %v2000_v1 }
  0x29   : > { %712 = vmatpush1.bf16.msra.mxu0 %v1887_v10  ;;  %1862 = vmatpush1.bf16.msra.mxu1 %v1887_v10  ;;  %v1982_v10 = vld [vmem:[%s2058_s28 + $0x1e4] ss:$8 sps:$4 sm:$0xff]  }
  0x2a   : > { %713 = vmatprep.subr.bf16.mxu0 %v2000_v1  ;;  %1847 = vmatprep.subr.bf16.mxu1 %v2000_v1 }
  0x2d   : > { %714 = vmatpush2.bf16.msra.mxu0 %v1888_v11  ;;  %1863 = vmatpush2.bf16.msra.mxu1 %v1888_v11  ;;  %v1984_v11 = vld [vmem:[%s2058_s28 + $0xe0] ss:$8 sps:$4 sm:$0xff]  }
  0x2e   : > { %715 = vmatprep.subr.bf16.mxu0 %v2000_v1  ;;  %1848 = vmatprep.subr.bf16.mxu1 %v2000_v1 }
  0x31   : > { %716 = vmatpush2.bf16.msra.mxu0 %v1889_v12  ;;  %1864 = vmatpush2.bf16.msra.mxu1 %v1889_v12  ;;  %v1985_v12 = vld [vmem:[%s2058_s28 + $0x1e0] ss:$8 sps:$4 sm:$0xff]  }
  0x32   : > { %717 = vmatprep.subr.bf16.mxu0 %v2000_v1  ;;  %1849 = vmatprep.subr.bf16.mxu1 %v2000_v1 }
  0x35   : > { %718 = vmatpush2.bf16.msra.mxu0 %v1890_v13  ;;  %1865 = vmatpush2.bf16.msra.mxu1 %v1890_v13  ;;  %v1986_v13 = vld [vmem:[%s2058_s28 + $0xf4] ss:$8 sps:$4 sm:$0xff]  }
  0x36   : > { %719 = vmatprep.subr.bf16.mxu0 %v2000_v1  ;;  %1850 = vmatprep.subr.bf16.mxu1 %v2000_v1 }
  0x39   : > { %720 = vmatpush2.bf16.msra.mxu0 %v1891_v14  ;;  %1866 = vmatpush2.bf16.msra.mxu1 %v1891_v14  ;;  %v1988_v14 = vld [vmem:[%s2058_s28 + $0x1f4] ss:$8 sps:$4 sm:$0xff]  }
  0x3a   : > { %721 = vmatprep.subr.bf16.mxu0 %v2000_v1  ;;  %1851 = vmatprep.subr.bf16.mxu1 %v2000_v1 }
  0x3d   : > { %722 = vmatpush2.bf16.msra.mxu0 %v1892_v15  ;;  %1867 = vmatpush2.bf16.msra.mxu1 %v1892_v15  ;;  %v1990_v15 = vld [vmem:[%s2058_s28 + $0xf0] ss:$8 sps:$4 sm:$0xff]  }
  0x3e   : > { %723 = vmatprep.subr.bf16.mxu0 %v2000_v1  ;;  %1852 = vmatprep.subr.bf16.mxu1 %v2000_v1 }
  0x41   : > { %724 = vmatpush2.bf16.msra.mxu0 %v1893_v16  ;;  %1868 = vmatpush2.bf16.msra.mxu1 %v1893_v16  ;;  %v1991_v16 = vld [vmem:[%s2058_s28 + $0x1f0] ss:$8 sps:$4 sm:$0xff]  }
  0x42   : > { %725 = vmatprep.subr.bf16.mxu0 %v2000_v1  ;;  %1853 = vmatprep.subr.bf16.mxu1 %v2000_v1 }
  0x45   : > { %726 = vmatpush2.bf16.msra.mxu0 %v1894_v17  ;;  %1869 = vmatpush2.bf16.msra.mxu1 %v1894_v17  ;;  %v2184_v17 = vld [vmem:[%s2293_s2] ss:$0 sm:$0xff] }
  0x46   : > { %727 = vmatprep.subr.bf16.mxu0 %v2000_v1  ;;  %1854 = vmatprep.subr.bf16.mxu1 %v2000_v1  ;;  %v1968_v1 = vld [vmem:[%s2058_s28 + $0xc4] ss:$8 sps:$4 sm:$0xff]  }
  0x49   : > { %728 = vmatpush2.bf16.msra.mxu0 %v1895_v18  ;;  %1870 = vmatpush2.bf16.msra.mxu1 %v1895_v18 }
  0x4c   : > { %730 = vmatmul.mubr.bf16.vlgmr.msra.gmra.mxu0 %v1896_v19  ;;  %858 = vmatmul.mubr.bf16.vlgmr.msra.gmra.mxu1 %v1899_v20 }
  0x4d   : > { %737 = vmatprep.mubr.bf16.mxu0 %v1902_v21  ;;  %865 = vmatprep.mubr.bf16.mxu1 %v1904_v22 }
  0x54   : > { %738 = vmatmul.mubr.bf16.gmra.mxu0 %v1906_v23  ;;  %866 = vmatmul.mubr.bf16.gmra.mxu1 %v1907_v24 }
  0x55   : > { %745 = vmatprep.mubr.bf16.mxu0 %v1908_v25  ;;  %873 = vmatprep.mubr.bf16.mxu1 %v1910_v26 }
  0x5c   : > { %746 = vmatmul.mubr.bf16.gmra.mxu0 %v1912_v27  ;;  %874 = vmatmul.mubr.bf16.gmra.mxu1 %v1913_v28 }
  0x5d   : > { %753 = vmatprep.mubr.bf16.mxu0 %v1914_v29  ;;  %881 = vmatprep.mubr.bf16.mxu1 %v1916_v30 }
  0x64   : > { %754 = vmatmul.mubr.bf16.gmra.mxu0 %v1918_v31  ;;  %882 = vmatmul.mubr.bf16.gmra.mxu1 %v1919_v32 }
  0x65   : > { %761 = vmatprep.mubr.bf16.mxu0 %v1920_v33  ;;  %889 = vmatprep.mubr.bf16.mxu1 %v1922_v34 }
  0x6c   : > { %762 = vmatmul.mubr.bf16.gmra.mxu0 %v1924_v35  ;;  %890 = vmatmul.mubr.bf16.gmra.mxu1 %v1925_v36 }
  0x6d   : > { %769 = vmatprep.mubr.bf16.mxu0 %v1926_v37  ;;  %897 = vmatprep.mubr.bf16.mxu1 %v1928_v38 }
  0x74   : > { %770 = vmatmul.mubr.bf16.gmra.mxu0 %v1930_v39  ;;  %898 = vmatmul.mubr.bf16.gmra.mxu1 %v1931_v40 }
  0x75   : > { %777 = vmatprep.mubr.bf16.mxu0 %v1932_v41  ;;  %905 = vmatprep.mubr.bf16.mxu1 %v1934_v42 }
  0x7c   : > { %778 = vmatmul.mubr.bf16.gmra.mxu0 %v1936_v43  ;;  %906 = vmatmul.mubr.bf16.gmra.mxu1 %v1937_v44 }
  0x7d   : > { %785 = vmatprep.mubr.bf16.mxu0 %v1938_v45  ;;  %913 = vmatprep.mubr.bf16.mxu1 %v1940_v46 }
  0x84   : > { %786 = vmatmul.mubr.bf16.gmra.mxu0 %v1942_v47  ;;  %914 = vmatmul.mubr.bf16.gmra.mxu1 %v1943_v48 }
  0x85   : > { %793 = vmatprep.mubr.bf16.mxu0 %v1944_v49  ;;  %921 = vmatprep.mubr.bf16.mxu1 %v1946_v50 }
  0x8c   : > { %794 = vmatmul.mubr.bf16.gmra.mxu0 %v1948_v51  ;;  %922 = vmatmul.mubr.bf16.gmra.mxu1 %v1949_v52 }
  0x8d   : > { %801 = vmatprep.mubr.bf16.mxu0 %v1950_v53  ;;  %929 = vmatprep.mubr.bf16.mxu1 %v1952_v54 }
  0x94   : > { %802 = vmatmul.mubr.bf16.gmra.mxu0 %v1954_v55  ;;  %930 = vmatmul.mubr.bf16.gmra.mxu1 %v1955_v56 }
  0x95   : > { %809 = vmatprep.mubr.bf16.mxu0 %v1956_v57  ;;  %937 = vmatprep.mubr.bf16.mxu1 %v1958_v58 }
  0x9c   : > { %810 = vmatmul.mubr.bf16.gmra.mxu0 %v1960_v59  ;;  %938 = vmatmul.mubr.bf16.gmra.mxu1 %v1961_v60 }
  0x9d   : > { %817 = vmatprep.mubr.bf16.mxu0 %v1962_v61  ;;  %945 = vmatprep.mubr.bf16.mxu1 %v1964_v62 }
  0xa4   : > { %818 = vmatmul.mubr.bf16.gmra.mxu0 %v1966_v63  ;;  %946 = vmatmul.mubr.bf16.gmra.mxu1 %v1967_v0 }
  0xa5   : > { %825 = vmatprep.mubr.bf16.mxu0 %v1968_v1  ;;  %953 = vmatprep.mubr.bf16.mxu1 %v1970_v2 }
  0xac   : > { %826 = vmatmul.mubr.bf16.gmra.mxu0 %v1972_v3  ;;  %954 = vmatmul.mubr.bf16.gmra.mxu1 %v1973_v4 }
  0xad   : > { %833 = vmatprep.mubr.bf16.mxu0 %v1974_v5  ;;  %961 = vmatprep.mubr.bf16.mxu1 %v1976_v6 }
  0xb4   : > { %834 = vmatmul.mubr.bf16.gmra.mxu0 %v1978_v7  ;;  %962 = vmatmul.mubr.bf16.gmra.mxu1 %v1979_v8 }
  0xb5   : > { %841 = vmatprep.mubr.bf16.mxu0 %v1980_v9  ;;  %969 = vmatprep.mubr.bf16.mxu1 %v1982_v10 }
  0xbc   : > { %842 = vmatmul.mubr.bf16.gmra.mxu0 %v1984_v11  ;;  %970 = vmatmul.mubr.bf16.gmra.mxu1 %v1985_v12 }
  0xbd   : > { %849 = vmatprep.mubr.bf16.mxu0 %v1986_v13  ;;  %977 = vmatprep.mubr.bf16.mxu1 %v1988_v14 }
  0xc4   : > { %850 = vmatmul.mubr.bf16.gmra.mxu0 %v1990_v15  ;;  %978 = vmatmul.mubr.bf16.gmra.mxu1 %v1991_v16 }
 0x10c   : > { %v731_v18 = vpop.f32.mrf.mxu0  ;;  %v859_v19 = vpop.f32.mrf.mxu1 }
 0x10d   : > { %v732_v22 = vadd.f32 %v2184_v17, %v731_v18  ;;  %v860_v23 = vadd.f32 %v2184_v17, %v859_v19 }
 0x10e   : > { %v733_v20 = vpop.f32.mrf.mxu0  ;;  %v861_v21 = vpop.f32.mrf.mxu1 }
 0x10f   : > { %v986_v30 = vmax.f32 %v732_v22, 0.0  ;;  %v1018_v31 = vmax.f32 %v860_v23, 0.0 }
 0x110   : > { %v734_v24 = vpop.f32.mrf.mxu0  ;;  %v862_v25 = vpop.f32.mrf.mxu1 }
 0x111   : > { %v735_v26 = vadd.f32 %v2184_v17, %v734_v24  ;;  %v863_v27 = vadd.f32 %v2184_v17, %v862_v25 }
 0x112   : > { %v736_v28 = vpop.f32.mrf.mxu0  ;;  %v864_v29 = vpop.f32.mrf.mxu1 }
 0x113   : > { %v987_v32 = vmax.f32 %v735_v26, 0.0  ;;  %v1019_v33 = vmax.f32 %v863_v27, 0.0 }
 0x114   : > { %v739_v34 = vpop.f32.mrf.mxu0  ;;  %v867_v35 = vpop.f32.mrf.mxu1 }
 0x115   : > { %v1651_v36 = vpack.c.bf16 %v987_v32, %v986_v30  ;;  %v1731_v37 = vpack.c.bf16 %v1019_v33, %v1018_v31  ;;  %v740_v40 = vadd.f32 %v2184_v17, %v739_v34  ;;  %v868_v41 = vadd.f32 %v2184_v17, %v867_v35 }
 0x116   : > { %v741_v38 = vpop.f32.mrf.mxu0  ;;  %v869_v39 = vpop.f32.mrf.mxu1 }
 0x117   : > { %1652 = vst [vmem:[%s2194_s4] sm:$0xff] %v1651_v36   ;;  %1823 = vst [vmem:[%s2194_s4 + $0x80] sm:$0xff] %v1731_v37   ;;  %v988_v48 = vmax.f32 %v740_v40, 0.0  ;;  %v1020_v49 = vmax.f32 %v868_v41, 0.0 }
 0x118   : > { %v742_v42 = vpop.f32.mrf.mxu0  ;;  %v870_v43 = vpop.f32.mrf.mxu1 }
 0x119   : > { %v743_v44 = vadd.f32 %v2184_v17, %v742_v42  ;;  %v871_v45 = vadd.f32 %v2184_v17, %v870_v43 }
 0x11a   : > { %v744_v46 = vpop.f32.mrf.mxu0  ;;  %v872_v47 = vpop.f32.mrf.mxu1 }
 0x11b   : > { %v989_v50 = vmax.f32 %v743_v44, 0.0  ;;  %v1021_v51 = vmax.f32 %v871_v45, 0.0 }
 0x11c   : > { %v747_v52 = vpop.f32.mrf.mxu0  ;;  %v875_v53 = vpop.f32.mrf.mxu1 }
 0x11d   : > { %v1656_v54 = vpack.c.bf16 %v989_v50, %v988_v48  ;;  %v1736_v55 = vpack.c.bf16 %v1021_v51, %v1020_v49  ;;  %v748_v58 = vadd.f32 %v2184_v17, %v747_v52  ;;  %v876_v59 = vadd.f32 %v2184_v17, %v875_v53 }
 0x11e   : > { %v749_v56 = vpop.f32.mrf.mxu0  ;;  %v877_v57 = vpop.f32.mrf.mxu1 }
 0x11f   : > { %1808 = vst [vmem:[%s2194_s4 + $0x8] sm:$0xff] %v1656_v54   ;;  %1824 = vst [vmem:[%s2194_s4 + $0x88] sm:$0xff] %v1736_v55   ;;  %v990_v2 = vmax.f32 %v748_v58, 0.0  ;;  %v1022_v3 = vmax.f32 %v876_v59, 0.0 }
 0x120   : > { %v750_v60 = vpop.f32.mrf.mxu0  ;;  %v878_v61 = vpop.f32.mrf.mxu1 }
 0x121   : > { %v751_v62 = vadd.f32 %v2184_v17, %v750_v60  ;;  %v879_v63 = vadd.f32 %v2184_v17, %v878_v61 }
 0x122   : > { %v752_v0 = vpop.f32.mrf.mxu0  ;;  %v880_v1 = vpop.f32.mrf.mxu1 }
 0x123   : > { %v991_v4 = vmax.f32 %v751_v62, 0.0  ;;  %v1023_v5 = vmax.f32 %v879_v63, 0.0 }
 0x124   : > { %v755_v6 = vpop.f32.mrf.mxu0  ;;  %v883_v7 = vpop.f32.mrf.mxu1 }
 0x125   : > { %v1661_v8 = vpack.c.bf16 %v991_v4, %v990_v2  ;;  %v1741_v9 = vpack.c.bf16 %v1023_v5, %v1022_v3  ;;  %v756_v12 = vadd.f32 %v2184_v17, %v755_v6  ;;  %v884_v13 = vadd.f32 %v2184_v17, %v883_v7 }
 0x126   : > { %v757_v10 = vpop.f32.mrf.mxu0  ;;  %v885_v11 = vpop.f32.mrf.mxu1 }
 0x127   : > { %1809 = vst [vmem:[%s2194_s4 + $0x10] sm:$0xff] %v1661_v8   ;;  %1825 = vst [vmem:[%s2194_s4 + $0x90] sm:$0xff] %v1741_v9   ;;  %v992_v21 = vmax.f32 %v756_v12, 0.0  ;;  %v1024_v22 = vmax.f32 %v884_v13, 0.0 }
 0x128   : > { %v758_v14 = vpop.f32.mrf.mxu0  ;;  %v886_v15 = vpop.f32.mrf.mxu1 }
 0x129   : > { %v759_v16 = vadd.f32 %v2184_v17, %v758_v14  ;;  %v887_v18 = vadd.f32 %v2184_v17, %v886_v15 }
 0x12a   : > { %v760_v19 = vpop.f32.mrf.mxu0  ;;  %v888_v20 = vpop.f32.mrf.mxu1 }
 0x12b   : > { %v993_v23 = vmax.f32 %v759_v16, 0.0  ;;  %v1025_v24 = vmax.f32 %v887_v18, 0.0 }
 0x12c   : > { %v763_v25 = vpop.f32.mrf.mxu0  ;;  %v891_v26 = vpop.f32.mrf.mxu1 }
 0x12d   : > { %v1666_v27 = vpack.c.bf16 %v993_v23, %v992_v21  ;;  %v1746_v28 = vpack.c.bf16 %v1025_v24, %v1024_v22  ;;  %v764_v31 = vadd.f32 %v2184_v17, %v763_v25  ;;  %v892_v32 = vadd.f32 %v2184_v17, %v891_v26 }
 0x12e   : > { %v765_v29 = vpop.f32.mrf.mxu0  ;;  %v893_v30 = vpop.f32.mrf.mxu1 }
 0x12f   : > { %1810 = vst [vmem:[%s2194_s4 + $0x18] sm:$0xff] %v1666_v27   ;;  %1826 = vst [vmem:[%s2194_s4 + $0x98] sm:$0xff] %v1746_v28   ;;  %v994_v39 = vmax.f32 %v764_v31, 0.0  ;;  %v1026_v40 = vmax.f32 %v892_v32, 0.0 }
 0x130   : > { %v766_v33 = vpop.f32.mrf.mxu0  ;;  %v894_v34 = vpop.f32.mrf.mxu1 }
 0x131   : > { %v767_v35 = vadd.f32 %v2184_v17, %v766_v33  ;;  %v895_v36 = vadd.f32 %v2184_v17, %v894_v34 }
 0x132   : > { %v768_v37 = vpop.f32.mrf.mxu0  ;;  %v896_v38 = vpop.f32.mrf.mxu1 }
 0x133   : > { %v995_v41 = vmax.f32 %v767_v35, 0.0  ;;  %v1027_v42 = vmax.f32 %v895_v36, 0.0 }
 0x134   : > { %v771_v43 = vpop.f32.mrf.mxu0  ;;  %v899_v44 = vpop.f32.mrf.mxu1 }
 0x135   : > { %v1671_v45 = vpack.c.bf16 %v995_v41, %v994_v39  ;;  %v1751_v46 = vpack.c.bf16 %v1027_v42, %v1026_v40  ;;  %v772_v49 = vadd.f32 %v2184_v17, %v771_v43  ;;  %v900_v50 = vadd.f32 %v2184_v17, %v899_v44 }
 0x136   : > { %v773_v47 = vpop.f32.mrf.mxu0  ;;  %v901_v48 = vpop.f32.mrf.mxu1 }
 0x137   : > { %1811 = vst [vmem:[%s2194_s4 + $0x20] sm:$0xff] %v1671_v45   ;;  %1827 = vst [vmem:[%s2194_s4 + $0xa0] sm:$0xff] %v1751_v46   ;;  %v996_v57 = vmax.f32 %v772_v49, 0.0  ;;  %v1028_v58 = vmax.f32 %v900_v50, 0.0 }
 0x138   : > { %v774_v51 = vpop.f32.mrf.mxu0  ;;  %v902_v52 = vpop.f32.mrf.mxu1 }
 0x139   : > { %v775_v53 = vadd.f32 %v2184_v17, %v774_v51  ;;  %v903_v54 = vadd.f32 %v2184_v17, %v902_v52 }
 0x13a   : > { %v776_v55 = vpop.f32.mrf.mxu0  ;;  %v904_v56 = vpop.f32.mrf.mxu1 }
 0x13b   : > { %v997_v59 = vmax.f32 %v775_v53, 0.0  ;;  %v1029_v60 = vmax.f32 %v903_v54, 0.0 }
 0x13c   : > { %v779_v61 = vpop.f32.mrf.mxu0  ;;  %v907_v62 = vpop.f32.mrf.mxu1 }
 0x13d   : > { %v1676_v63 = vpack.c.bf16 %v997_v59, %v996_v57  ;;  %v1756_v0 = vpack.c.bf16 %v1029_v60, %v1028_v58  ;;  %v780_v3 = vadd.f32 %v2184_v17, %v779_v61  ;;  %v908_v4 = vadd.f32 %v2184_v17, %v907_v62 }
 0x13e   : > { %v781_v1 = vpop.f32.mrf.mxu0  ;;  %v909_v2 = vpop.f32.mrf.mxu1 }
 0x13f   : > { %1812 = vst [vmem:[%s2194_s4 + $0x28] sm:$0xff] %v1676_v63   ;;  %1828 = vst [vmem:[%s2194_s4 + $0xa8] sm:$0xff] %v1756_v0   ;;  %v998_v11 = vmax.f32 %v780_v3, 0.0  ;;  %v1030_v12 = vmax.f32 %v908_v4, 0.0 }
 0x140   : > { %v782_v5 = vpop.f32.mrf.mxu0  ;;  %v910_v6 = vpop.f32.mrf.mxu1 }
 0x141   : > { %v783_v7 = vadd.f32 %v2184_v17, %v782_v5  ;;  %v911_v8 = vadd.f32 %v2184_v17, %v910_v6 }
 0x142   : > { %v784_v9 = vpop.f32.mrf.mxu0  ;;  %v912_v10 = vpop.f32.mrf.mxu1 }
 0x143   : > { %v999_v13 = vmax.f32 %v783_v7, 0.0  ;;  %v1031_v14 = vmax.f32 %v911_v8, 0.0 }
 0x144   : > { %v787_v15 = vpop.f32.mrf.mxu0  ;;  %v915_v16 = vpop.f32.mrf.mxu1 }
 0x145   : > { %v1681_v18 = vpack.c.bf16 %v999_v13, %v998_v11  ;;  %v1761_v19 = vpack.c.bf16 %v1031_v14, %v1030_v12  ;;  %v788_v22 = vadd.f32 %v2184_v17, %v787_v15  ;;  %v916_v23 = vadd.f32 %v2184_v17, %v915_v16 }
 0x146   : > { %v789_v20 = vpop.f32.mrf.mxu0  ;;  %v917_v21 = vpop.f32.mrf.mxu1 }
 0x147   : > { %1813 = vst [vmem:[%s2194_s4 + $0x30] sm:$0xff] %v1681_v18   ;;  %1829 = vst [vmem:[%s2194_s4 + $0xb0] sm:$0xff] %v1761_v19   ;;  %v1000_v30 = vmax.f32 %v788_v22, 0.0  ;;  %v1032_v31 = vmax.f32 %v916_v23, 0.0 }
 0x148   : > { %v790_v24 = vpop.f32.mrf.mxu0  ;;  %v918_v25 = vpop.f32.mrf.mxu1 }
 0x149   : > { %v791_v26 = vadd.f32 %v2184_v17, %v790_v24  ;;  %v919_v27 = vadd.f32 %v2184_v17, %v918_v25 }
 0x14a   : > { %v792_v28 = vpop.f32.mrf.mxu0  ;;  %v920_v29 = vpop.f32.mrf.mxu1 }
 0x14b   : > { %v1001_v32 = vmax.f32 %v791_v26, 0.0  ;;  %v1033_v33 = vmax.f32 %v919_v27, 0.0 }
 0x14c   : > { %v795_v34 = vpop.f32.mrf.mxu0  ;;  %v923_v35 = vpop.f32.mrf.mxu1 }
 0x14d   : > { %v1686_v36 = vpack.c.bf16 %v1001_v32, %v1000_v30  ;;  %v1766_v37 = vpack.c.bf16 %v1033_v33, %v1032_v31  ;;  %v796_v40 = vadd.f32 %v2184_v17, %v795_v34  ;;  %v924_v41 = vadd.f32 %v2184_v17, %v923_v35 }
 0x14e   : > { %v797_v38 = vpop.f32.mrf.mxu0  ;;  %v925_v39 = vpop.f32.mrf.mxu1 }
 0x14f   : > { %1814 = vst [vmem:[%s2194_s4 + $0x38] sm:$0xff] %v1686_v36   ;;  %1830 = vst [vmem:[%s2194_s4 + $0xb8] sm:$0xff] %v1766_v37   ;;  %v1002_v48 = vmax.f32 %v796_v40, 0.0  ;;  %v1034_v49 = vmax.f32 %v924_v41, 0.0 }
 0x150   : > { %v798_v42 = vpop.f32.mrf.mxu0  ;;  %v926_v43 = vpop.f32.mrf.mxu1 }
 0x151   : > { %v799_v44 = vadd.f32 %v2184_v17, %v798_v42  ;;  %v927_v45 = vadd.f32 %v2184_v17, %v926_v43 }
 0x152   : > { %v800_v46 = vpop.f32.mrf.mxu0  ;;  %v928_v47 = vpop.f32.mrf.mxu1 }
 0x153   : > { %v1003_v50 = vmax.f32 %v799_v44, 0.0  ;;  %v1035_v51 = vmax.f32 %v927_v45, 0.0 }
 0x154   : > { %v803_v52 = vpop.f32.mrf.mxu0  ;;  %v931_v53 = vpop.f32.mrf.mxu1 }
 0x155   : > { %v1691_v54 = vpack.c.bf16 %v1003_v50, %v1002_v48  ;;  %v1771_v55 = vpack.c.bf16 %v1035_v51, %v1034_v49  ;;  %v804_v58 = vadd.f32 %v2184_v17, %v803_v52  ;;  %v932_v59 = vadd.f32 %v2184_v17, %v931_v53 }
 0x156   : > { %v805_v56 = vpop.f32.mrf.mxu0  ;;  %v933_v57 = vpop.f32.mrf.mxu1 }
 0x157   : > { %1815 = vst [vmem:[%s2194_s4 + $0x40] sm:$0xff] %v1691_v54   ;;  %1831 = vst [vmem:[%s2194_s4 + $0xc0] sm:$0xff] %v1771_v55   ;;  %v1004_v2 = vmax.f32 %v804_v58, 0.0  ;;  %v1036_v3 = vmax.f32 %v932_v59, 0.0 }
 0x158   : > { %v806_v60 = vpop.f32.mrf.mxu0  ;;  %v934_v61 = vpop.f32.mrf.mxu1 }
 0x159   : > { %v807_v62 = vadd.f32 %v2184_v17, %v806_v60  ;;  %v935_v63 = vadd.f32 %v2184_v17, %v934_v61 }
 0x15a   : > { %v808_v0 = vpop.f32.mrf.mxu0  ;;  %v936_v1 = vpop.f32.mrf.mxu1 }
 0x15b   : > { %v1005_v4 = vmax.f32 %v807_v62, 0.0  ;;  %v1037_v5 = vmax.f32 %v935_v63, 0.0 }
 0x15c   : > { %v811_v6 = vpop.f32.mrf.mxu0  ;;  %v939_v7 = vpop.f32.mrf.mxu1 }
 0x15d   : > { %v1696_v8 = vpack.c.bf16 %v1005_v4, %v1004_v2  ;;  %v1776_v9 = vpack.c.bf16 %v1037_v5, %v1036_v3  ;;  %v812_v12 = vadd.f32 %v2184_v17, %v811_v6  ;;  %v940_v13 = vadd.f32 %v2184_v17, %v939_v7 }
 0x15e   : > { %v813_v10 = vpop.f32.mrf.mxu0  ;;  %v941_v11 = vpop.f32.mrf.mxu1 }
 0x15f   : > { %1816 = vst [vmem:[%s2194_s4 + $0x48] sm:$0xff] %v1696_v8   ;;  %1832 = vst [vmem:[%s2194_s4 + $0xc8] sm:$0xff] %v1776_v9   ;;  %v1006_v21 = vmax.f32 %v812_v12, 0.0  ;;  %v1038_v22 = vmax.f32 %v940_v13, 0.0 }
 0x160   : > { %v814_v14 = vpop.f32.mrf.mxu0  ;;  %v942_v15 = vpop.f32.mrf.mxu1 }
 0x161   : > { %v815_v16 = vadd.f32 %v2184_v17, %v814_v14  ;;  %v943_v18 = vadd.f32 %v2184_v17, %v942_v15 }
 0x162   : > { %v816_v19 = vpop.f32.mrf.mxu0  ;;  %v944_v20 = vpop.f32.mrf.mxu1 }
 0x163   : > { %v1007_v23 = vmax.f32 %v815_v16, 0.0  ;;  %v1039_v24 = vmax.f32 %v943_v18, 0.0 }
 0x164   : > { %v819_v25 = vpop.f32.mrf.mxu0  ;;  %v947_v26 = vpop.f32.mrf.mxu1 }
 0x165   : > { %v1701_v27 = vpack.c.bf16 %v1007_v23, %v1006_v21  ;;  %v1781_v28 = vpack.c.bf16 %v1039_v24, %v1038_v22  ;;  %v820_v31 = vadd.f32 %v2184_v17, %v819_v25  ;;  %v948_v32 = vadd.f32 %v2184_v17, %v947_v26 }
 0x166   : > { %v821_v29 = vpop.f32.mrf.mxu0  ;;  %v949_v30 = vpop.f32.mrf.mxu1 }
 0x167   : > { %1817 = vst [vmem:[%s2194_s4 + $0x50] sm:$0xff] %v1701_v27   ;;  %1833 = vst [vmem:[%s2194_s4 + $0xd0] sm:$0xff] %v1781_v28   ;;  %v1008_v39 = vmax.f32 %v820_v31, 0.0  ;;  %v1040_v40 = vmax.f32 %v948_v32, 0.0 }
 0x168   : > { %v822_v33 = vpop.f32.mrf.mxu0  ;;  %v950_v34 = vpop.f32.mrf.mxu1 }
 0x169   : > { %v823_v35 = vadd.f32 %v2184_v17, %v822_v33  ;;  %v951_v36 = vadd.f32 %v2184_v17, %v950_v34 }
 0x16a   : > { %v824_v37 = vpop.f32.mrf.mxu0  ;;  %v952_v38 = vpop.f32.mrf.mxu1 }
 0x16b   : > { %v1009_v41 = vmax.f32 %v823_v35, 0.0  ;;  %v1041_v42 = vmax.f32 %v951_v36, 0.0 }
 0x16c   : > { %v827_v43 = vpop.f32.mrf.mxu0  ;;  %v955_v44 = vpop.f32.mrf.mxu1 }
 0x16d   : > { %v1706_v45 = vpack.c.bf16 %v1009_v41, %v1008_v39  ;;  %v1786_v46 = vpack.c.bf16 %v1041_v42, %v1040_v40  ;;  %v828_v49 = vadd.f32 %v2184_v17, %v827_v43  ;;  %v956_v50 = vadd.f32 %v2184_v17, %v955_v44 }
 0x16e   : > { %v829_v47 = vpop.f32.mrf.mxu0  ;;  %v957_v48 = vpop.f32.mrf.mxu1 }
 0x16f   : > { %1818 = vst [vmem:[%s2194_s4 + $0x58] sm:$0xff] %v1706_v45   ;;  %1834 = vst [vmem:[%s2194_s4 + $0xd8] sm:$0xff] %v1786_v46   ;;  %v1010_v57 = vmax.f32 %v828_v49, 0.0  ;;  %v1042_v58 = vmax.f32 %v956_v50, 0.0 }
 0x170   : > { %v830_v51 = vpop.f32.mrf.mxu0  ;;  %v958_v52 = vpop.f32.mrf.mxu1 }
 0x171   : > { %v831_v53 = vadd.f32 %v2184_v17, %v830_v51  ;;  %v959_v54 = vadd.f32 %v2184_v17, %v958_v52 }
 0x172   : > { %v832_v55 = vpop.f32.mrf.mxu0  ;;  %v960_v56 = vpop.f32.mrf.mxu1 }
 0x173   : > { %v1011_v59 = vmax.f32 %v831_v53, 0.0  ;;  %v1043_v60 = vmax.f32 %v959_v54, 0.0 }
 0x174   : > { %v835_v61 = vpop.f32.mrf.mxu0  ;;  %v963_v62 = vpop.f32.mrf.mxu1 }
 0x175   : > { %v1711_v63 = vpack.c.bf16 %v1011_v59, %v1010_v57  ;;  %v1791_v0 = vpack.c.bf16 %v1043_v60, %v1042_v58  ;;  %v836_v3 = vadd.f32 %v2184_v17, %v835_v61  ;;  %v964_v4 = vadd.f32 %v2184_v17, %v963_v62 }
 0x176   : > { %v837_v1 = vpop.f32.mrf.mxu0  ;;  %v965_v2 = vpop.f32.mrf.mxu1 }
 0x177   : > { %1819 = vst [vmem:[%s2194_s4 + $0x60] sm:$0xff] %v1711_v63   ;;  %1835 = vst [vmem:[%s2194_s4 + $0xe0] sm:$0xff] %v1791_v0   ;;  %v1012_v11 = vmax.f32 %v836_v3, 0.0  ;;  %v1044_v12 = vmax.f32 %v964_v4, 0.0 }
 0x178   : > { %v838_v5 = vpop.f32.mrf.mxu0  ;;  %v966_v6 = vpop.f32.mrf.mxu1 }
 0x179   : > { %v839_v7 = vadd.f32 %v2184_v17, %v838_v5  ;;  %v967_v8 = vadd.f32 %v2184_v17, %v966_v6 }
 0x17a   : > { %v840_v9 = vpop.f32.mrf.mxu0  ;;  %v968_v10 = vpop.f32.mrf.mxu1 }
 0x17b   : > { %v1013_v13 = vmax.f32 %v839_v7, 0.0  ;;  %v1045_v14 = vmax.f32 %v967_v8, 0.0 }
 0x17c   : > { %v843_v15 = vpop.f32.mrf.mxu0  ;;  %v971_v16 = vpop.f32.mrf.mxu1 }
 0x17d   : > { %v1716_v18 = vpack.c.bf16 %v1013_v13, %v1012_v11  ;;  %v1796_v19 = vpack.c.bf16 %v1045_v14, %v1044_v12  ;;  %v844_v22 = vadd.f32 %v2184_v17, %v843_v15  ;;  %v972_v23 = vadd.f32 %v2184_v17, %v971_v16 }
 0x17e   : > { %v845_v20 = vpop.f32.mrf.mxu0  ;;  %v973_v21 = vpop.f32.mrf.mxu1 }
 0x17f   : > { %1820 = vst [vmem:[%s2194_s4 + $0x68] sm:$0xff] %v1716_v18   ;;  %1836 = vst [vmem:[%s2194_s4 + $0xe8] sm:$0xff] %v1796_v19   ;;  %v1014_v30 = vmax.f32 %v844_v22, 0.0  ;;  %v1046_v31 = vmax.f32 %v972_v23, 0.0 }
 0x180   : > { %v846_v24 = vpop.f32.mrf.mxu0  ;;  %v974_v25 = vpop.f32.mrf.mxu1 }
 0x181   : > { %v847_v26 = vadd.f32 %v2184_v17, %v846_v24  ;;  %v975_v27 = vadd.f32 %v2184_v17, %v974_v25 }
 0x182   : > { %v848_v28 = vpop.f32.mrf.mxu0  ;;  %v976_v29 = vpop.f32.mrf.mxu1 }
 0x183   : > { %v1015_v32 = vmax.f32 %v847_v26, 0.0  ;;  %v1047_v33 = vmax.f32 %v975_v27, 0.0 }
 0x184   : > { %v851_v34 = vpop.f32.mrf.mxu0  ;;  %v979_v35 = vpop.f32.mrf.mxu1 }
 0x185   : > { %v1721_v36 = vpack.c.bf16 %v1015_v32, %v1014_v30  ;;  %v1801_v37 = vpack.c.bf16 %v1047_v33, %v1046_v31  ;;  %v852_v40 = vadd.f32 %v2184_v17, %v851_v34  ;;  %v980_v41 = vadd.f32 %v2184_v17, %v979_v35 }
 0x186   : > { %v853_v38 = vpop.f32.mrf.mxu0  ;;  %v981_v39 = vpop.f32.mrf.mxu1 }
 0x187   : > { %1821 = vst [vmem:[%s2194_s4 + $0x70] sm:$0xff] %v1721_v36   ;;  %1837 = vst [vmem:[%s2194_s4 + $0xf0] sm:$0xff] %v1801_v37   ;;  %v1016_v48 = vmax.f32 %v852_v40, 0.0  ;;  %v1048_v49 = vmax.f32 %v980_v41, 0.0 }
 0x188   : > { %v854_v42 = vpop.f32.mrf.mxu0  ;;  %v982_v43 = vpop.f32.mrf.mxu1 }
 0x189   : > { %v855_v44 = vadd.f32 %v2184_v17, %v854_v42  ;;  %v983_v45 = vadd.f32 %v2184_v17, %v982_v43 }
 0x18a   : > { %v856_v46 = vpop.f32.mrf.mxu0  ;;  %v984_v47 = vpop.f32.mrf.mxu1 }
 0x18b   : > { %v1017_v50 = vmax.f32 %v855_v44, 0.0  ;;  %v1049_v51 = vmax.f32 %v983_v45, 0.0 }
 0x18d   : > { %v1726_v52 = vpack.c.bf16 %v1017_v50, %v1016_v48  ;;  %v1806_v53 = vpack.c.bf16 %v1049_v51, %v1048_v49 }
 0x18f   : > { %1822 = vst [vmem:[%s2194_s4 + $0x78] sm:$0xff] %v1726_v52   ;;  %1838 = vst [vmem:[%s2194_s4 + $0xf8] sm:$0xff] %v1806_v53  }
 0x190 PF: > { %s13_s12 = sadd.s32 1, %s1998_s12  }
 0x191   : > { %p10_p4 = scmp.ge.s32.totalorder %s13_s12, 4  }
 0x193   :  { %12 = sbr.rel (!%p10_p4) target bundleno = 1 (0x1), region = 62 }

// kernel: ppo_forward.5
= control target key start
LH: loop header
LB: loop body
LE: loop exit
PB: predicated region body
PF: predicated region fallthrough
CT: control target
= control target key end

     0   :  { %s1676_s1 = inlined_call_operand.vmem [shape: bf16[512,128], index: 1, kind: input, shape index: {}]   ;;  %s1677_s0 = inlined_call_operand.vmem [shape: bf16[176,512], index: 0, kind: input, shape index: {}]   ;;  %s1678_s2 = inlined_call_operand.vmem [shape: f32[1,128], index: 2, kind: input, shape index: {}]   ;;  %s1679_s3 = inlined_call_operand.vmem [shape: bf16[176,128], index: 3, kind: output, shape index: {}]  }
   0x1   :  { %v1270_v0 = vld [vmem:[%s1676_s1 + $0x78] sm:$0xff]   ;;  %v1274_v4 = vld [vmem:[%s1676_s1 + $0x70] sm:$0xff]   ;;  %v1278_v8 = vld [vmem:[%s1676_s1 + $0x68] sm:$0xff]  }
   0x2   :  { %v1271_v1 = vld [vmem:[%s1676_s1 + $0xf8] sm:$0xff]   ;;  %1106 = vmatprep.subr.bf16.mxu0 %v1270_v0  ;;  %v1275_v5 = vld [vmem:[%s1676_s1 + $0xf0] sm:$0xff]   ;;  %v1279_v9 = vld [vmem:[%s1676_s1 + $0xe8] sm:$0xff]  }
   0x3   :  { %v1272_v2 = vld [vmem:[%s1676_s1 + $0x38] sm:$0xff]   ;;  %1188 = vmatprep.subr.bf16.mxu1 %v1271_v1  ;;  %v1276_v6 = vld [vmem:[%s1676_s1 + $0x30] sm:$0xff]   ;;  %v1280_v10 = vld [vmem:[%s1676_s1 + $0x28] sm:$0xff]  }
   0x4   :  { %v1273_v3 = vld [vmem:[%s1676_s1 + $0xb8] sm:$0xff]   ;;  %1107 = vmatpush3.bf16.msra.mxu0 %v1272_v2  ;;  %v1277_v7 = vld [vmem:[%s1676_s1 + $0xb0] sm:$0xff]   ;;  %v1281_v11 = vld [vmem:[%s1676_s1 + $0xa8] sm:$0xff]  }
   0x5   :  { %1189 = vmatpush3.bf16.msra.mxu1 %v1273_v3  ;;  %1108 = vmatprep.subr.bf16.mxu0 %v1274_v4  ;;  %v1282_v12 = vld [vmem:[%s1676_s1 + $0x60] sm:$0xff]   ;;  %v1286_v16 = vld [vmem:[%s1676_s1 + $0x58] sm:$0xff]   ;;  %v1290_v20 = vld [vmem:[%s1676_s1 + $0x50] sm:$0xff]  }
   0x6   :  { %1190 = vmatprep.subr.bf16.mxu1 %v1275_v5  ;;  %v1283_v13 = vld [vmem:[%s1676_s1 + $0xe0] sm:$0xff]   ;;  %v1287_v17 = vld [vmem:[%s1676_s1 + $0xd8] sm:$0xff]   ;;  %v1291_v21 = vld [vmem:[%s1676_s1 + $0xd0] sm:$0xff]  }
   0x7   :  { %v1284_v14 = vld [vmem:[%s1676_s1 + $0x20] sm:$0xff]   ;;  %v1288_v18 = vld [vmem:[%s1676_s1 + $0x18] sm:$0xff]   ;;  %v1292_v22 = vld [vmem:[%s1676_s1 + $0x10] sm:$0xff]  }
   0x8   :  { %1109 = vmatpush3.bf16.msra.mxu0 %v1276_v6  ;;  %v1285_v15 = vld [vmem:[%s1676_s1 + $0xa0] sm:$0xff]   ;;  %v1289_v19 = vld [vmem:[%s1676_s1 + $0x98] sm:$0xff]   ;;  %v1293_v23 = vld [vmem:[%s1676_s1 + $0x90] sm:$0xff]  }
   0x9   :  { %1191 = vmatpush3.bf16.msra.mxu1 %v1277_v7  ;;  %1110 = vmatprep.subr.bf16.mxu0 %v1278_v8  ;;  %v1294_v24 = vld [vmem:[%s1676_s1 + $0x48] sm:$0xff]   ;;  %v1298_v28 = vld [vmem:[%s1676_s1 + $0x40] sm:$0xff]  }
   0xa   :  { %1192 = vmatprep.subr.bf16.mxu1 %v1279_v9  ;;  %v1295_v25 = vld [vmem:[%s1676_s1 + $0xc8] sm:$0xff]   ;;  %v1299_v29 = vld [vmem:[%s1676_s1 + $0xc0] sm:$0xff]  }
   0xb   :  { %v1296_v26 = vld [vmem:[%s1676_s1 + $0x8] sm:$0xff]   ;;  %v1300_v30 = vld [vmem:[%s1676_s1] sm:$0xff]  }
   0xc   :  { %1111 = vmatpush3.bf16.msra.mxu0 %v1280_v10  ;;  %v1297_v27 = vld [vmem:[%s1676_s1 + $0x88] sm:$0xff]   ;;  %v1301_v31 = vld [vmem:[%s1676_s1 + $0x80] sm:$0xff]  }
   0xd   :  { %1193 = vmatpush3.bf16.msra.mxu1 %v1281_v11  ;;  %1112 = vmatprep.subr.bf16.mxu0 %v1282_v12  ;;  %v1302_v32 = vld [vmem:[%s1677_s0] ss:$16 sps:$4 sm:$0xff]   ;;  %v1304_v33 = vld [vmem:[%s1677_s0 + $0x4] ss:$16 sps:$4 sm:$0xff]   ;;  %v1305_v34 = vld [vmem:[%s1677_s0 + $0x8] ss:$16 sps:$4 sm:$0xff]  }
   0xe   :  { %1194 = vmatprep.subr.bf16.mxu1 %v1283_v13  ;;  %v1307_v35 = vld [vmem:[%s1677_s0 + $0xc] ss:$16 sps:$4 sm:$0xff]   ;;  %574 = vmatprep.mubr.bf16.mxu0 %v1304_v33  ;;  %v1308_v36 = vld [vmem:[%s1677_s0 + $0x24] ss:$16 sps:$4 sm:$0xff]   ;;  %v1312_v38 = vld [vmem:[%s1677_s0 + $0x20] ss:$16 sps:$4 sm:$0xff]  }
   0xf   :  { %695 = vmatprep.mubr.bf16.mxu1 %v1307_v35  ;;  %v1310_v37 = vld [vmem:[%s1677_s0 + $0x2c] ss:$16 sps:$4 sm:$0xff]   ;;  %v1313_v39 = vld [vmem:[%s1677_s0 + $0x28] ss:$16 sps:$4 sm:$0xff]   ;;  %v1314_v40 = vld [vmem:[%s1677_s0 + $0x44] ss:$16 sps:$4 sm:$0xff]  }
  0x10   :  { %1113 = vmatpush3.bf16.msra.mxu0 %v1284_v14  ;;  %v1316_v41 = vld [vmem:[%s1677_s0 + $0x4c] ss:$16 sps:$4 sm:$0xff]   ;;  %v1318_v42 = vld [vmem:[%s1677_s0 + $0x40] ss:$16 sps:$4 sm:$0xff]   ;;  %v1319_v43 = vld [vmem:[%s1677_s0 + $0x48] ss:$16 sps:$4 sm:$0xff]  }
  0x11   :  { %1195 = vmatpush3.bf16.msra.mxu1 %v1285_v15  ;;  %1114 = vmatprep.subr.bf16.mxu0 %v1286_v16  ;;  %v1320_v44 = vld [vmem:[%s1677_s0 + $0x64] ss:$16 sps:$4 sm:$0xff]   ;;  %v1322_v45 = vld [vmem:[%s1677_s0 + $0x6c] ss:$16 sps:$4 sm:$0xff]   ;;  %v1324_v46 = vld [vmem:[%s1677_s0 + $0x60] ss:$16 sps:$4 sm:$0xff]  }
  0x12   :  { %1196 = vmatprep.subr.bf16.mxu1 %v1287_v17  ;;  %v1325_v47 = vld [vmem:[%s1677_s0 + $0x68] ss:$16 sps:$4 sm:$0xff]   ;;  %v1326_v48 = vld [vmem:[%s1677_s0 + $0x84] ss:$16 sps:$4 sm:$0xff]   ;;  %v1328_v49 = vld [vmem:[%s1677_s0 + $0x8c] ss:$16 sps:$4 sm:$0xff]  }
  0x13   :  { %v1330_v50 = vld [vmem:[%s1677_s0 + $0x80] ss:$16 sps:$4 sm:$0xff]   ;;  %v1331_v51 = vld [vmem:[%s1677_s0 + $0x88] ss:$16 sps:$4 sm:$0xff]   ;;  %v1332_v52 = vld [vmem:[%s1677_s0 + $0xa4] ss:$16 sps:$4 sm:$0xff]  }
  0x14   :  { %1115 = vmatpush3.bf16.msra.mxu0 %v1288_v18  ;;  %v1334_v53 = vld [vmem:[%s1677_s0 + $0xac] ss:$16 sps:$4 sm:$0xff]   ;;  %v1336_v54 = vld [vmem:[%s1677_s0 + $0xa0] ss:$16 sps:$4 sm:$0xff]   ;;  %v1337_v55 = vld [vmem:[%s1677_s0 + $0xa8] ss:$16 sps:$4 sm:$0xff]  }
  0x15   :  { %1197 = vmatpush3.bf16.msra.mxu1 %v1289_v19  ;;  %1116 = vmatprep.subr.bf16.mxu0 %v1290_v20  ;;  %v1338_v56 = vld [vmem:[%s1677_s0 + $0xc4] ss:$16 sps:$4 sm:$0xff]   ;;  %v1340_v57 = vld [vmem:[%s1677_s0 + $0xcc] ss:$16 sps:$4 sm:$0xff]   ;;  %v1342_v58 = vld [vmem:[%s1677_s0 + $0xc0] ss:$16 sps:$4 sm:$0xff]  }
  0x16   :  { %1198 = vmatprep.subr.bf16.mxu1 %v1291_v21  ;;  %v1343_v59 = vld [vmem:[%s1677_s0 + $0xc8] ss:$16 sps:$4 sm:$0xff]   ;;  %v1344_v60 = vld [vmem:[%s1677_s0 + $0xe4] ss:$16 sps:$4 sm:$0xff]   ;;  %v1346_v61 = vld [vmem:[%s1677_s0 + $0xec] ss:$16 sps:$4 sm:$0xff]  }
  0x17   :  { %v1348_v62 = vld [vmem:[%s1677_s0 + $0xe0] ss:$16 sps:$4 sm:$0xff]   ;;  %v1349_v63 = vld [vmem:[%s1677_s0 + $0xe8] ss:$16 sps:$4 sm:$0xff]   ;;  %v1350_v0 = vld [vmem:[%s1677_s0 + $0x104] ss:$16 sps:$4 sm:$0xff]  }
  0x18   :  { %1117 = vmatpush3.bf16.msra.mxu0 %v1292_v22  ;;  %v1352_v1 = vld [vmem:[%s1677_s0 + $0x10c] ss:$16 sps:$4 sm:$0xff]   ;;  %v1354_v2 = vld [vmem:[%s1677_s0 + $0x100] ss:$16 sps:$4 sm:$0xff]   ;;  %v1355_v3 = vld [vmem:[%s1677_s0 + $0x108] ss:$16 sps:$4 sm:$0xff]  }
  0x19   :  { %1199 = vmatpush3.bf16.msra.mxu1 %v1293_v23  ;;  %1118 = vmatprep.subr.bf16.mxu0 %v1294_v24  ;;  %v1356_v4 = vld [vmem:[%s1677_s0 + $0x124] ss:$16 sps:$4 sm:$0xff]   ;;  %v1358_v5 = vld [vmem:[%s1677_s0 + $0x12c] ss:$16 sps:$4 sm:$0xff]   ;;  %v1360_v6 = vld [vmem:[%s1677_s0 + $0x120] ss:$16 sps:$4 sm:$0xff]  }
  0x1a   :  { %1200 = vmatprep.subr.bf16.mxu1 %v1295_v25  ;;  %v1361_v7 = vld [vmem:[%s1677_s0 + $0x128] ss:$16 sps:$4 sm:$0xff]   ;;  %v1362_v8 = vld [vmem:[%s1677_s0 + $0x144] ss:$16 sps:$4 sm:$0xff]   ;;  %v1364_v9 = vld [vmem:[%s1677_s0 + $0x14c] ss:$16 sps:$4 sm:$0xff]  }
  0x1b   :  { %v1366_v10 = vld [vmem:[%s1677_s0 + $0x140] ss:$16 sps:$4 sm:$0xff]   ;;  %v1367_v11 = vld [vmem:[%s1677_s0 + $0x148] ss:$16 sps:$4 sm:$0xff]  }
  0x1c   :  { %1119 = vmatpush3.bf16.msra.mxu0 %v1296_v26  ;;  %v1619_v14 = vld [vmem:[%s1678_s2] ss:$0 sm:$0xff] }
  0x1d   :  { %1201 = vmatpush3.bf16.msra.mxu1 %v1297_v27  ;;  %1120 = vmatprep.subr.bf16.mxu0 %v1298_v28 }
  0x1e   :  { %1202 = vmatprep.subr.bf16.mxu1 %v1299_v29 }
  0x20   :  { %1121 = vmatpush3.bf16.msra.mxu0 %v1300_v30 }
  0x21   :  { %1203 = vmatpush3.bf16.msra.mxu1 %v1301_v31 }
  0x23   :  { %575 = vmatmul.mubr.bf16.vlgmr.msra.gmra.mxu0 %v1302_v32 }
  0x24   :  { %696 = vmatmul.mubr.bf16.vlgmr.msra.gmra.mxu1 %v1305_v34  ;;  %582 = vmatprep.mubr.bf16.mxu0 %v1308_v36 }
  0x25   :  { %703 = vmatprep.mubr.bf16.mxu1 %v1310_v37 }
  0x2b   :  { %583 = vmatmul.mubr.bf16.gmra.mxu0 %v1312_v38 }
  0x2c   :  { %704 = vmatmul.mubr.bf16.gmra.mxu1 %v1313_v39  ;;  %590 = vmatprep.mubr.bf16.mxu0 %v1314_v40 }
  0x2d   :  { %711 = vmatprep.mubr.bf16.mxu1 %v1316_v41 }
  0x33   :  { %591 = vmatmul.mubr.bf16.gmra.mxu0 %v1318_v42 }
  0x34   :  { %712 = vmatmul.mubr.bf16.gmra.mxu1 %v1319_v43  ;;  %598 = vmatprep.mubr.bf16.mxu0 %v1320_v44 }
  0x35   :  { %719 = vmatprep.mubr.bf16.mxu1 %v1322_v45 }
  0x3b   :  { %599 = vmatmul.mubr.bf16.gmra.mxu0 %v1324_v46 }
  0x3c   :  { %720 = vmatmul.mubr.bf16.gmra.mxu1 %v1325_v47  ;;  %606 = vmatprep.mubr.bf16.mxu0 %v1326_v48 }
  0x3d   :  { %727 = vmatprep.mubr.bf16.mxu1 %v1328_v49 }
  0x43   :  { %607 = vmatmul.mubr.bf16.gmra.mxu0 %v1330_v50 }
  0x44   :  { %728 = vmatmul.mubr.bf16.gmra.mxu1 %v1331_v51  ;;  %614 = vmatprep.mubr.bf16.mxu0 %v1332_v52 }
  0x45   :  { %735 = vmatprep.mubr.bf16.mxu1 %v1334_v53 }
  0x4b   :  { %615 = vmatmul.mubr.bf16.gmra.mxu0 %v1336_v54 }
  0x4c   :  { %736 = vmatmul.mubr.bf16.gmra.mxu1 %v1337_v55  ;;  %622 = vmatprep.mubr.bf16.mxu0 %v1338_v56 }
  0x4d   :  { %743 = vmatprep.mubr.bf16.mxu1 %v1340_v57 }
  0x53   :  { %623 = vmatmul.mubr.bf16.gmra.mxu0 %v1342_v58 }
  0x54   :  { %744 = vmatmul.mubr.bf16.gmra.mxu1 %v1343_v59  ;;  %630 = vmatprep.mubr.bf16.mxu0 %v1344_v60 }
  0x55   :  { %751 = vmatprep.mubr.bf16.mxu1 %v1346_v61 }
  0x5b   :  { %631 = vmatmul.mubr.bf16.gmra.mxu0 %v1348_v62 }
  0x5c   :  { %752 = vmatmul.mubr.bf16.gmra.mxu1 %v1349_v63  ;;  %638 = vmatprep.mubr.bf16.mxu0 %v1350_v0 }
  0x5d   :  { %759 = vmatprep.mubr.bf16.mxu1 %v1352_v1 }
  0x63   :  { %639 = vmatmul.mubr.bf16.gmra.mxu0 %v1354_v2 }
  0x64   :  { %760 = vmatmul.mubr.bf16.gmra.mxu1 %v1355_v3  ;;  %646 = vmatprep.mubr.bf16.mxu0 %v1356_v4 }
  0x65   :  { %767 = vmatprep.mubr.bf16.mxu1 %v1358_v5 }
  0x6b   :  { %647 = vmatmul.mubr.bf16.gmra.mxu0 %v1360_v6 }
  0x6c   :  { %768 = vmatmul.mubr.bf16.gmra.mxu1 %v1361_v7  ;;  %654 = vmatprep.mubr.bf16.mxu0 %v1362_v8 }
  0x6d   :  { %775 = vmatprep.mubr.bf16.mxu1 %v1364_v9 }
  0x73   :  { %655 = vmatmul.mubr.bf16.gmra.mxu0 %v1366_v10 }
  0x74   :  { %776 = vmatmul.mubr.bf16.gmra.mxu1 %v1367_v11 }
  0xe3   :  { %v1122_v12 = vpop.f32.mrf.mxu0 }
  0xe4   :  { %v1204_v13 = vpop.f32.mrf.mxu1 }
  0xe5   :  { %v1123_v15 = vpop.f32.mrf.mxu0 }
  0xe6   :  { %v1124_v16 = vadd.f32 %v1123_v15, %v1122_v12  ;;  %v1205_v17 = vpop.f32.mrf.mxu1 }
  0xe7   :  { %v1125_v18 = vpop.f32.mrf.mxu0  ;;  %v1206_v22 = vadd.f32 %v1205_v17, %v1204_v13 }
  0xe8   :  { %v577_v19 = vadd.f32 %v1124_v16, %v1619_v14  ;;  %v1207_v20 = vpop.f32.mrf.mxu1 }
  0xe9   :  { %v1126_v21 = vpop.f32.mrf.mxu0 }
  0xea   :  { %v1127_v23 = vadd.f32 %v1126_v21, %v1125_v18  ;;  %v1208_v24 = vpop.f32.mrf.mxu1  ;;  %v698_v26 = vadd.f32 %v1206_v22, %v577_v19 }
  0xeb   :  { %v1128_v25 = vpop.f32.mrf.mxu0  ;;  %v1209_v28 = vadd.f32 %v1208_v24, %v1207_v20 }
  0xec   :  { %v580_v27 = vadd.f32 %v1127_v23, %v1619_v14  ;;  %v1210_v29 = vpop.f32.mrf.mxu1  ;;  %v784_v35 = vmax.f32 %v698_v26, 0.0 }
  0xed   :  { %v1129_v30 = vpop.f32.mrf.mxu0 }
  0xee   :  { %v701_v31 = vadd.f32 %v1209_v28, %v580_v27  ;;  %v1130_v32 = vadd.f32 %v1129_v30, %v1128_v25  ;;  %v1211_v33 = vpop.f32.mrf.mxu1 }
  0xef   :  { %v1131_v34 = vpop.f32.mrf.mxu0  ;;  %v1212_v41 = vadd.f32 %v1211_v33, %v1210_v29 }
  0xf0   :  { %v785_v36 = vmax.f32 %v701_v31, 0.0  ;;  %v585_v37 = vadd.f32 %v1130_v32, %v1619_v14  ;;  %v1213_v38 = vpop.f32.mrf.mxu1 }
  0xf1   :  { %v1132_v39 = vpop.f32.mrf.mxu0 }
  0xf2   :  { %v1044_v40 = vpack.c.bf16 %v785_v36, %v784_v35  ;;  %v1133_v42 = vadd.f32 %v1132_v39, %v1131_v34  ;;  %v1214_v43 = vpop.f32.mrf.mxu1  ;;  %v706_v45 = vadd.f32 %v1212_v41, %v585_v37 }
  0xf3   :  { %v1134_v44 = vpop.f32.mrf.mxu0  ;;  %v1215_v47 = vadd.f32 %v1214_v43, %v1213_v38 }
  0xf4   :  { %1045 = vst [vmem:[%s1679_s3] sm:$0xff] %v1044_v40   ;;  %v588_v46 = vadd.f32 %v1133_v42, %v1619_v14  ;;  %v1216_v48 = vpop.f32.mrf.mxu1  ;;  %v786_v54 = vmax.f32 %v706_v45, 0.0 }
  0xf5   :  { %v1135_v49 = vpop.f32.mrf.mxu0 }
  0xf6   :  { %v709_v50 = vadd.f32 %v1215_v47, %v588_v46  ;;  %v1136_v51 = vadd.f32 %v1135_v49, %v1134_v44  ;;  %v1217_v52 = vpop.f32.mrf.mxu1 }
  0xf7   :  { %v1137_v53 = vpop.f32.mrf.mxu0  ;;  %v1218_v60 = vadd.f32 %v1217_v52, %v1216_v48 }
  0xf8   :  { %v787_v55 = vmax.f32 %v709_v50, 0.0  ;;  %v593_v56 = vadd.f32 %v1136_v51, %v1619_v14  ;;  %v1219_v57 = vpop.f32.mrf.mxu1 }
  0xf9   :  { %v1138_v58 = vpop.f32.mrf.mxu0 }
  0xfa   :  { %v1049_v59 = vpack.c.bf16 %v787_v55, %v786_v54  ;;  %v1139_v61 = vadd.f32 %v1138_v58, %v1137_v53  ;;  %v1220_v62 = vpop.f32.mrf.mxu1  ;;  %v714_v0 = vadd.f32 %v1218_v60, %v593_v56 }
  0xfb   :  { %v1140_v63 = vpop.f32.mrf.mxu0  ;;  %v1221_v2 = vadd.f32 %v1220_v62, %v1219_v57 }
  0xfc   :  { %1096 = vst [vmem:[%s1679_s3 + $0x8] sm:$0xff] %v1049_v59   ;;  %v596_v1 = vadd.f32 %v1139_v61, %v1619_v14  ;;  %v1222_v3 = vpop.f32.mrf.mxu1  ;;  %v788_v9 = vmax.f32 %v714_v0, 0.0 }
  0xfd   :  { %v1141_v4 = vpop.f32.mrf.mxu0 }
  0xfe   :  { %v717_v5 = vadd.f32 %v1221_v2, %v596_v1  ;;  %v1142_v6 = vadd.f32 %v1141_v4, %v1140_v63  ;;  %v1223_v7 = vpop.f32.mrf.mxu1 }
  0xff   :  { %v1143_v8 = vpop.f32.mrf.mxu0  ;;  %v1224_v16 = vadd.f32 %v1223_v7, %v1222_v3 }
 0x100   :  { %v789_v10 = vmax.f32 %v717_v5, 0.0  ;;  %v601_v11 = vadd.f32 %v1142_v6, %v1619_v14  ;;  %v1225_v12 = vpop.f32.mrf.mxu1 }
 0x101   :  { %v1144_v13 = vpop.f32.mrf.mxu0 }
 0x102   :  { %v1054_v15 = vpack.c.bf16 %v789_v10, %v788_v9  ;;  %v1145_v17 = vadd.f32 %v1144_v13, %v1143_v8  ;;  %v1226_v18 = vpop.f32.mrf.mxu1  ;;  %v722_v20 = vadd.f32 %v1224_v16, %v601_v11 }
 0x103   :  { %v1146_v19 = vpop.f32.mrf.mxu0  ;;  %v1227_v22 = vadd.f32 %v1226_v18, %v1225_v12 }
 0x104   :  { %1097 = vst [vmem:[%s1679_s3 + $0x10] sm:$0xff] %v1054_v15   ;;  %v604_v21 = vadd.f32 %v1145_v17, %v1619_v14  ;;  %v1228_v23 = vpop.f32.mrf.mxu1  ;;  %v790_v29 = vmax.f32 %v722_v20, 0.0 }
 0x105   :  { %v1147_v24 = vpop.f32.mrf.mxu0 }
 0x106   :  { %v725_v25 = vadd.f32 %v1227_v22, %v604_v21  ;;  %v1148_v26 = vadd.f32 %v1147_v24, %v1146_v19  ;;  %v1229_v27 = vpop.f32.mrf.mxu1 }
 0x107   :  { %v1149_v28 = vpop.f32.mrf.mxu0  ;;  %v1230_v35 = vadd.f32 %v1229_v27, %v1228_v23 }
 0x108   :  { %v791_v30 = vmax.f32 %v725_v25, 0.0  ;;  %v609_v31 = vadd.f32 %v1148_v26, %v1619_v14  ;;  %v1231_v32 = vpop.f32.mrf.mxu1 }
 0x109   :  { %v1150_v33 = vpop.f32.mrf.mxu0 }
 0x10a   :  { %v1059_v34 = vpack.c.bf16 %v791_v30, %v790_v29  ;;  %v1151_v36 = vadd.f32 %v1150_v33, %v1149_v28  ;;  %v1232_v37 = vpop.f32.mrf.mxu1  ;;  %v730_v39 = vadd.f32 %v1230_v35, %v609_v31 }
 0x10b   :  { %v1152_v38 = vpop.f32.mrf.mxu0  ;;  %v1233_v41 = vadd.f32 %v1232_v37, %v1231_v32 }
 0x10c   :  { %1098 = vst [vmem:[%s1679_s3 + $0x18] sm:$0xff] %v1059_v34   ;;  %v612_v40 = vadd.f32 %v1151_v36, %v1619_v14  ;;  %v1234_v42 = vpop.f32.mrf.mxu1  ;;  %v792_v48 = vmax.f32 %v730_v39, 0.0 }
 0x10d   :  { %v1153_v43 = vpop.f32.mrf.mxu0 }
 0x10e   :  { %v733_v44 = vadd.f32 %v1233_v41, %v612_v40  ;;  %v1154_v45 = vadd.f32 %v1153_v43, %v1152_v38  ;;  %v1235_v46 = vpop.f32.mrf.mxu1 }
 0x10f   :  { %v1155_v47 = vpop.f32.mrf.mxu0  ;;  %v1236_v54 = vadd.f32 %v1235_v46, %v1234_v42 }
 0x110   :  { %v793_v49 = vmax.f32 %v733_v44, 0.0  ;;  %v617_v50 = vadd.f32 %v1154_v45, %v1619_v14  ;;  %v1237_v51 = vpop.f32.mrf.mxu1 }
 0x111   :  { %v1156_v52 = vpop.f32.mrf.mxu0 }
 0x112   :  { %v1064_v53 = vpack.c.bf16 %v793_v49, %v792_v48  ;;  %v1157_v55 = vadd.f32 %v1156_v52, %v1155_v47  ;;  %v1238_v56 = vpop.f32.mrf.mxu1  ;;  %v738_v58 = vadd.f32 %v1236_v54, %v617_v50 }
 0x113   :  { %v1158_v57 = vpop.f32.mrf.mxu0  ;;  %v1239_v60 = vadd.f32 %v1238_v56, %v1237_v51 }
 0x114   :  { %1099 = vst [vmem:[%s1679_s3 + $0x20] sm:$0xff] %v1064_v53   ;;  %v620_v59 = vadd.f32 %v1157_v55, %v1619_v14  ;;  %v1240_v61 = vpop.f32.mrf.mxu1  ;;  %v794_v3 = vmax.f32 %v738_v58, 0.0 }
 0x115   :  { %v1159_v62 = vpop.f32.mrf.mxu0 }
 0x116   :  { %v741_v63 = vadd.f32 %v1239_v60, %v620_v59  ;;  %v1160_v0 = vadd.f32 %v1159_v62, %v1158_v57  ;;  %v1241_v1 = vpop.f32.mrf.mxu1 }
 0x117   :  { %v1161_v2 = vpop.f32.mrf.mxu0  ;;  %v1242_v9 = vadd.f32 %v1241_v1, %v1240_v61 }
 0x118   :  { %v795_v4 = vmax.f32 %v741_v63, 0.0  ;;  %v625_v5 = vadd.f32 %v1160_v0, %v1619_v14  ;;  %v1243_v6 = vpop.f32.mrf.mxu1 }
 0x119   :  { %v1162_v7 = vpop.f32.mrf.mxu0 }
 0x11a   :  { %v1069_v8 = vpack.c.bf16 %v795_v4, %v794_v3  ;;  %v1163_v10 = vadd.f32 %v1162_v7, %v1161_v2  ;;  %v1244_v11 = vpop.f32.mrf.mxu1  ;;  %v746_v13 = vadd.f32 %v1242_v9, %v625_v5 }
 0x11b   :  { %v1164_v12 = vpop.f32.mrf.mxu0  ;;  %v1245_v16 = vadd.f32 %v1244_v11, %v1243_v6 }
 0x11c   :  { %1100 = vst [vmem:[%s1679_s3 + $0x28] sm:$0xff] %v1069_v8   ;;  %v628_v15 = vadd.f32 %v1163_v10, %v1619_v14  ;;  %v1246_v17 = vpop.f32.mrf.mxu1  ;;  %v796_v23 = vmax.f32 %v746_v13, 0.0 }
 0x11d   :  { %v1165_v18 = vpop.f32.mrf.mxu0 }
 0x11e   :  { %v749_v19 = vadd.f32 %v1245_v16, %v628_v15  ;;  %v1166_v20 = vadd.f32 %v1165_v18, %v1164_v12  ;;  %v1247_v21 = vpop.f32.mrf.mxu1 }
 0x11f   :  { %v1167_v22 = vpop.f32.mrf.mxu0  ;;  %v1248_v29 = vadd.f32 %v1247_v21, %v1246_v17 }
 0x120   :  { %v797_v24 = vmax.f32 %v749_v19, 0.0  ;;  %v633_v25 = vadd.f32 %v1166_v20, %v1619_v14  ;;  %v1249_v26 = vpop.f32.mrf.mxu1 }
 0x121   :  { %v1168_v27 = vpop.f32.mrf.mxu0 }
 0x122   :  { %v1074_v28 = vpack.c.bf16 %v797_v24, %v796_v23  ;;  %v1169_v30 = vadd.f32 %v1168_v27, %v1167_v22  ;;  %v1250_v31 = vpop.f32.mrf.mxu1  ;;  %v754_v33 = vadd.f32 %v1248_v29, %v633_v25 }
 0x123   :  { %v1170_v32 = vpop.f32.mrf.mxu0  ;;  %v1251_v35 = vadd.f32 %v1250_v31, %v1249_v26 }
 0x124   :  { %1101 = vst [vmem:[%s1679_s3 + $0x30] sm:$0xff] %v1074_v28   ;;  %v636_v34 = vadd.f32 %v1169_v30, %v1619_v14  ;;  %v1252_v36 = vpop.f32.mrf.mxu1  ;;  %v798_v42 = vmax.f32 %v754_v33, 0.0 }
 0x125   :  { %v1171_v37 = vpop.f32.mrf.mxu0 }
 0x126   :  { %v757_v38 = vadd.f32 %v1251_v35, %v636_v34  ;;  %v1172_v39 = vadd.f32 %v1171_v37, %v1170_v32  ;;  %v1253_v40 = vpop.f32.mrf.mxu1 }
 0x127   :  { %v1173_v41 = vpop.f32.mrf.mxu0  ;;  %v1254_v48 = vadd.f32 %v1253_v40, %v1252_v36 }
 0x128   :  { %v799_v43 = vmax.f32 %v757_v38, 0.0  ;;  %v641_v44 = vadd.f32 %v1172_v39, %v1619_v14  ;;  %v1255_v45 = vpop.f32.mrf.mxu1 }
 0x129   :  { %v1174_v46 = vpop.f32.mrf.mxu0 }
 0x12a   :  { %v1079_v47 = vpack.c.bf16 %v799_v43, %v798_v42  ;;  %v1175_v49 = vadd.f32 %v1174_v46, %v1173_v41  ;;  %v1256_v50 = vpop.f32.mrf.mxu1  ;;  %v762_v52 = vadd.f32 %v1254_v48, %v641_v44 }
 0x12b   :  { %v1176_v51 = vpop.f32.mrf.mxu0  ;;  %v1257_v54 = vadd.f32 %v1256_v50, %v1255_v45 }
 0x12c   :  { %1102 = vst [vmem:[%s1679_s3 + $0x38] sm:$0xff] %v1079_v47   ;;  %v644_v53 = vadd.f32 %v1175_v49, %v1619_v14  ;;  %v1258_v55 = vpop.f32.mrf.mxu1  ;;  %v800_v61 = vmax.f32 %v762_v52, 0.0 }
 0x12d   :  { %v1177_v56 = vpop.f32.mrf.mxu0 }
 0x12e   :  { %v765_v57 = vadd.f32 %v1257_v54, %v644_v53  ;;  %v1178_v58 = vadd.f32 %v1177_v56, %v1176_v51  ;;  %v1259_v59 = vpop.f32.mrf.mxu1 }
 0x12f   :  { %v1179_v60 = vpop.f32.mrf.mxu0  ;;  %v1260_v3 = vadd.f32 %v1259_v59, %v1258_v55 }
 0x130   :  { %v801_v62 = vmax.f32 %v765_v57, 0.0  ;;  %v649_v63 = vadd.f32 %v1178_v58, %v1619_v14  ;;  %v1261_v0 = vpop.f32.mrf.mxu1 }
 0x131   :  { %v1180_v1 = vpop.f32.mrf.mxu0 }
 0x132   :  { %v1084_v2 = vpack.c.bf16 %v801_v62, %v800_v61  ;;  %v1181_v4 = vadd.f32 %v1180_v1, %v1179_v60  ;;  %v1262_v5 = vpop.f32.mrf.mxu1  ;;  %v770_v7 = vadd.f32 %v1260_v3, %v649_v63 }
 0x133   :  { %v1182_v6 = vpop.f32.mrf.mxu0  ;;  %v1263_v9 = vadd.f32 %v1262_v5, %v1261_v0 }
 0x134   :  { %1103 = vst [vmem:[%s1679_s3 + $0x40] sm:$0xff] %v1084_v2   ;;  %v652_v8 = vadd.f32 %v1181_v4, %v1619_v14  ;;  %v1264_v10 = vpop.f32.mrf.mxu1  ;;  %v802_v17 = vmax.f32 %v770_v7, 0.0 }
 0x135   :  { %v1183_v11 = vpop.f32.mrf.mxu0 }
 0x136   :  { %v773_v12 = vadd.f32 %v1263_v9, %v652_v8  ;;  %v1184_v13 = vadd.f32 %v1183_v11, %v1182_v6  ;;  %v1265_v15 = vpop.f32.mrf.mxu1 }
 0x137   :  { %v1185_v16 = vpop.f32.mrf.mxu0  ;;  %v1266_v23 = vadd.f32 %v1265_v15, %v1264_v10 }
 0x138   :  { %v803_v18 = vmax.f32 %v773_v12, 0.0  ;;  %v657_v19 = vadd.f32 %v1184_v13, %v1619_v14  ;;  %v1267_v20 = vpop.f32.mrf.mxu1 }
 0x139   :  { %v1186_v21 = vpop.f32.mrf.mxu0 }
 0x13a   :  { %v1089_v22 = vpack.c.bf16 %v803_v18, %v802_v17  ;;  %v1187_v24 = vadd.f32 %v1186_v21, %v1185_v16  ;;  %v1268_v25 = vpop.f32.mrf.mxu1  ;;  %v778_v26 = vadd.f32 %v1266_v23, %v657_v19 }
 0x13b   :  { %v1269_v28 = vadd.f32 %v1268_v25, %v1267_v20 }
 0x13c   :  { %1104 = vst [vmem:[%s1679_s3 + $0x48] sm:$0xff] %v1089_v22   ;;  %v660_v27 = vadd.f32 %v1187_v24, %v1619_v14  ;;  %v804_v30 = vmax.f32 %v778_v26, 0.0 }
 0x13e   :  { %v781_v29 = vadd.f32 %v1269_v28, %v660_v27 }
 0x140   :  { %v805_v31 = vmax.f32 %v781_v29, 0.0 }
 0x142   :  { %v1094_v32 = vpack.c.bf16 %v805_v31, %v804_v30 }
 0x144   :  { %1105 = vst [vmem:[%s1679_s3 + $0x50] sm:$0xff] %v1094_v32  }

// kernel: ppo_forward.6
= control target key start
LH: loop header
LB: loop body
LE: loop exit
PB: predicated region body
PF: predicated region fallthrough
CT: control target
= control target key end

     0   :  { %v1348_v24 = vmov 0.0   ;;  %vm1349_vm0 = vmmov 0   ;;  %s1705_s1 = inlined_call_operand.vmem [shape: bf16[640,128], index: 1, kind: input, shape index: {}]   ;;  %s1706_s0 = inlined_call_operand.vmem [shape: bf16[112,640], index: 0, kind: input, shape index: {}]   ;;  %s1707_s2 = inlined_call_operand.vmem [shape: f32[1,128], index: 2, kind: input, shape index: {}]   ;;  %s1708_s3 = inlined_call_operand.vmem [shape: bf16[112,128], index: 3, kind: output, shape index: {}]  }
   0x1   :  { %v1259_v0 = vld [vmem:[%s1705_s1 + $0x78] sm:$0xff]   ;;  %v1261_v2 = vld [vmem:[%s1705_s1 + $0x70] sm:$0xff]   ;;  %v1263_v4 = vld [vmem:[%s1705_s1 + $0x68] sm:$0xff]  }
   0x2   :  { %v1260_v1 = vld [vmem:[%s1705_s1 + $0x38] sm:$0xff]   ;;  %1066 = vmatprep.subr.bf16.mxu0 %v1259_v0  ;;  %1241 = vmatprep.subr.bf16.mxu1 %v1259_v0  ;;  %v1262_v3 = vld [vmem:[%s1705_s1 + $0x30] sm:$0xff]   ;;  %v1264_v5 = vld [vmem:[%s1705_s1 + $0x28] sm:$0xff]  }
   0x3   :  { %1067 = vmatpush3.bf16.msra.mxu0 %v1260_v1  ;;  %1249 = vmatpush3.bf16.msra.mxu1 %v1260_v1  ;;  %v1265_v6 = vld [vmem:[%s1705_s1 + $0x60] sm:$0xff]   ;;  %v1267_v8 = vld [vmem:[%s1705_s1 + $0x58] sm:$0xff]   ;;  %v1269_v10 = vld [vmem:[%s1705_s1 + $0x50] sm:$0xff]  }
   0x4   :  { %1068 = vmatprep.subr.bf16.mxu0 %v1261_v2  ;;  %1242 = vmatprep.subr.bf16.mxu1 %v1261_v2  ;;  %v1266_v7 = vld [vmem:[%s1705_s1 + $0x20] sm:$0xff]   ;;  %v1268_v9 = vld [vmem:[%s1705_s1 + $0x18] sm:$0xff]   ;;  %v1270_v13 = vld [vmem:[%s1705_s1 + $0x10] sm:$0xff]  }
   0x5   :  { %v1277_v11 = vld [vmem:[%s1706_s0 + $0x4] ss:$20 sps:$4 sm:$0xff]   ;;  %v1271_v14 = vld [vmem:[%s1705_s1 + $0x48] sm:$0xff]   ;;  %v1275_v18 = vld [vmem:[%s1706_s0] ss:$20 sps:$4 sm:$0xff]  }
   0x6   :  { %v1280_v12 = vld [vmem:[%s1706_s0 + $0xa4] ss:$20 sps:$4 sm:$0xff]   ;;  %598 = vmatprep.mubr.bf16.mxu0 %v1277_v11  ;;  %v1272_v15 = vld [vmem:[%s1705_s1 + $0x8] sm:$0xff]   ;;  %v1278_v19 = vld [vmem:[%s1706_s0 + $0xa0] ss:$20 sps:$4 sm:$0xff]  }
   0x7   :  { %1069 = vmatpush3.bf16.msra.mxu0 %v1262_v3  ;;  %1250 = vmatpush3.bf16.msra.mxu1 %v1262_v3  ;;  %v1273_v16 = vld [vmem:[%s1705_s1 + $0x40] sm:$0xff]   ;;  %v1281_v20 = vld [vmem:[%s1705_s1 + $0xf8] sm:$0xff]   ;;  %v1284_v23 = vld [vmem:[%s1705_s1 + $0xf0] sm:$0xff]  }
   0x8   :  { %1070 = vmatprep.subr.bf16.mxu0 %v1263_v4  ;;  %1243 = vmatprep.subr.bf16.mxu1 %v1263_v4  ;;  %v1274_v17 = vld [vmem:[%s1705_s1] sm:$0xff]   ;;  %v1282_v21 = vld [vmem:[%s1705_s1 + $0xb8] sm:$0xff]   ;;  %v1285_v27 = vld [vmem:[%s1705_s1 + $0xb0] sm:$0xff]  }
   0x9   :  { %630 = vmatprep.mubr.bf16.mxu1 %v1280_v12  ;;  %v1283_v22 = vld [vmem:[%s1705_s1 + $0x138] sm:$0xff]   ;;  %v1287_v25 = vld [vmem:[%s1706_s0 + $0x2c] ss:$20 sps:$4 sm:$0xff]   ;;  %v1286_v28 = vld [vmem:[%s1705_s1 + $0x130] sm:$0xff]  }
   0xa   :  { %v1291_v26 = vld [vmem:[%s1706_s0 + $0xcc] ss:$20 sps:$4 sm:$0xff]   ;;  %v1289_v29 = vld [vmem:[%s1706_s0 + $0x28] ss:$20 sps:$4 sm:$0xff]   ;;  %v1301_v39 = vld [vmem:[%s1706_s0 + $0x50] ss:$20 sps:$4 sm:$0xff]  }
   0xb   :  { %1071 = vmatpush3.bf16.msra.mxu0 %v1264_v5  ;;  %1251 = vmatpush3.bf16.msra.mxu1 %v1264_v5  ;;  %v1290_v30 = vld [vmem:[%s1705_s1 + $0xe8] sm:$0xff]   ;;  %v1296_v34 = vld [vmem:[%s1705_s1 + $0xe0] sm:$0xff]   ;;  %v1302_v40 = vld [vmem:[%s1705_s1 + $0xd8] sm:$0xff]  }
   0xc   :  { %1072 = vmatprep.subr.bf16.mxu0 %v1265_v6  ;;  %1244 = vmatprep.subr.bf16.mxu1 %v1265_v6  ;;  %v1293_v31 = vld [vmem:[%s1705_s1 + $0xa8] sm:$0xff]   ;;  %v1297_v37 = vld [vmem:[%s1705_s1 + $0xa0] sm:$0xff]   ;;  %v1305_v41 = vld [vmem:[%s1705_s1 + $0x98] sm:$0xff]  }
   0xd   :  { %v1294_v32 = vld [vmem:[%s1705_s1 + $0x128] sm:$0xff]   ;;  %v1298_v38 = vld [vmem:[%s1705_s1 + $0x120] sm:$0xff]   ;;  %v1306_v43 = vld [vmem:[%s1705_s1 + $0x118] sm:$0xff]  }
   0xe   :  { %v1295_v33 = vld [vmem:[%s1706_s0 + $0xc8] ss:$20 sps:$4 sm:$0xff]   ;;  %v1307_v42 = vld [vmem:[%s1706_s0 + $0xf0] ss:$20 sps:$4 sm:$0xff]   ;;  %v1322_v47 = vld [vmem:[%s1706_s0 + $0xc] ss:$20 sps:$4 sm:$0xff]  }
   0xf   :  { %1073 = vmatpush3.bf16.msra.mxu0 %v1266_v7  ;;  %1252 = vmatpush3.bf16.msra.mxu1 %v1266_v7  ;;  %v1299_v35 = vld [vmem:[%s1706_s0 + $0x54] ss:$20 sps:$4 sm:$0xff]   ;;  %v1311_v45 = vld [vmem:[%s1706_s0 + $0x7c] ss:$20 sps:$4 sm:$0xff]   ;;  %v1313_v50 = vld [vmem:[%s1706_s0 + $0x78] ss:$20 sps:$4 sm:$0xff]  }
  0x10   :  { %1074 = vmatprep.subr.bf16.mxu0 %v1267_v8  ;;  %1245 = vmatprep.subr.bf16.mxu1 %v1267_v8  ;;  %v1303_v36 = vld [vmem:[%s1706_s0 + $0xf4] ss:$20 sps:$4 sm:$0xff]   ;;  %v1317_v53 = vld [vmem:[%s1705_s1 + $0xc0] sm:$0xff]   ;;  %v1327_v60 = vld [vmem:[%s1706_s0 + $0x38] ss:$20 sps:$4 sm:$0xff]  }
  0x11   :  { %v1308_v44 = vld [vmem:[%s1705_s1 + $0xd0] sm:$0xff]   ;;  %v1314_v49 = vld [vmem:[%s1705_s1 + $0xc8] sm:$0xff]   ;;  %v1318_v54 = vld [vmem:[%s1705_s1 + $0x80] sm:$0xff]  }
  0x12   :  { %v1309_v46 = vld [vmem:[%s1705_s1 + $0x90] sm:$0xff]   ;;  %v1315_v51 = vld [vmem:[%s1705_s1 + $0x88] sm:$0xff]   ;;  %v1319_v55 = vld [vmem:[%s1705_s1 + $0x100] sm:$0xff]  }
  0x13   :  { %1075 = vmatpush3.bf16.msra.mxu0 %v1268_v9  ;;  %1253 = vmatpush3.bf16.msra.mxu1 %v1268_v9  ;;  %v1310_v48 = vld [vmem:[%s1705_s1 + $0x110] sm:$0xff]   ;;  %v1316_v52 = vld [vmem:[%s1705_s1 + $0x108] sm:$0xff]   ;;  %v1332_v0 = vld [vmem:[%s1706_s0 + $0x84] ss:$20 sps:$4 sm:$0xff]  }
  0x14   :  { %1076 = vmatprep.subr.bf16.mxu0 %v1269_v10  ;;  %1246 = vmatprep.subr.bf16.mxu1 %v1269_v10  ;;  %v1320_v56 = vld [vmem:[%s1706_s0 + $0x8] ss:$20 sps:$4 sm:$0xff]   ;;  %v1323_v57 = vld [vmem:[%s1706_s0 + $0x10] ss:$20 sps:$4 sm:$0xff]   ;;  %v1330_v62 = vld [vmem:[%s1706_s0 + $0x58] ss:$20 sps:$4 sm:$0xff]  }
  0x15   :  { %v1324_v58 = vld [vmem:[%s1706_s0 + $0x34] ss:$20 sps:$4 sm:$0xff]   ;;  %v1326_v59 = vld [vmem:[%s1706_s0 + $0x30] ss:$20 sps:$4 sm:$0xff]   ;;  %v1336_v3 = vld [vmem:[%s1706_s0 + $0xac] ss:$20 sps:$4 sm:$0xff]  }
  0x16   :  { %v1328_v61 = vld [vmem:[%s1706_s0 + $0x5c] ss:$20 sps:$4 sm:$0xff]   ;;  %v1331_v63 = vld [vmem:[%s1706_s0 + $0x60] ss:$20 sps:$4 sm:$0xff]   ;;  %v1343_v8 = vld [vmem:[%s1706_s0 + $0xd8] ss:$20 sps:$4 sm:$0xff]  }
  0x17   :  { %1077 = vmatpush3.bf16.msra.mxu0 %v1270_v13  ;;  %1254 = vmatpush3.bf16.msra.mxu1 %v1270_v13  ;;  %v1334_v1 = vld [vmem:[%s1706_s0 + $0x80] ss:$20 sps:$4 sm:$0xff]   ;;  %v1335_v2 = vld [vmem:[%s1706_s0 + $0x88] ss:$20 sps:$4 sm:$0xff]   ;;  %v1339_v5 = vld [vmem:[%s1706_s0 + $0xb0] ss:$20 sps:$4 sm:$0xff]  }
  0x18   :  { %1078 = vmatprep.subr.bf16.mxu0 %v1271_v14  ;;  %1247 = vmatprep.subr.bf16.mxu1 %v1271_v14  ;;  %v1338_v4 = vld [vmem:[%s1706_s0 + $0xa8] ss:$20 sps:$4 sm:$0xff]   ;;  %v1342_v7 = vld [vmem:[%s1706_s0 + $0xd0] ss:$20 sps:$4 sm:$0xff]   ;;  %v1346_v10 = vld [vmem:[%s1706_s0 + $0xf8] ss:$20 sps:$4 sm:$0xff]  }
  0x19   :  { %v1340_v6 = vld [vmem:[%s1706_s0 + $0xd4] ss:$20 sps:$4 sm:$0xff]   ;;  %v1344_v9 = vld [vmem:[%s1706_s0 + $0xfc] ss:$20 sps:$4 sm:$0xff]  }
  0x1a   :  { %v1347_v11 = vld [vmem:[%s1706_s0 + $0x100] ss:$20 sps:$4 sm:$0xff]  }
  0x1b   :  { %1079 = vmatpush3.bf16.msra.mxu0 %v1272_v15  ;;  %1255 = vmatpush3.bf16.msra.mxu1 %v1272_v15 }
  0x1c   :  { %1080 = vmatprep.subr.bf16.mxu0 %v1273_v16  ;;  %1248 = vmatprep.subr.bf16.mxu1 %v1273_v16 }
  0x1f   :  { %1081 = vmatpush3.bf16.msra.mxu0 %v1274_v17  ;;  %1256 = vmatpush3.bf16.msra.mxu1 %v1274_v17 }
  0x20   :  { %1124 = vmatprep.subr.bf16.mxu1 %v1281_v20  ;;  %1197 = vmatprep.subr.bf16.mxu0 %v1348_v24 }
  0x22   :  { %599 = vmatmul.mubr.bf16.vlgmr.msra.gmra.mxu0 %v1275_v18  ;;  %631 = vmatmul.mubr.bf16.vlgmr.msra.gmra.mxu1 %v1278_v19 }
  0x23   :  { %1125 = vmatpush3.bf16.msra.mxu1 %v1282_v21  ;;  %1198 = vmatpush3.bf16.msra.mxu0 %v1283_v22 }
  0x24   :  { %1126 = vmatprep.subr.bf16.mxu1 %v1284_v23  ;;  %1199 = vmatprep.subr.bf16.mxu0 %v1348_v24 }
  0x25   :  { %606 = vmatprep.mubr.bf16.mxu0 %v1287_v25  ;;  %638 = vmatprep.mubr.bf16.mxu1 %v1291_v26 }
  0x27   :  { %1127 = vmatpush3.bf16.msra.mxu1 %v1285_v27  ;;  %1200 = vmatpush3.bf16.msra.mxu0 %v1286_v28 }
  0x28   :  { %1128 = vmatprep.subr.bf16.mxu1 %v1290_v30  ;;  %1201 = vmatprep.subr.bf16.mxu0 %v1348_v24 }
  0x2a   :  { %607 = vmatmul.mubr.bf16.gmra.mxu0 %v1289_v29  ;;  %639 = vmatmul.mubr.bf16.gmra.mxu1 %v1295_v33 }
  0x2b   :  { %1129 = vmatpush3.bf16.msra.mxu1 %v1293_v31  ;;  %1202 = vmatpush3.bf16.msra.mxu0 %v1294_v32 }
  0x2c   :  { %1130 = vmatprep.subr.bf16.mxu1 %v1296_v34  ;;  %1203 = vmatprep.subr.bf16.mxu0 %v1348_v24 }
  0x2d   :  { %614 = vmatprep.mubr.bf16.mxu0 %v1299_v35  ;;  %646 = vmatprep.mubr.bf16.mxu1 %v1303_v36 }
  0x2f   :  { %1131 = vmatpush3.bf16.msra.mxu1 %v1297_v37  ;;  %1204 = vmatpush3.bf16.msra.mxu0 %v1298_v38 }
  0x30   :  { %1132 = vmatprep.subr.bf16.mxu1 %v1302_v40  ;;  %1205 = vmatprep.subr.bf16.mxu0 %v1348_v24 }
  0x32   :  { %615 = vmatmul.mubr.bf16.gmra.mxu0 %v1301_v39  ;;  %647 = vmatmul.mubr.bf16.gmra.mxu1 %v1307_v42 }
  0x33   :  { %1133 = vmatpush3.bf16.msra.mxu1 %v1305_v41  ;;  %1206 = vmatpush3.bf16.msra.mxu0 %v1306_v43  ;;  %v1652_v43 = vld [vmem:[%s1707_s2] ss:$0 sm:$0xff] }
  0x34   :  { %1134 = vmatprep.subr.bf16.mxu1 %v1308_v44  ;;  %1207 = vmatprep.subr.bf16.mxu0 %v1348_v24 }
  0x35   :  { %622 = vmatprep.mubr.bf16.mxu0 %v1311_v45  ;;  %687 = vmatprep.mubr.bf16.mxu1 %v1322_v47 }
  0x37   :  { %1135 = vmatpush3.bf16.msra.mxu1 %v1309_v46  ;;  %1208 = vmatpush3.bf16.msra.mxu0 %v1310_v48 }
  0x38   :  { %1136 = vmatprep.subr.bf16.mxu1 %v1314_v49  ;;  %1209 = vmatprep.subr.bf16.mxu0 %v1348_v24 }
  0x3a   :  { %623 = vmatmul.mubr.bf16.gmra.mxu0 %v1313_v50 }
  0x3b   :  { %1137 = vmatpush3.bf16.msra.mxu1 %v1315_v51  ;;  %1210 = vmatpush3.bf16.msra.mxu0 %v1316_v52 }
  0x3c   :  { %1138 = vmatprep.subr.bf16.mxu1 %v1317_v53  ;;  %1211 = vmatprep.subr.bf16.mxu0 %v1348_v24 }
  0x3d   :  { %1213 = vmatprep.mubr.msk.bf16.mxu0 %vm1349_vm0, %v1348_v24 }
  0x3f   :  { %1139 = vmatpush3.bf16.msra.mxu1 %v1318_v54  ;;  %1212 = vmatpush3.bf16.msra.mxu0 %v1319_v55 }
  0x42   :  { %688 = vmatmul.mubr.bf16.vlgmr.msra.gmra.mxu1 %v1320_v56  ;;  %1214 = vmatmul.mubr.bf16.vlgmr.msra.gmra.mxu0 %v1323_v57 }
  0x43   :  { %695 = vmatprep.mubr.bf16.mxu1 %v1324_v58  ;;  %1217 = vmatprep.mubr.msk.bf16.mxu0 %vm1349_vm0, %v1348_v24 }
  0x4a   :  { %696 = vmatmul.mubr.bf16.gmra.mxu1 %v1326_v59  ;;  %1218 = vmatmul.mubr.bf16.gmra.mxu0 %v1327_v60 }
  0x4b   :  { %703 = vmatprep.mubr.bf16.mxu1 %v1328_v61  ;;  %1221 = vmatprep.mubr.msk.bf16.mxu0 %vm1349_vm0, %v1348_v24 }
  0x52   :  { %704 = vmatmul.mubr.bf16.gmra.mxu1 %v1330_v62  ;;  %1222 = vmatmul.mubr.bf16.gmra.mxu0 %v1331_v63 }
  0x53   :  { %711 = vmatprep.mubr.bf16.mxu1 %v1332_v0  ;;  %1225 = vmatprep.mubr.msk.bf16.mxu0 %vm1349_vm0, %v1348_v24 }
  0x5a   :  { %712 = vmatmul.mubr.bf16.gmra.mxu1 %v1334_v1  ;;  %1226 = vmatmul.mubr.bf16.gmra.mxu0 %v1335_v2 }
  0x5b   :  { %719 = vmatprep.mubr.bf16.mxu1 %v1336_v3  ;;  %1229 = vmatprep.mubr.msk.bf16.mxu0 %vm1349_vm0, %v1348_v24 }
  0x62   :  { %720 = vmatmul.mubr.bf16.gmra.mxu1 %v1338_v4  ;;  %1230 = vmatmul.mubr.bf16.gmra.mxu0 %v1339_v5 }
  0x63   :  { %727 = vmatprep.mubr.bf16.mxu1 %v1340_v6  ;;  %1233 = vmatprep.mubr.msk.bf16.mxu0 %vm1349_vm0, %v1348_v24 }
  0x6a   :  { %728 = vmatmul.mubr.bf16.gmra.mxu1 %v1342_v7  ;;  %1234 = vmatmul.mubr.bf16.gmra.mxu0 %v1343_v8 }
  0x6b   :  { %735 = vmatprep.mubr.bf16.mxu1 %v1344_v9  ;;  %1237 = vmatprep.mubr.msk.bf16.mxu0 %vm1349_vm0, %v1348_v24 }
  0x72   :  { %736 = vmatmul.mubr.bf16.gmra.mxu1 %v1346_v10  ;;  %1238 = vmatmul.mubr.bf16.gmra.mxu0 %v1347_v11 }
  0xe2   :  { %v1082_v12 = vpop.f32.mrf.mxu0  ;;  %v1617_v13 = vpop.f32.mrf.mxu1 }
  0xe4   :  { %v1083_v14 = vpop.f32.mrf.mxu0  ;;  %v1619_v15 = vpop.f32.mrf.mxu1 }
  0xe5   :  { %v1084_v40 = vadd.f32 %v1083_v14, %v1082_v12 }
  0xe6   :  { %v1085_v16 = vpop.f32.mrf.mxu0  ;;  %v1621_v17 = vpop.f32.mrf.mxu1 }
  0xe7   :  { %v601_v46 = vadd.f32 %v1084_v40, %v1652_v43 }
  0xe8   :  { %v1086_v18 = vpop.f32.mrf.mxu0  ;;  %v1623_v19 = vpop.f32.mrf.mxu1 }
  0xe9   :  { %v1087_v47 = vadd.f32 %v1086_v18, %v1085_v16 }
  0xea   :  { %v1088_v20 = vpop.f32.mrf.mxu0  ;;  %v1625_v21 = vpop.f32.mrf.mxu1 }
  0xeb   :  { %v604_v54 = vadd.f32 %v1087_v47, %v1652_v43 }
  0xec   :  { %v1089_v22 = vpop.f32.mrf.mxu0  ;;  %v1627_v23 = vpop.f32.mrf.mxu1 }
  0xed   :  { %v1090_v55 = vadd.f32 %v1089_v22, %v1088_v20 }
  0xee   :  { %v1091_v24 = vpop.f32.mrf.mxu0  ;;  %v1629_v25 = vpop.f32.mrf.mxu1 }
  0xef   :  { %v609_v63 = vadd.f32 %v1090_v55, %v1652_v43 }
  0xf0   :  { %v1092_v26 = vpop.f32.mrf.mxu0  ;;  %v1631_v27 = vpop.f32.mrf.mxu1 }
  0xf1   :  { %v1093_v0 = vadd.f32 %v1092_v26, %v1091_v24 }
  0xf2   :  { %v1094_v28 = vpop.f32.mrf.mxu0  ;;  %v1633_v30 = vpop.f32.mrf.mxu1 }
  0xf3   :  { %v612_v10 = vadd.f32 %v1093_v0, %v1652_v43 }
  0xf4   :  { %v1095_v29 = vpop.f32.mrf.mxu0  ;;  %v1635_v32 = vpop.f32.mrf.mxu1 }
  0xf5   :  { %v1096_v11 = vadd.f32 %v1095_v29, %v1094_v28 }
  0xf6   :  { %v1097_v31 = vpop.f32.mrf.mxu0  ;;  %v1639_v35 = vpop.f32.mrf.mxu1 }
  0xf7   :  { %v617_v40 = vadd.f32 %v1096_v11, %v1652_v43 }
  0xf8   :  { %v1098_v33 = vpop.f32.mrf.mxu0  ;;  %v1645_v38 = vpop.f32.mrf.mxu1 }
  0xfa   :  { %v1637_v34 = vpop.f32.mrf.mxu0 }
  0xfc   :  { %v1641_v36 = vpop.f32.mrf.mxu0 }
  0xfe   :  { %v1643_v37 = vpop.f32.mrf.mxu0 }
 0x100   :  { %v1647_v39 = vpop.f32.mrf.mxu0 }
 0x102   :  { %v1140_v41 = vpop.f32.mrf.mxu1  ;;  %v778_v42 = vpop.f32.mrf.mxu0 }
 0x104   :  { %v1141_v44 = vpop.f32.mrf.mxu1  ;;  %v1215_v45 = vpop.f32.mrf.mxu0 }
 0x105   :  { %v1142_v48 = vadd.f32 %v1141_v44, %v1140_v41  ;;  %v1099_v41 = vadd.f32 %v1098_v33, %v1097_v31 }
 0x106   :  { %v1143_v49 = vpop.f32.mrf.mxu1  ;;  %v781_v50 = vpop.f32.mrf.mxu0 }
 0x107   :  { %v690_v51 = vadd.f32 %v1142_v48, %v601_v46 }
 0x108   :  { %v1144_v52 = vpop.f32.mrf.mxu1  ;;  %v1216_v53 = vpop.f32.mrf.mxu0 }
 0x109   :  { %v1145_v56 = vadd.f32 %v1144_v52, %v1143_v49  ;;  %v779_v59 = vadd.f32 %v778_v42, %v690_v51  ;;  %v1102_v51 = vadd.f32 %v1641_v36, %v1637_v34 }
 0x10a   :  { %v1146_v57 = vpop.f32.mrf.mxu1  ;;  %v786_v58 = vpop.f32.mrf.mxu0 }
 0x10b   :  { %v693_v60 = vadd.f32 %v1145_v56, %v604_v54  ;;  %v833_v5 = vmax.f32 %v779_v59, 0.0  ;;  %v1105_v59 = vadd.f32 %v1647_v39, %v1643_v37 }
 0x10c   :  { %v1147_v61 = vpop.f32.mrf.mxu1  ;;  %v1219_v62 = vpop.f32.mrf.mxu0 }
 0x10d   :  { %v782_v1 = vadd.f32 %v781_v50, %v693_v60  ;;  %v1148_v2 = vadd.f32 %v1147_v61, %v1146_v57  ;;  %v620_v50 = vadd.f32 %v1099_v41, %v1652_v43  ;;  %v1114_v41 = vadd.f32 %v1627_v23, %v1625_v21 }
 0x10e   :  { %v1149_v3 = vpop.f32.mrf.mxu1  ;;  %v789_v4 = vpop.f32.mrf.mxu0 }
 0x10f   :  { %v834_v6 = vmax.f32 %v782_v1, 0.0  ;;  %v698_v7 = vadd.f32 %v1148_v2, %v609_v63 }
 0x110   :  { %v1150_v8 = vpop.f32.mrf.mxu1  ;;  %v1220_v9 = vpop.f32.mrf.mxu0 }
 0x111   :  { %v1028_v12 = vpack.c.bf16 %v834_v6, %v833_v5  ;;  %v1151_v14 = vadd.f32 %v1150_v8, %v1149_v3  ;;  %v787_v20 = vadd.f32 %v786_v58, %v698_v7  ;;  %v625_v58 = vadd.f32 %v1102_v51, %v1652_v43 }
 0x112   :  { %v1152_v16 = vpop.f32.mrf.mxu1  ;;  %v794_v18 = vpop.f32.mrf.mxu0  ;;  %v1108_v3 = vadd.f32 %v1619_v15, %v1617_v13 }
 0x113   :  { %1029 = vst [vmem:[%s1708_s3] sm:$0xff] %v1028_v12   ;;  %v701_v22 = vadd.f32 %v1151_v14, %v612_v10  ;;  %v835_v28 = vmax.f32 %v787_v20, 0.0  ;;  %v1111_v12 = vadd.f32 %v1623_v19, %v1621_v17 }
 0x114   :  { %v1153_v24 = vpop.f32.mrf.mxu1  ;;  %v1223_v26 = vpop.f32.mrf.mxu0  ;;  %v633_v11 = vadd.f32 %v1108_v3, %v1652_v43 }
 0x115   :  { %v790_v42 = vadd.f32 %v789_v4, %v701_v22  ;;  %v1154_v44 = vadd.f32 %v1153_v24, %v1152_v16  ;;  %v628_v4 = vadd.f32 %v1105_v59, %v1652_v43 }
 0x116   :  { %v1155_v45 = vpop.f32.mrf.mxu1  ;;  %v797_v46 = vpop.f32.mrf.mxu0 }
 0x117   :  { %v836_v29 = vmax.f32 %v790_v42, 0.0  ;;  %v706_v47 = vadd.f32 %v1154_v44, %v617_v40  ;;  %v636_v40 = vadd.f32 %v1111_v12, %v1652_v43 }
 0x118   :  { %v1156_v48 = vpop.f32.mrf.mxu1  ;;  %v1224_v49 = vpop.f32.mrf.mxu0 }
 0x119   :  { %v1033_v52 = vpack.c.bf16 %v836_v29, %v835_v28  ;;  %v1157_v53 = vadd.f32 %v1156_v48, %v1155_v45  ;;  %v795_v31 = vadd.f32 %v794_v18, %v706_v47  ;;  %v641_v47 = vadd.f32 %v1114_v41, %v1652_v43 }
 0x11a   :  { %v1158_v54 = vpop.f32.mrf.mxu1  ;;  %v802_v55 = vpop.f32.mrf.mxu0  ;;  %v1117_v48 = vadd.f32 %v1631_v27, %v1629_v25 }
 0x11b   :  { %1060 = vst [vmem:[%s1708_s3 + $0x8] sm:$0xff] %v1033_v52   ;;  %v709_v33 = vadd.f32 %v1157_v53, %v620_v50  ;;  %v837_v62 = vmax.f32 %v795_v31, 0.0 }
 0x11c   :  { %v1159_v56 = vpop.f32.mrf.mxu1  ;;  %v1227_v57 = vpop.f32.mrf.mxu0  ;;  %v644_v31 = vadd.f32 %v1117_v48, %v1652_v43 }
 0x11d   :  { %v798_v60 = vadd.f32 %v797_v46, %v709_v33  ;;  %v1160_v61 = vadd.f32 %v1159_v56, %v1158_v54  ;;  %v1120_v33 = vadd.f32 %v1635_v32, %v1633_v30 }
 0x11e   :  { %v1161_v34 = vpop.f32.mrf.mxu1  ;;  %v805_v36 = vpop.f32.mrf.mxu0 }
 0x11f   :  { %v838_v63 = vmax.f32 %v798_v60, 0.0  ;;  %v714_v0 = vadd.f32 %v1160_v61, %v625_v58 }
 0x120   :  { %v1162_v1 = vpop.f32.mrf.mxu1  ;;  %v1228_v2 = vpop.f32.mrf.mxu0 }
 0x121   :  { %v1038_v5 = vpack.c.bf16 %v838_v63, %v837_v62  ;;  %v1163_v6 = vadd.f32 %v1162_v1, %v1161_v34  ;;  %v803_v37 = vadd.f32 %v802_v55, %v714_v0  ;;  %v649_v34 = vadd.f32 %v1120_v33, %v1652_v43 }
 0x122   :  { %v1164_v7 = vpop.f32.mrf.mxu1  ;;  %v810_v8 = vpop.f32.mrf.mxu0 }
 0x123   :  { %1061 = vst [vmem:[%s1708_s3 + $0x10] sm:$0xff] %v1038_v5   ;;  %v717_v39 = vadd.f32 %v1163_v6, %v628_v4  ;;  %v839_v18 = vmax.f32 %v803_v37, 0.0 }
 0x124   :  { %v1165_v9 = vpop.f32.mrf.mxu1  ;;  %v1231_v10 = vpop.f32.mrf.mxu0 }
 0x125   :  { %v806_v13 = vadd.f32 %v805_v36, %v717_v39  ;;  %v1166_v15 = vadd.f32 %v1165_v9, %v1164_v7  ;;  %v1123_v36 = vadd.f32 %v1645_v38, %v1639_v35 }
 0x126   :  { %v1167_v14 = vpop.f32.mrf.mxu1  ;;  %v813_v16 = vpop.f32.mrf.mxu0 }
 0x127   :  { %v840_v20 = vmax.f32 %v806_v13, 0.0  ;;  %v722_v22 = vadd.f32 %v1166_v15, %v633_v11  ;;  %v652_v5 = vadd.f32 %v1123_v36, %v1652_v43 }
 0x128   :  { %v1168_v24 = vpop.f32.mrf.mxu1  ;;  %v1232_v26 = vpop.f32.mrf.mxu0 }
 0x129   :  { %v1043_v42 = vpack.c.bf16 %v840_v20, %v839_v18  ;;  %v1169_v44 = vadd.f32 %v1168_v24, %v1167_v14  ;;  %v811_v17 = vadd.f32 %v810_v8, %v722_v22 }
 0x12a   :  { %v1170_v45 = vpop.f32.mrf.mxu1  ;;  %v818_v46 = vpop.f32.mrf.mxu0 }
 0x12b   :  { %1062 = vst [vmem:[%s1708_s3 + $0x18] sm:$0xff] %v1043_v42   ;;  %v725_v19 = vadd.f32 %v1169_v44, %v636_v40  ;;  %v841_v51 = vmax.f32 %v811_v17, 0.0 }
 0x12c   :  { %v1171_v28 = vpop.f32.mrf.mxu1  ;;  %v1235_v29 = vpop.f32.mrf.mxu0 }
 0x12d   :  { %v814_v49 = vadd.f32 %v813_v16, %v725_v19  ;;  %v1172_v50 = vadd.f32 %v1171_v28, %v1170_v45 }
 0x12e   :  { %v1173_v21 = vpop.f32.mrf.mxu1  ;;  %v821_v23 = vpop.f32.mrf.mxu0 }
 0x12f   :  { %v842_v52 = vmax.f32 %v814_v49, 0.0  ;;  %v730_v53 = vadd.f32 %v1172_v50, %v641_v47 }
 0x130   :  { %v1174_v54 = vpop.f32.mrf.mxu1  ;;  %v1236_v55 = vpop.f32.mrf.mxu0 }
 0x131   :  { %v1048_v56 = vpack.c.bf16 %v842_v52, %v841_v51  ;;  %v1175_v57 = vadd.f32 %v1174_v54, %v1173_v21  ;;  %v819_v25 = vadd.f32 %v818_v46, %v730_v53 }
 0x132   :  { %v1176_v58 = vpop.f32.mrf.mxu1  ;;  %v826_v59 = vpop.f32.mrf.mxu0 }
 0x133   :  { %1063 = vst [vmem:[%s1708_s3 + $0x20] sm:$0xff] %v1048_v56   ;;  %v733_v27 = vadd.f32 %v1175_v57, %v644_v31  ;;  %v843_v0 = vmax.f32 %v819_v25, 0.0 }
 0x134   :  { %v1177_v60 = vpop.f32.mrf.mxu1  ;;  %v1239_v61 = vpop.f32.mrf.mxu0 }
 0x135   :  { %v822_v62 = vadd.f32 %v821_v23, %v733_v27  ;;  %v1178_v63 = vadd.f32 %v1177_v60, %v1176_v58 }
 0x136   :  { %v1179_v30 = vpop.f32.mrf.mxu1  ;;  %v829_v32 = vpop.f32.mrf.mxu0 }
 0x137   :  { %v844_v1 = vmax.f32 %v822_v62, 0.0  ;;  %v738_v2 = vadd.f32 %v1178_v63, %v649_v34 }
 0x138   :  { %v1180_v3 = vpop.f32.mrf.mxu1  ;;  %v1240_v4 = vpop.f32.mrf.mxu0 }
 0x139   :  { %v1053_v6 = vpack.c.bf16 %v844_v1, %v843_v0  ;;  %v1181_v7 = vadd.f32 %v1180_v3, %v1179_v30  ;;  %v827_v8 = vadd.f32 %v826_v59, %v738_v2 }
 0x13b   :  { %1064 = vst [vmem:[%s1708_s3 + $0x28] sm:$0xff] %v1053_v6   ;;  %v741_v37 = vadd.f32 %v1181_v7, %v652_v5  ;;  %v845_v38 = vmax.f32 %v827_v8, 0.0 }
 0x13d   :  { %v830_v35 = vadd.f32 %v829_v32, %v741_v37 }
 0x13f   :  { %v846_v39 = vmax.f32 %v830_v35, 0.0 }
 0x141   :  { %v1058_v9 = vpack.c.bf16 %v846_v39, %v845_v38 }
 0x143   :  { %1065 = vst [vmem:[%s1708_s3 + $0x30] sm:$0xff] %v1058_v9  }

// kernel: ppo_forward.7
= control target key start
LH: loop header
LB: loop body
LE: loop exit
PB: predicated region body
PF: predicated region fallthrough
CT: control target
= control target key end

     0   :  { %s12101_s1 = inlined_call_operand.vmem [shape: bf16[3200,512], index: 1, kind: input, shape index: {}]   ;;  %s12102_s0 = inlined_call_operand.vmem [shape: bf16[16,3200], index: 0, kind: input, shape index: {}]   ;;  %s12103_s2 = inlined_call_operand.vmem [shape: f32[1,512], index: 2, kind: input, shape index: {}]   ;;  %s12104_s3 = inlined_call_operand.vmem [shape: bf16[512,256], index: 3, kind: input, shape index: {}]   ;;  %s12105_s5 = inlined_call_operand.vmem [shape: bf16[256,128], index: 5, kind: input, shape index: {}]   ;;  %s12106_s4 = inlined_call_operand.vmem [shape: f32[1,256], index: 4, kind: input, shape index: {}]   ;;  %s12107_s6 = inlined_call_operand.vmem [shape: f32[1,128], index: 6, kind: input, shape index: {}]   ;;  %s12108_s7 = inlined_call_operand.vmem [shape: f32[16,128], index: 7, kind: output, shape index: {}]  }
   0x1   :  { %v7730_v0 = vld [vmem:[%s12101_s1 + $0xe4] ss:$16 sps:$4 sm:$0xff]   ;;  %v7734_v2 = vld [vmem:[%s12101_s1 + $0xe0] ss:$16 sps:$4 sm:$0xff]  }
   0x2   :  { %v7732_v1 = vld [vmem:[%s12101_s1 + $0x2e4] ss:$16 sps:$4 sm:$0xff]   ;;  %5001 = vmatprep.subr.bf16.mxu0 %v7730_v0  ;;  %v7735_v3 = vld [vmem:[%s12101_s1 + $0x2e0] ss:$16 sps:$4 sm:$0xff]  }
   0x3   :  { %5044 = vmatprep.subr.bf16.mxu1 %v7732_v1  ;;  %v7736_v4 = vld [vmem:[%s12101_s1 + $0xc4] ss:$16 sps:$4 sm:$0xff]   ;;  %5002 = vmatpush1.bf16.msra.mxu0 %v7734_v2  ;;  %v7740_v6 = vld [vmem:[%s12101_s1 + $0xc0] ss:$16 sps:$4 sm:$0xff]  }
   0x4   :  { %5045 = vmatpush1.bf16.msra.mxu1 %v7735_v3  ;;  %v7738_v5 = vld [vmem:[%s12101_s1 + $0x2c4] ss:$16 sps:$4 sm:$0xff]   ;;  %5003 = vmatprep.subr.bf16.mxu0 %v7736_v4  ;;  %v7741_v7 = vld [vmem:[%s12101_s1 + $0x2c0] ss:$16 sps:$4 sm:$0xff]  }
   0x5   :  { %5046 = vmatprep.subr.bf16.mxu1 %v7738_v5  ;;  %v7742_v8 = vld [vmem:[%s12101_s1 + $0xa4] ss:$16 sps:$4 sm:$0xff]   ;;  %v7746_v10 = vld [vmem:[%s12101_s1 + $0xa0] ss:$16 sps:$4 sm:$0xff]   ;;  %v7829_v5 = vld [vmem:[%s12102_s0 + $0x8] ss:$100 sps:$4 sm:$0xff]  }
   0x6   :  { %v7744_v9 = vld [vmem:[%s12101_s1 + $0x2a4] ss:$16 sps:$4 sm:$0xff]   ;;  %v7747_v11 = vld [vmem:[%s12101_s1 + $0x2a0] ss:$16 sps:$4 sm:$0xff]  }
   0x7   :  { %5004 = vmatpush1.bf16.msra.mxu0 %v7740_v6  ;;  %v7748_v12 = vld [vmem:[%s12101_s1 + $0x84] ss:$16 sps:$4 sm:$0xff]   ;;  %v7752_v14 = vld [vmem:[%s12101_s1 + $0x80] ss:$16 sps:$4 sm:$0xff]  }
   0x8   :  { %5047 = vmatpush1.bf16.msra.mxu1 %v7741_v7  ;;  %5005 = vmatprep.subr.bf16.mxu0 %v7742_v8  ;;  %v7750_v13 = vld [vmem:[%s12101_s1 + $0x284] ss:$16 sps:$4 sm:$0xff]   ;;  %v7753_v15 = vld [vmem:[%s12101_s1 + $0x280] ss:$16 sps:$4 sm:$0xff]  }
   0x9   :  { %5048 = vmatprep.subr.bf16.mxu1 %v7744_v9  ;;  %v7754_v16 = vld [vmem:[%s12101_s1 + $0x64] ss:$16 sps:$4 sm:$0xff]   ;;  %v7758_v18 = vld [vmem:[%s12101_s1 + $0x60] ss:$16 sps:$4 sm:$0xff]  }
   0xa   :  { %v7756_v17 = vld [vmem:[%s12101_s1 + $0x264] ss:$16 sps:$4 sm:$0xff]   ;;  %v7759_v19 = vld [vmem:[%s12101_s1 + $0x260] ss:$16 sps:$4 sm:$0xff]  }
   0xb   :  { %5006 = vmatpush1.bf16.msra.mxu0 %v7746_v10  ;;  %v7760_v20 = vld [vmem:[%s12101_s1 + $0x44] ss:$16 sps:$4 sm:$0xff]   ;;  %v7764_v22 = vld [vmem:[%s12101_s1 + $0x40] ss:$16 sps:$4 sm:$0xff]  }
   0xc   :  { %5049 = vmatpush1.bf16.msra.mxu1 %v7747_v11  ;;  %5007 = vmatprep.subr.bf16.mxu0 %v7748_v12  ;;  %v7762_v21 = vld [vmem:[%s12101_s1 + $0x244] ss:$16 sps:$4 sm:$0xff]   ;;  %v7765_v23 = vld [vmem:[%s12101_s1 + $0x240] ss:$16 sps:$4 sm:$0xff]  }
   0xd   :  { %5050 = vmatprep.subr.bf16.mxu1 %v7750_v13  ;;  %v7766_v24 = vld [vmem:[%s12101_s1 + $0x24] ss:$16 sps:$4 sm:$0xff]   ;;  %v7770_v26 = vld [vmem:[%s12101_s1 + $0x20] ss:$16 sps:$4 sm:$0xff]  }
   0xe   :  { %v7768_v25 = vld [vmem:[%s12101_s1 + $0x224] ss:$16 sps:$4 sm:$0xff]   ;;  %v7771_v27 = vld [vmem:[%s12101_s1 + $0x220] ss:$16 sps:$4 sm:$0xff]  }
   0xf   :  { %5008 = vmatpush1.bf16.msra.mxu0 %v7752_v14  ;;  %v7772_v28 = vld [vmem:[%s12101_s1 + $0x4] ss:$16 sps:$4 sm:$0xff]   ;;  %v7776_v30 = vld [vmem:[%s12101_s1] ss:$16 sps:$4 sm:$0xff]  }
  0x10   :  { %5051 = vmatpush1.bf16.msra.mxu1 %v7753_v15  ;;  %5009 = vmatprep.subr.bf16.mxu0 %v7754_v16  ;;  %v7774_v29 = vld [vmem:[%s12101_s1 + $0x204] ss:$16 sps:$4 sm:$0xff]   ;;  %v7777_v31 = vld [vmem:[%s12101_s1 + $0x200] ss:$16 sps:$4 sm:$0xff]  }
  0x11   :  { %5052 = vmatprep.subr.bf16.mxu1 %v7756_v17  ;;  %v7778_v32 = vld [vmem:[%s12101_s1 + $0x1e4] ss:$16 sps:$4 sm:$0xff]   ;;  %v7782_v34 = vld [vmem:[%s12101_s1 + $0x1e0] ss:$16 sps:$4 sm:$0xff]  }
  0x12   :  { %v7780_v33 = vld [vmem:[%s12101_s1 + $0x3e4] ss:$16 sps:$4 sm:$0xff]   ;;  %v7783_v35 = vld [vmem:[%s12101_s1 + $0x3e0] ss:$16 sps:$4 sm:$0xff]  }
  0x13   :  { %5010 = vmatpush1.bf16.msra.mxu0 %v7758_v18  ;;  %v7784_v36 = vld [vmem:[%s12101_s1 + $0x1c4] ss:$16 sps:$4 sm:$0xff]   ;;  %v7788_v38 = vld [vmem:[%s12101_s1 + $0x1c0] ss:$16 sps:$4 sm:$0xff]  }
  0x14   :  { %5053 = vmatpush1.bf16.msra.mxu1 %v7759_v19  ;;  %5011 = vmatprep.subr.bf16.mxu0 %v7760_v20  ;;  %v7786_v37 = vld [vmem:[%s12101_s1 + $0x3c4] ss:$16 sps:$4 sm:$0xff]   ;;  %v7789_v39 = vld [vmem:[%s12101_s1 + $0x3c0] ss:$16 sps:$4 sm:$0xff]  }
  0x15   :  { %5054 = vmatprep.subr.bf16.mxu1 %v7762_v21  ;;  %v7790_v40 = vld [vmem:[%s12101_s1 + $0x1a4] ss:$16 sps:$4 sm:$0xff]   ;;  %v7794_v42 = vld [vmem:[%s12101_s1 + $0x1a0] ss:$16 sps:$4 sm:$0xff]  }
  0x16   :  { %v7792_v41 = vld [vmem:[%s12101_s1 + $0x3a4] ss:$16 sps:$4 sm:$0xff]   ;;  %v7795_v43 = vld [vmem:[%s12101_s1 + $0x3a0] ss:$16 sps:$4 sm:$0xff]  }
  0x17   :  { %5012 = vmatpush1.bf16.msra.mxu0 %v7764_v22  ;;  %v7796_v44 = vld [vmem:[%s12101_s1 + $0x184] ss:$16 sps:$4 sm:$0xff]   ;;  %v7800_v46 = vld [vmem:[%s12101_s1 + $0x180] ss:$16 sps:$4 sm:$0xff]  }
  0x18   :  { %5055 = vmatpush1.bf16.msra.mxu1 %v7765_v23  ;;  %5013 = vmatprep.subr.bf16.mxu0 %v7766_v24  ;;  %v7798_v45 = vld [vmem:[%s12101_s1 + $0x384] ss:$16 sps:$4 sm:$0xff]   ;;  %v7801_v47 = vld [vmem:[%s12101_s1 + $0x380] ss:$16 sps:$4 sm:$0xff]  }
  0x19   :  { %5056 = vmatprep.subr.bf16.mxu1 %v7768_v25  ;;  %v7802_v48 = vld [vmem:[%s12101_s1 + $0x164] ss:$16 sps:$4 sm:$0xff]   ;;  %v7831_v51 = vld [vmem:[%s12102_s0 + $0xc] ss:$100 sps:$4 sm:$0xff]  }
  0x1a   :  { %v7828_v49 = vld [vmem:[%s12102_s0 + $0x4] ss:$100 sps:$4 sm:$0xff]   ;;  %v7806_v52 = vld [vmem:[%s12101_s1 + $0x160] ss:$16 sps:$4 sm:$0xff]   ;;  %5076 = vmatprep.mubr.bf16.mxu1 %v7831_v51 }
  0x1b   :  { %5014 = vmatpush1.bf16.msra.mxu0 %v7770_v26  ;;  %v7804_v50 = vld [vmem:[%s12101_s1 + $0x364] ss:$16 sps:$4 sm:$0xff]   ;;  %5033 = vmatprep.mubr.bf16.mxu0 %v7828_v49  ;;  %v7807_v53 = vld [vmem:[%s12101_s1 + $0x360] ss:$16 sps:$4 sm:$0xff]  }
  0x1c   :  { %5057 = vmatpush1.bf16.msra.mxu1 %v7771_v27  ;;  %5015 = vmatprep.subr.bf16.mxu0 %v7772_v28  ;;  %v7808_v54 = vld [vmem:[%s12101_s1 + $0x144] ss:$16 sps:$4 sm:$0xff]   ;;  %v7812_v56 = vld [vmem:[%s12101_s1 + $0x140] ss:$16 sps:$4 sm:$0xff]  }
  0x1d   :  { %5058 = vmatprep.subr.bf16.mxu1 %v7774_v29  ;;  %v7810_v55 = vld [vmem:[%s12101_s1 + $0x344] ss:$16 sps:$4 sm:$0xff]   ;;  %v7813_v57 = vld [vmem:[%s12101_s1 + $0x340] ss:$16 sps:$4 sm:$0xff]  }
  0x1e   :  { %v7814_v58 = vld [vmem:[%s12101_s1 + $0x124] ss:$16 sps:$4 sm:$0xff]   ;;  %v7818_v60 = vld [vmem:[%s12101_s1 + $0x120] ss:$16 sps:$4 sm:$0xff]  }
  0x1f   :  { %5016 = vmatpush1.bf16.msra.mxu0 %v7776_v30  ;;  %v7816_v59 = vld [vmem:[%s12101_s1 + $0x324] ss:$16 sps:$4 sm:$0xff]   ;;  %v7819_v61 = vld [vmem:[%s12101_s1 + $0x320] ss:$16 sps:$4 sm:$0xff]  }
  0x20   :  { %5059 = vmatpush1.bf16.msra.mxu1 %v7777_v31  ;;  %5017 = vmatprep.subr.bf16.mxu0 %v7778_v32  ;;  %v7820_v62 = vld [vmem:[%s12101_s1 + $0x104] ss:$16 sps:$4 sm:$0xff]   ;;  %v7824_v0 = vld [vmem:[%s12101_s1 + $0x100] ss:$16 sps:$4 sm:$0xff]  }
  0x21   :  { %5060 = vmatprep.subr.bf16.mxu1 %v7780_v33  ;;  %v7822_v63 = vld [vmem:[%s12101_s1 + $0x304] ss:$16 sps:$4 sm:$0xff]   ;;  %v7825_v1 = vld [vmem:[%s12101_s1 + $0x300] ss:$16 sps:$4 sm:$0xff]  }
  0x22   :  { %v7834_v2 = vld [vmem:[%s12101_s1 + $0x4e4] ss:$16 sps:$4 sm:$0xff]   ;;  %v7832_v6 = vld [vmem:[%s12101_s1 + $0x4e0] ss:$16 sps:$4 sm:$0xff]  }
  0x23   :  { %5018 = vmatpush2.bf16.msra.mxu0 %v7782_v34  ;;  %v7837_v3 = vld [vmem:[%s12101_s1 + $0x6e4] ss:$16 sps:$4 sm:$0xff]   ;;  %v7835_v7 = vld [vmem:[%s12101_s1 + $0x6e0] ss:$16 sps:$4 sm:$0xff]  }
  0x24   :  { %5061 = vmatpush2.bf16.msra.mxu1 %v7783_v35  ;;  %5019 = vmatprep.subr.bf16.mxu0 %v7784_v36  ;;  %v7826_v4 = vld [vmem:[%s12102_s0] ss:$100 sps:$4 sm:$0xff]   ;;  %v7930_v34 = vld [vmem:[%s12102_s0 + $0x14] ss:$100 sps:$4 sm:$0xff]  }
  0x25   :  { %5062 = vmatprep.subr.bf16.mxu1 %v7786_v37  ;;  %v7840_v8 = vld [vmem:[%s12101_s1 + $0x4c4] ss:$16 sps:$4 sm:$0xff]   ;;  %v7838_v10 = vld [vmem:[%s12101_s1 + $0x4c0] ss:$16 sps:$4 sm:$0xff]  }
  0x26   :  { %v7843_v9 = vld [vmem:[%s12101_s1 + $0x6c4] ss:$16 sps:$4 sm:$0xff]   ;;  %v7841_v11 = vld [vmem:[%s12101_s1 + $0x6c0] ss:$16 sps:$4 sm:$0xff]  }
  0x27   :  { %5020 = vmatpush2.bf16.msra.mxu0 %v7788_v38  ;;  %v7846_v12 = vld [vmem:[%s12101_s1 + $0x4a4] ss:$16 sps:$4 sm:$0xff]   ;;  %v7844_v14 = vld [vmem:[%s12101_s1 + $0x4a0] ss:$16 sps:$4 sm:$0xff]  }
  0x28   :  { %5063 = vmatpush2.bf16.msra.mxu1 %v7789_v39  ;;  %5021 = vmatprep.subr.bf16.mxu0 %v7790_v40  ;;  %v7849_v13 = vld [vmem:[%s12101_s1 + $0x6a4] ss:$16 sps:$4 sm:$0xff]   ;;  %v7847_v15 = vld [vmem:[%s12101_s1 + $0x6a0] ss:$16 sps:$4 sm:$0xff]  }
  0x29   :  { %5064 = vmatprep.subr.bf16.mxu1 %v7792_v41  ;;  %v7852_v16 = vld [vmem:[%s12101_s1 + $0x484] ss:$16 sps:$4 sm:$0xff]   ;;  %v7850_v18 = vld [vmem:[%s12101_s1 + $0x480] ss:$16 sps:$4 sm:$0xff]  }
  0x2a   :  { %v7855_v17 = vld [vmem:[%s12101_s1 + $0x684] ss:$16 sps:$4 sm:$0xff]   ;;  %v7853_v19 = vld [vmem:[%s12101_s1 + $0x680] ss:$16 sps:$4 sm:$0xff]  }
  0x2b   :  { %5022 = vmatpush2.bf16.msra.mxu0 %v7794_v42  ;;  %v7858_v20 = vld [vmem:[%s12101_s1 + $0x464] ss:$16 sps:$4 sm:$0xff]   ;;  %v7856_v22 = vld [vmem:[%s12101_s1 + $0x460] ss:$16 sps:$4 sm:$0xff]  }
  0x2c   :  { %5065 = vmatpush2.bf16.msra.mxu1 %v7795_v43  ;;  %5023 = vmatprep.subr.bf16.mxu0 %v7796_v44  ;;  %v7861_v21 = vld [vmem:[%s12101_s1 + $0x664] ss:$16 sps:$4 sm:$0xff]   ;;  %v7859_v23 = vld [vmem:[%s12101_s1 + $0x660] ss:$16 sps:$4 sm:$0xff]  }
  0x2d   :  { %5066 = vmatprep.subr.bf16.mxu1 %v7798_v45  ;;  %v7864_v24 = vld [vmem:[%s12101_s1 + $0x444] ss:$16 sps:$4 sm:$0xff]   ;;  %v7862_v26 = vld [vmem:[%s12101_s1 + $0x440] ss:$16 sps:$4 sm:$0xff]  }
  0x2e   :  { %v7867_v25 = vld [vmem:[%s12101_s1 + $0x644] ss:$16 sps:$4 sm:$0xff]   ;;  %v7865_v27 = vld [vmem:[%s12101_s1 + $0x640] ss:$16 sps:$4 sm:$0xff]  }
  0x2f   :  { %5024 = vmatpush2.bf16.msra.mxu0 %v7800_v46  ;;  %v7870_v28 = vld [vmem:[%s12101_s1 + $0x424] ss:$16 sps:$4 sm:$0xff]   ;;  %v7868_v30 = vld [vmem:[%s12101_s1 + $0x420] ss:$16 sps:$4 sm:$0xff]  }
  0x30   :  { %5067 = vmatpush2.bf16.msra.mxu1 %v7801_v47  ;;  %5025 = vmatprep.subr.bf16.mxu0 %v7802_v48  ;;  %v7873_v29 = vld [vmem:[%s12101_s1 + $0x624] ss:$16 sps:$4 sm:$0xff]   ;;  %v7871_v31 = vld [vmem:[%s12101_s1 + $0x620] ss:$16 sps:$4 sm:$0xff]  }
  0x31   :  { %5068 = vmatprep.subr.bf16.mxu1 %v7804_v50  ;;  %v7876_v32 = vld [vmem:[%s12101_s1 + $0x404] ss:$16 sps:$4 sm:$0xff]   ;;  %v7933_v35 = vld [vmem:[%s12102_s0 + $0x1c] ss:$100 sps:$4 sm:$0xff]  }
  0x32   :  { %v7879_v33 = vld [vmem:[%s12101_s1 + $0x604] ss:$16 sps:$4 sm:$0xff]   ;;  %v7874_v36 = vld [vmem:[%s12101_s1 + $0x400] ss:$16 sps:$4 sm:$0xff]  }
  0x33   :  { %5026 = vmatpush2.bf16.msra.mxu0 %v7806_v52  ;;  %v7877_v37 = vld [vmem:[%s12101_s1 + $0x600] ss:$16 sps:$4 sm:$0xff]   ;;  %v7882_v38 = vld [vmem:[%s12101_s1 + $0x5e4] ss:$16 sps:$4 sm:$0xff]  }
  0x34   :  { %5069 = vmatpush2.bf16.msra.mxu1 %v7807_v53  ;;  %5027 = vmatprep.subr.bf16.mxu0 %v7808_v54  ;;  %v7885_v39 = vld [vmem:[%s12101_s1 + $0x7e4] ss:$16 sps:$4 sm:$0xff]   ;;  %v7880_v40 = vld [vmem:[%s12101_s1 + $0x5e0] ss:$16 sps:$4 sm:$0xff]  }
  0x35   :  { %5070 = vmatprep.subr.bf16.mxu1 %v7810_v55  ;;  %v7883_v41 = vld [vmem:[%s12101_s1 + $0x7e0] ss:$16 sps:$4 sm:$0xff]   ;;  %v7888_v42 = vld [vmem:[%s12101_s1 + $0x5c4] ss:$16 sps:$4 sm:$0xff]  }
  0x36   :  { %v7891_v43 = vld [vmem:[%s12101_s1 + $0x7c4] ss:$16 sps:$4 sm:$0xff]   ;;  %v7886_v44 = vld [vmem:[%s12101_s1 + $0x5c0] ss:$16 sps:$4 sm:$0xff]  }
  0x37   :  { %5028 = vmatpush2.bf16.msra.mxu0 %v7812_v56  ;;  %v7889_v45 = vld [vmem:[%s12101_s1 + $0x7c0] ss:$16 sps:$4 sm:$0xff]   ;;  %v7894_v46 = vld [vmem:[%s12101_s1 + $0x5a4] ss:$16 sps:$4 sm:$0xff]  }
  0x38   :  { %5071 = vmatpush2.bf16.msra.mxu1 %v7813_v57  ;;  %5029 = vmatprep.subr.bf16.mxu0 %v7814_v58  ;;  %v7897_v47 = vld [vmem:[%s12101_s1 + $0x7a4] ss:$16 sps:$4 sm:$0xff]   ;;  %v7892_v48 = vld [vmem:[%s12101_s1 + $0x5a0] ss:$16 sps:$4 sm:$0xff]  }
  0x39   :  { %5072 = vmatprep.subr.bf16.mxu1 %v7816_v59  ;;  %v7895_v49 = vld [vmem:[%s12101_s1 + $0x7a0] ss:$16 sps:$4 sm:$0xff]   ;;  %v7900_v50 = vld [vmem:[%s12101_s1 + $0x584] ss:$16 sps:$4 sm:$0xff]  }
  0x3a   :  { %v7903_v51 = vld [vmem:[%s12101_s1 + $0x784] ss:$16 sps:$4 sm:$0xff]   ;;  %v7898_v52 = vld [vmem:[%s12101_s1 + $0x580] ss:$16 sps:$4 sm:$0xff]  }
  0x3b   :  { %5030 = vmatpush2.bf16.msra.mxu0 %v7818_v60  ;;  %v7901_v53 = vld [vmem:[%s12101_s1 + $0x780] ss:$16 sps:$4 sm:$0xff]   ;;  %v7906_v54 = vld [vmem:[%s12101_s1 + $0x564] ss:$16 sps:$4 sm:$0xff]  }
  0x3c   :  { %5073 = vmatpush2.bf16.msra.mxu1 %v7819_v61  ;;  %5031 = vmatprep.subr.bf16.mxu0 %v7820_v62  ;;  %v7909_v55 = vld [vmem:[%s12101_s1 + $0x764] ss:$16 sps:$4 sm:$0xff]   ;;  %v7904_v56 = vld [vmem:[%s12101_s1 + $0x560] ss:$16 sps:$4 sm:$0xff]  }
  0x3d   :  { %5074 = vmatprep.subr.bf16.mxu1 %v7822_v63  ;;  %v7907_v57 = vld [vmem:[%s12101_s1 + $0x760] ss:$16 sps:$4 sm:$0xff]   ;;  %v7912_v58 = vld [vmem:[%s12101_s1 + $0x544] ss:$16 sps:$4 sm:$0xff]  }
  0x3e   :  { %v7915_v59 = vld [vmem:[%s12101_s1 + $0x744] ss:$16 sps:$4 sm:$0xff]   ;;  %v7910_v60 = vld [vmem:[%s12101_s1 + $0x540] ss:$16 sps:$4 sm:$0xff]  }
  0x3f   :  { %5032 = vmatpush2.bf16.msra.mxu0 %v7824_v0  ;;  %v7913_v61 = vld [vmem:[%s12101_s1 + $0x740] ss:$16 sps:$4 sm:$0xff]   ;;  %v7918_v62 = vld [vmem:[%s12101_s1 + $0x524] ss:$16 sps:$4 sm:$0xff]  }
  0x40   :  { %5075 = vmatpush2.bf16.msra.mxu1 %v7825_v1  ;;  %5087 = vmatprep.subr.bf16.mxu0 %v7834_v2  ;;  %v7921_v63 = vld [vmem:[%s12101_s1 + $0x724] ss:$16 sps:$4 sm:$0xff]   ;;  %v7916_v0 = vld [vmem:[%s12101_s1 + $0x520] ss:$16 sps:$4 sm:$0xff]  }
  0x41   :  { %5130 = vmatprep.subr.bf16.mxu1 %v7837_v3  ;;  %v7919_v1 = vld [vmem:[%s12101_s1 + $0x720] ss:$16 sps:$4 sm:$0xff]   ;;  %v7924_v2 = vld [vmem:[%s12101_s1 + $0x504] ss:$16 sps:$4 sm:$0xff]  }
  0x42   :  { %5034 = vmatmul.mubr.bf16.vlgmr.msra.gmra.mxu0 %v7826_v4  ;;  %v7927_v3 = vld [vmem:[%s12101_s1 + $0x704] ss:$16 sps:$4 sm:$0xff]   ;;  %v7922_v4 = vld [vmem:[%s12101_s1 + $0x500] ss:$16 sps:$4 sm:$0xff]  }
  0x43   :  { %5077 = vmatmul.mubr.bf16.vlgmr.msra.gmra.mxu1 %v7829_v5  ;;  %5088 = vmatpush1.bf16.msra.mxu0 %v7832_v6  ;;  %v7925_v5 = vld [vmem:[%s12101_s1 + $0x700] ss:$16 sps:$4 sm:$0xff]   ;;  %v7936_v6 = vld [vmem:[%s12101_s1 + $0x8e4] ss:$16 sps:$4 sm:$0xff]  }
  0x44   :  { %5131 = vmatpush1.bf16.msra.mxu1 %v7835_v7  ;;  %5089 = vmatprep.subr.bf16.mxu0 %v7840_v8  ;;  %v7939_v7 = vld [vmem:[%s12101_s1 + $0xae4] ss:$16 sps:$4 sm:$0xff]  }
  0x45   :  { %5132 = vmatprep.subr.bf16.mxu1 %v7843_v9  ;;  %5119 = vmatprep.mubr.bf16.mxu0 %v7930_v34  ;;  %v7928_v8 = vld [vmem:[%s12102_s0 + $0x10] ss:$100 sps:$4 sm:$0xff]   ;;  %v7931_v9 = vld [vmem:[%s12102_s0 + $0x18] ss:$100 sps:$4 sm:$0xff]  }
  0x46   :  { %5162 = vmatprep.mubr.bf16.mxu1 %v7933_v35  ;;  %v7972_v34 = vld [vmem:[%s12101_s1 + $0x824] ss:$16 sps:$4 sm:$0xff]  }
  0x47   :  { %5090 = vmatpush1.bf16.msra.mxu0 %v7838_v10  ;;  %v7934_v10 = vld [vmem:[%s12101_s1 + $0x8e0] ss:$16 sps:$4 sm:$0xff]   ;;  %v7975_v35 = vld [vmem:[%s12101_s1 + $0xa24] ss:$16 sps:$4 sm:$0xff]  }
  0x48   :  { %5133 = vmatpush1.bf16.msra.mxu1 %v7841_v11  ;;  %5091 = vmatprep.subr.bf16.mxu0 %v7846_v12  ;;  %v7937_v11 = vld [vmem:[%s12101_s1 + $0xae0] ss:$16 sps:$4 sm:$0xff]   ;;  %v7942_v12 = vld [vmem:[%s12101_s1 + $0x8c4] ss:$16 sps:$4 sm:$0xff]  }
  0x49   :  { %5134 = vmatprep.subr.bf16.mxu1 %v7849_v13  ;;  %v7945_v13 = vld [vmem:[%s12101_s1 + $0xac4] ss:$16 sps:$4 sm:$0xff]  }
  0x4b   :  { %5092 = vmatpush1.bf16.msra.mxu0 %v7844_v14  ;;  %v7940_v14 = vld [vmem:[%s12101_s1 + $0x8c0] ss:$16 sps:$4 sm:$0xff]  }
  0x4c   :  { %5135 = vmatpush1.bf16.msra.mxu1 %v7847_v15  ;;  %5093 = vmatprep.subr.bf16.mxu0 %v7852_v16  ;;  %v7943_v15 = vld [vmem:[%s12101_s1 + $0xac0] ss:$16 sps:$4 sm:$0xff]   ;;  %v7948_v16 = vld [vmem:[%s12101_s1 + $0x8a4] ss:$16 sps:$4 sm:$0xff]  }
  0x4d   :  { %5136 = vmatprep.subr.bf16.mxu1 %v7855_v17  ;;  %v7951_v17 = vld [vmem:[%s12101_s1 + $0xaa4] ss:$16 sps:$4 sm:$0xff]  }
  0x4f   :  { %5094 = vmatpush1.bf16.msra.mxu0 %v7850_v18  ;;  %v7946_v18 = vld [vmem:[%s12101_s1 + $0x8a0] ss:$16 sps:$4 sm:$0xff]  }
  0x50   :  { %5137 = vmatpush1.bf16.msra.mxu1 %v7853_v19  ;;  %5095 = vmatprep.subr.bf16.mxu0 %v7858_v20  ;;  %v8032_v19 = vld [vmem:[%s12102_s0 + $0x24] ss:$100 sps:$4 sm:$0xff]   ;;  %v7949_v20 = vld [vmem:[%s12101_s1 + $0xaa0] ss:$16 sps:$4 sm:$0xff]  }
  0x51   :  { %5138 = vmatprep.subr.bf16.mxu1 %v7861_v21  ;;  %v8035_v21 = vld [vmem:[%s12102_s0 + $0x2c] ss:$100 sps:$4 sm:$0xff]  }
  0x53   :  { %5096 = vmatpush1.bf16.msra.mxu0 %v7856_v22  ;;  %v7954_v22 = vld [vmem:[%s12101_s1 + $0x884] ss:$16 sps:$4 sm:$0xff]  }
  0x54   :  { %5139 = vmatpush1.bf16.msra.mxu1 %v7859_v23  ;;  %5097 = vmatprep.subr.bf16.mxu0 %v7864_v24  ;;  %v7957_v23 = vld [vmem:[%s12101_s1 + $0xa84] ss:$16 sps:$4 sm:$0xff]   ;;  %v7952_v24 = vld [vmem:[%s12101_s1 + $0x880] ss:$16 sps:$4 sm:$0xff]  }
  0x55   :  { %5140 = vmatprep.subr.bf16.mxu1 %v7867_v25  ;;  %v7955_v25 = vld [vmem:[%s12101_s1 + $0xa80] ss:$16 sps:$4 sm:$0xff]  }
  0x57   :  { %5098 = vmatpush1.bf16.msra.mxu0 %v7862_v26  ;;  %v7960_v26 = vld [vmem:[%s12101_s1 + $0x864] ss:$16 sps:$4 sm:$0xff]  }
  0x58   :  { %5141 = vmatpush1.bf16.msra.mxu1 %v7865_v27  ;;  %5099 = vmatprep.subr.bf16.mxu0 %v7870_v28  ;;  %v7963_v27 = vld [vmem:[%s12101_s1 + $0xa64] ss:$16 sps:$4 sm:$0xff]   ;;  %v7958_v28 = vld [vmem:[%s12101_s1 + $0x860] ss:$16 sps:$4 sm:$0xff]  }
  0x59   :  { %5142 = vmatprep.subr.bf16.mxu1 %v7873_v29  ;;  %v7961_v29 = vld [vmem:[%s12101_s1 + $0xa60] ss:$16 sps:$4 sm:$0xff]  }
  0x5b   :  { %5100 = vmatpush1.bf16.msra.mxu0 %v7868_v30  ;;  %v7966_v30 = vld [vmem:[%s12101_s1 + $0x844] ss:$16 sps:$4 sm:$0xff]  }
  0x5c   :  { %5143 = vmatpush1.bf16.msra.mxu1 %v7871_v31  ;;  %5101 = vmatprep.subr.bf16.mxu0 %v7876_v32  ;;  %v7969_v31 = vld [vmem:[%s12101_s1 + $0xa44] ss:$16 sps:$4 sm:$0xff]   ;;  %v7964_v32 = vld [vmem:[%s12101_s1 + $0x840] ss:$16 sps:$4 sm:$0xff]  }
  0x5d   :  { %5144 = vmatprep.subr.bf16.mxu1 %v7879_v33  ;;  %v7967_v33 = vld [vmem:[%s12101_s1 + $0xa40] ss:$16 sps:$4 sm:$0xff]  }
  0x5f   :  { %5102 = vmatpush1.bf16.msra.mxu0 %v7874_v36  ;;  %v7970_v36 = vld [vmem:[%s12101_s1 + $0x820] ss:$16 sps:$4 sm:$0xff]  }
  0x60   :  { %5145 = vmatpush1.bf16.msra.mxu1 %v7877_v37  ;;  %5103 = vmatprep.subr.bf16.mxu0 %v7882_v38  ;;  %v7973_v37 = vld [vmem:[%s12101_s1 + $0xa20] ss:$16 sps:$4 sm:$0xff]   ;;  %v7978_v38 = vld [vmem:[%s12101_s1 + $0x804] ss:$16 sps:$4 sm:$0xff]  }
  0x61   :  { %5146 = vmatprep.subr.bf16.mxu1 %v7885_v39  ;;  %v7981_v39 = vld [vmem:[%s12101_s1 + $0xa04] ss:$16 sps:$4 sm:$0xff]  }
  0x63   :  { %5104 = vmatpush2.bf16.msra.mxu0 %v7880_v40  ;;  %v7976_v40 = vld [vmem:[%s12101_s1 + $0x800] ss:$16 sps:$4 sm:$0xff]  }
  0x64   :  { %5147 = vmatpush2.bf16.msra.mxu1 %v7883_v41  ;;  %5105 = vmatprep.subr.bf16.mxu0 %v7888_v42  ;;  %v7979_v41 = vld [vmem:[%s12101_s1 + $0xa00] ss:$16 sps:$4 sm:$0xff]   ;;  %v7984_v42 = vld [vmem:[%s12101_s1 + $0x9e4] ss:$16 sps:$4 sm:$0xff]  }
  0x65   :  { %5148 = vmatprep.subr.bf16.mxu1 %v7891_v43  ;;  %v7987_v43 = vld [vmem:[%s12101_s1 + $0xbe4] ss:$16 sps:$4 sm:$0xff]  }
  0x67   :  { %5106 = vmatpush2.bf16.msra.mxu0 %v7886_v44  ;;  %v7982_v44 = vld [vmem:[%s12101_s1 + $0x9e0] ss:$16 sps:$4 sm:$0xff]  }
  0x68   :  { %5149 = vmatpush2.bf16.msra.mxu1 %v7889_v45  ;;  %5107 = vmatprep.subr.bf16.mxu0 %v7894_v46  ;;  %v7985_v45 = vld [vmem:[%s12101_s1 + $0xbe0] ss:$16 sps:$4 sm:$0xff]   ;;  %v7990_v46 = vld [vmem:[%s12101_s1 + $0x9c4] ss:$16 sps:$4 sm:$0xff]  }
  0x69   :  { %5150 = vmatprep.subr.bf16.mxu1 %v7897_v47  ;;  %v7993_v47 = vld [vmem:[%s12101_s1 + $0xbc4] ss:$16 sps:$4 sm:$0xff]  }
  0x6b   :  { %5108 = vmatpush2.bf16.msra.mxu0 %v7892_v48  ;;  %v7988_v48 = vld [vmem:[%s12101_s1 + $0x9c0] ss:$16 sps:$4 sm:$0xff]  }
  0x6c   :  { %5151 = vmatpush2.bf16.msra.mxu1 %v7895_v49  ;;  %5109 = vmatprep.subr.bf16.mxu0 %v7900_v50  ;;  %v7991_v49 = vld [vmem:[%s12101_s1 + $0xbc0] ss:$16 sps:$4 sm:$0xff]   ;;  %v7996_v50 = vld [vmem:[%s12101_s1 + $0x9a4] ss:$16 sps:$4 sm:$0xff]  }
  0x6d   :  { %5152 = vmatprep.subr.bf16.mxu1 %v7903_v51  ;;  %v7999_v51 = vld [vmem:[%s12101_s1 + $0xba4] ss:$16 sps:$4 sm:$0xff]  }
  0x6f   :  { %5110 = vmatpush2.bf16.msra.mxu0 %v7898_v52  ;;  %v7994_v52 = vld [vmem:[%s12101_s1 + $0x9a0] ss:$16 sps:$4 sm:$0xff]  }
  0x70   :  { %5153 = vmatpush2.bf16.msra.mxu1 %v7901_v53  ;;  %5111 = vmatprep.subr.bf16.mxu0 %v7906_v54  ;;  %v7997_v53 = vld [vmem:[%s12101_s1 + $0xba0] ss:$16 sps:$4 sm:$0xff]   ;;  %v8002_v54 = vld [vmem:[%s12101_s1 + $0x984] ss:$16 sps:$4 sm:$0xff]  }
  0x71   :  { %5154 = vmatprep.subr.bf16.mxu1 %v7909_v55  ;;  %v8005_v55 = vld [vmem:[%s12101_s1 + $0xb84] ss:$16 sps:$4 sm:$0xff]  }
  0x73   :  { %5112 = vmatpush2.bf16.msra.mxu0 %v7904_v56  ;;  %v8000_v56 = vld [vmem:[%s12101_s1 + $0x980] ss:$16 sps:$4 sm:$0xff]  }
  0x74   :  { %5155 = vmatpush2.bf16.msra.mxu1 %v7907_v57  ;;  %5113 = vmatprep.subr.bf16.mxu0 %v7912_v58  ;;  %v8003_v57 = vld [vmem:[%s12101_s1 + $0xb80] ss:$16 sps:$4 sm:$0xff]   ;;  %v8008_v58 = vld [vmem:[%s12101_s1 + $0x964] ss:$16 sps:$4 sm:$0xff]  }
  0x75   :  { %5156 = vmatprep.subr.bf16.mxu1 %v7915_v59  ;;  %v8011_v59 = vld [vmem:[%s12101_s1 + $0xb64] ss:$16 sps:$4 sm:$0xff]  }
  0x77   :  { %5114 = vmatpush2.bf16.msra.mxu0 %v7910_v60  ;;  %v8006_v60 = vld [vmem:[%s12101_s1 + $0x960] ss:$16 sps:$4 sm:$0xff]  }
  0x78   :  { %5157 = vmatpush2.bf16.msra.mxu1 %v7913_v61  ;;  %5115 = vmatprep.subr.bf16.mxu0 %v7918_v62  ;;  %v8009_v61 = vld [vmem:[%s12101_s1 + $0xb60] ss:$16 sps:$4 sm:$0xff]   ;;  %v8014_v62 = vld [vmem:[%s12101_s1 + $0x944] ss:$16 sps:$4 sm:$0xff]  }
  0x79   :  { %5158 = vmatprep.subr.bf16.mxu1 %v7921_v63  ;;  %v8017_v63 = vld [vmem:[%s12101_s1 + $0xb44] ss:$16 sps:$4 sm:$0xff]  }
  0x7b   :  { %5116 = vmatpush2.bf16.msra.mxu0 %v7916_v0  ;;  %v8012_v0 = vld [vmem:[%s12101_s1 + $0x940] ss:$16 sps:$4 sm:$0xff]  }
  0x7c   :  { %5159 = vmatpush2.bf16.msra.mxu1 %v7919_v1  ;;  %5117 = vmatprep.subr.bf16.mxu0 %v7924_v2  ;;  %v8015_v1 = vld [vmem:[%s12101_s1 + $0xb40] ss:$16 sps:$4 sm:$0xff]   ;;  %v8020_v2 = vld [vmem:[%s12101_s1 + $0x924] ss:$16 sps:$4 sm:$0xff]  }
  0x7d   :  { %5160 = vmatprep.subr.bf16.mxu1 %v7927_v3  ;;  %v8023_v3 = vld [vmem:[%s12101_s1 + $0xb24] ss:$16 sps:$4 sm:$0xff]  }
  0x7f   :  { %5118 = vmatpush2.bf16.msra.mxu0 %v7922_v4  ;;  %v8018_v4 = vld [vmem:[%s12101_s1 + $0x920] ss:$16 sps:$4 sm:$0xff]  }
  0x80   :  { %5161 = vmatpush2.bf16.msra.mxu1 %v7925_v5  ;;  %5173 = vmatprep.subr.bf16.mxu0 %v7936_v6  ;;  %v8021_v5 = vld [vmem:[%s12101_s1 + $0xb20] ss:$16 sps:$4 sm:$0xff]   ;;  %v8026_v6 = vld [vmem:[%s12101_s1 + $0x904] ss:$16 sps:$4 sm:$0xff]  }
  0x81   :  { %5216 = vmatprep.subr.bf16.mxu1 %v7939_v7  ;;  %v8029_v7 = vld [vmem:[%s12101_s1 + $0xb04] ss:$16 sps:$4 sm:$0xff]  }
  0x82   :  { %5120 = vmatmul.mubr.bf16.vlgmr.msra.gmra.mxu0 %v7928_v8  ;;  %v8024_v8 = vld [vmem:[%s12101_s1 + $0x900] ss:$16 sps:$4 sm:$0xff]  }
  0x83   :  { %5163 = vmatmul.mubr.bf16.vlgmr.msra.gmra.mxu1 %v7931_v9  ;;  %5174 = vmatpush1.bf16.msra.mxu0 %v7934_v10  ;;  %v8027_v9 = vld [vmem:[%s12101_s1 + $0xb00] ss:$16 sps:$4 sm:$0xff]   ;;  %v8038_v10 = vld [vmem:[%s12101_s1 + $0xce4] ss:$16 sps:$4 sm:$0xff]  }
  0x84   :  { %5217 = vmatpush1.bf16.msra.mxu1 %v7937_v11  ;;  %5175 = vmatprep.subr.bf16.mxu0 %v7942_v12  ;;  %v8041_v11 = vld [vmem:[%s12101_s1 + $0xee4] ss:$16 sps:$4 sm:$0xff]  }
  0x85   :  { %5218 = vmatprep.subr.bf16.mxu1 %v7945_v13  ;;  %5205 = vmatprep.mubr.bf16.mxu0 %v8032_v19  ;;  %v8030_v12 = vld [vmem:[%s12102_s0 + $0x20] ss:$100 sps:$4 sm:$0xff]   ;;  %v8033_v13 = vld [vmem:[%s12102_s0 + $0x28] ss:$100 sps:$4 sm:$0xff]  }
  0x86   :  { %5248 = vmatprep.mubr.bf16.mxu1 %v8035_v21  ;;  %v8137_v19 = vld [vmem:[%s12102_s0 + $0x3c] ss:$100 sps:$4 sm:$0xff]  }
  0x87   :  { %5176 = vmatpush1.bf16.msra.mxu0 %v7940_v14  ;;  %v8036_v14 = vld [vmem:[%s12101_s1 + $0xce0] ss:$16 sps:$4 sm:$0xff]  }
  0x88   :  { %5219 = vmatpush1.bf16.msra.mxu1 %v7943_v15  ;;  %5177 = vmatprep.subr.bf16.mxu0 %v7948_v16  ;;  %v8039_v15 = vld [vmem:[%s12101_s1 + $0xee0] ss:$16 sps:$4 sm:$0xff]   ;;  %v8044_v16 = vld [vmem:[%s12101_s1 + $0xcc4] ss:$16 sps:$4 sm:$0xff]  }
  0x89   :  { %5220 = vmatprep.subr.bf16.mxu1 %v7951_v17  ;;  %v8047_v17 = vld [vmem:[%s12101_s1 + $0xec4] ss:$16 sps:$4 sm:$0xff]   ;;  %v8045_v21 = vld [vmem:[%s12101_s1 + $0xec0] ss:$16 sps:$4 sm:$0xff]  }
  0x8b   :  { %5178 = vmatpush1.bf16.msra.mxu0 %v7946_v18  ;;  %v8134_v18 = vld [vmem:[%s12102_s0 + $0x34] ss:$100 sps:$4 sm:$0xff]  }
  0x8c   :  { %5221 = vmatpush1.bf16.msra.mxu1 %v7949_v20  ;;  %5179 = vmatprep.subr.bf16.mxu0 %v7954_v22  ;;  %v8042_v20 = vld [vmem:[%s12101_s1 + $0xcc0] ss:$16 sps:$4 sm:$0xff]   ;;  %v8050_v22 = vld [vmem:[%s12101_s1 + $0xca4] ss:$16 sps:$4 sm:$0xff]  }
  0x8d   :  { %5222 = vmatprep.subr.bf16.mxu1 %v7957_v23  ;;  %v8053_v23 = vld [vmem:[%s12101_s1 + $0xea4] ss:$16 sps:$4 sm:$0xff]  }
  0x8f   :  { %5180 = vmatpush1.bf16.msra.mxu0 %v7952_v24  ;;  %v8048_v24 = vld [vmem:[%s12101_s1 + $0xca0] ss:$16 sps:$4 sm:$0xff]  }
  0x90   :  { %5223 = vmatpush1.bf16.msra.mxu1 %v7955_v25  ;;  %5181 = vmatprep.subr.bf16.mxu0 %v7960_v26  ;;  %v8051_v25 = vld [vmem:[%s12101_s1 + $0xea0] ss:$16 sps:$4 sm:$0xff]   ;;  %v8056_v26 = vld [vmem:[%s12101_s1 + $0xc84] ss:$16 sps:$4 sm:$0xff]  }
  0x91   :  { %5224 = vmatprep.subr.bf16.mxu1 %v7963_v27  ;;  %v8059_v27 = vld [vmem:[%s12101_s1 + $0xe84] ss:$16 sps:$4 sm:$0xff]  }
  0x93   :  { %5182 = vmatpush1.bf16.msra.mxu0 %v7958_v28  ;;  %v8054_v28 = vld [vmem:[%s12101_s1 + $0xc80] ss:$16 sps:$4 sm:$0xff]  }
  0x94   :  { %5225 = vmatpush1.bf16.msra.mxu1 %v7961_v29  ;;  %5183 = vmatprep.subr.bf16.mxu0 %v7966_v30  ;;  %v8057_v29 = vld [vmem:[%s12101_s1 + $0xe80] ss:$16 sps:$4 sm:$0xff]   ;;  %v8062_v30 = vld [vmem:[%s12101_s1 + $0xc64] ss:$16 sps:$4 sm:$0xff]  }
  0x95   :  { %5226 = vmatprep.subr.bf16.mxu1 %v7969_v31  ;;  %v8065_v31 = vld [vmem:[%s12101_s1 + $0xe64] ss:$16 sps:$4 sm:$0xff]  }
  0x97   :  { %5184 = vmatpush1.bf16.msra.mxu0 %v7964_v32  ;;  %v8060_v32 = vld [vmem:[%s12101_s1 + $0xc60] ss:$16 sps:$4 sm:$0xff]  }
  0x98   :  { %5227 = vmatpush1.bf16.msra.mxu1 %v7967_v33  ;;  %5185 = vmatprep.subr.bf16.mxu0 %v7972_v34  ;;  %v8063_v33 = vld [vmem:[%s12101_s1 + $0xe60] ss:$16 sps:$4 sm:$0xff]   ;;  %v8068_v34 = vld [vmem:[%s12101_s1 + $0xc44] ss:$16 sps:$4 sm:$0xff]  }
  0x99   :  { %5228 = vmatprep.subr.bf16.mxu1 %v7975_v35  ;;  %v8071_v35 = vld [vmem:[%s12101_s1 + $0xe44] ss:$16 sps:$4 sm:$0xff]  }
  0x9b   :  { %5186 = vmatpush1.bf16.msra.mxu0 %v7970_v36  ;;  %v8066_v36 = vld [vmem:[%s12101_s1 + $0xc40] ss:$16 sps:$4 sm:$0xff]  }
  0x9c   :  { %5229 = vmatpush1.bf16.msra.mxu1 %v7973_v37  ;;  %5187 = vmatprep.subr.bf16.mxu0 %v7978_v38  ;;  %v8069_v37 = vld [vmem:[%s12101_s1 + $0xe40] ss:$16 sps:$4 sm:$0xff]   ;;  %v8074_v38 = vld [vmem:[%s12101_s1 + $0xc24] ss:$16 sps:$4 sm:$0xff]  }
  0x9d   :  { %5230 = vmatprep.subr.bf16.mxu1 %v7981_v39  ;;  %v8077_v39 = vld [vmem:[%s12101_s1 + $0xe24] ss:$16 sps:$4 sm:$0xff]  }
  0x9f   :  { %5188 = vmatpush1.bf16.msra.mxu0 %v7976_v40  ;;  %v8072_v40 = vld [vmem:[%s12101_s1 + $0xc20] ss:$16 sps:$4 sm:$0xff]  }
  0xa0   :  { %5231 = vmatpush1.bf16.msra.mxu1 %v7979_v41  ;;  %5189 = vmatprep.subr.bf16.mxu0 %v7984_v42  ;;  %v8075_v41 = vld [vmem:[%s12101_s1 + $0xe20] ss:$16 sps:$4 sm:$0xff]   ;;  %v8080_v42 = vld [vmem:[%s12101_s1 + $0xc04] ss:$16 sps:$4 sm:$0xff]  }
  0xa1   :  { %5232 = vmatprep.subr.bf16.mxu1 %v7987_v43  ;;  %v8083_v43 = vld [vmem:[%s12101_s1 + $0xe04] ss:$16 sps:$4 sm:$0xff]  }
  0xa3   :  { %5190 = vmatpush2.bf16.msra.mxu0 %v7982_v44  ;;  %v8078_v44 = vld [vmem:[%s12101_s1 + $0xc00] ss:$16 sps:$4 sm:$0xff]  }
  0xa4   :  { %5233 = vmatpush2.bf16.msra.mxu1 %v7985_v45  ;;  %5191 = vmatprep.subr.bf16.mxu0 %v7990_v46  ;;  %v8081_v45 = vld [vmem:[%s12101_s1 + $0xe00] ss:$16 sps:$4 sm:$0xff]   ;;  %v8086_v46 = vld [vmem:[%s12101_s1 + $0xde4] ss:$16 sps:$4 sm:$0xff]  }
  0xa5   :  { %5234 = vmatprep.subr.bf16.mxu1 %v7993_v47  ;;  %v8089_v47 = vld [vmem:[%s12101_s1 + $0xfe4] ss:$16 sps:$4 sm:$0xff]  }
  0xa7   :  { %5192 = vmatpush2.bf16.msra.mxu0 %v7988_v48  ;;  %v8084_v48 = vld [vmem:[%s12101_s1 + $0xde0] ss:$16 sps:$4 sm:$0xff]  }
  0xa8   :  { %5235 = vmatpush2.bf16.msra.mxu1 %v7991_v49  ;;  %5193 = vmatprep.subr.bf16.mxu0 %v7996_v50  ;;  %v8087_v49 = vld [vmem:[%s12101_s1 + $0xfe0] ss:$16 sps:$4 sm:$0xff]   ;;  %v8092_v50 = vld [vmem:[%s12101_s1 + $0xdc4] ss:$16 sps:$4 sm:$0xff]  }
  0xa9   :  { %5236 = vmatprep.subr.bf16.mxu1 %v7999_v51  ;;  %v8095_v51 = vld [vmem:[%s12101_s1 + $0xfc4] ss:$16 sps:$4 sm:$0xff]  }
  0xab   :  { %5194 = vmatpush2.bf16.msra.mxu0 %v7994_v52  ;;  %v8090_v52 = vld [vmem:[%s12101_s1 + $0xdc0] ss:$16 sps:$4 sm:$0xff]  }
  0xac   :  { %5237 = vmatpush2.bf16.msra.mxu1 %v7997_v53  ;;  %5195 = vmatprep.subr.bf16.mxu0 %v8002_v54  ;;  %v8093_v53 = vld [vmem:[%s12101_s1 + $0xfc0] ss:$16 sps:$4 sm:$0xff]   ;;  %v8098_v54 = vld [vmem:[%s12101_s1 + $0xda4] ss:$16 sps:$4 sm:$0xff]  }
  0xad   :  { %5238 = vmatprep.subr.bf16.mxu1 %v8005_v55  ;;  %v8101_v55 = vld [vmem:[%s12101_s1 + $0xfa4] ss:$16 sps:$4 sm:$0xff]  }
  0xaf   :  { %5196 = vmatpush2.bf16.msra.mxu0 %v8000_v56  ;;  %v8096_v56 = vld [vmem:[%s12101_s1 + $0xda0] ss:$16 sps:$4 sm:$0xff]  }
  0xb0   :  { %5239 = vmatpush2.bf16.msra.mxu1 %v8003_v57  ;;  %5197 = vmatprep.subr.bf16.mxu0 %v8008_v58  ;;  %v8099_v57 = vld [vmem:[%s12101_s1 + $0xfa0] ss:$16 sps:$4 sm:$0xff]   ;;  %v8104_v58 = vld [vmem:[%s12101_s1 + $0xd84] ss:$16 sps:$4 sm:$0xff]  }
  0xb1   :  { %5240 = vmatprep.subr.bf16.mxu1 %v8011_v59  ;;  %v8107_v59 = vld [vmem:[%s12101_s1 + $0xf84] ss:$16 sps:$4 sm:$0xff]  }
  0xb3   :  { %5198 = vmatpush2.bf16.msra.mxu0 %v8006_v60  ;;  %v8102_v60 = vld [vmem:[%s12101_s1 + $0xd80] ss:$16 sps:$4 sm:$0xff]  }
  0xb4   :  { %5241 = vmatpush2.bf16.msra.mxu1 %v8009_v61  ;;  %5199 = vmatprep.subr.bf16.mxu0 %v8014_v62  ;;  %v8105_v61 = vld [vmem:[%s12101_s1 + $0xf80] ss:$16 sps:$4 sm:$0xff]   ;;  %v8110_v62 = vld [vmem:[%s12101_s1 + $0xd64] ss:$16 sps:$4 sm:$0xff]  }
  0xb5   :  { %5242 = vmatprep.subr.bf16.mxu1 %v8017_v63  ;;  %v8113_v63 = vld [vmem:[%s12101_s1 + $0xf64] ss:$16 sps:$4 sm:$0xff]  }
  0xb7   :  { %5200 = vmatpush2.bf16.msra.mxu0 %v8012_v0  ;;  %v8108_v0 = vld [vmem:[%s12101_s1 + $0xd60] ss:$16 sps:$4 sm:$0xff]  }
  0xb8   :  { %5243 = vmatpush2.bf16.msra.mxu1 %v8015_v1  ;;  %5201 = vmatprep.subr.bf16.mxu0 %v8020_v2  ;;  %v8111_v1 = vld [vmem:[%s12101_s1 + $0xf60] ss:$16 sps:$4 sm:$0xff]   ;;  %v8116_v2 = vld [vmem:[%s12101_s1 + $0xd44] ss:$16 sps:$4 sm:$0xff]  }
  0xb9   :  { %5244 = vmatprep.subr.bf16.mxu1 %v8023_v3  ;;  %v8119_v3 = vld [vmem:[%s12101_s1 + $0xf44] ss:$16 sps:$4 sm:$0xff]  }
  0xbb   :  { %5202 = vmatpush2.bf16.msra.mxu0 %v8018_v4  ;;  %v8114_v4 = vld [vmem:[%s12101_s1 + $0xd40] ss:$16 sps:$4 sm:$0xff]  }
  0xbc   :  { %5245 = vmatpush2.bf16.msra.mxu1 %v8021_v5  ;;  %5203 = vmatprep.subr.bf16.mxu0 %v8026_v6  ;;  %v8117_v5 = vld [vmem:[%s12101_s1 + $0xf40] ss:$16 sps:$4 sm:$0xff]   ;;  %v855_v6 = vlaneseq }
  0xbd   :  { %5246 = vmatprep.subr.bf16.mxu1 %v8029_v7  ;;  %v8122_v7 = vld [vmem:[%s12101_s1 + $0xd24] ss:$16 sps:$4 sm:$0xff]  }
  0xbf   :  { %5204 = vmatpush2.bf16.msra.mxu0 %v8024_v8  ;;  %v8125_v8 = vld [vmem:[%s12101_s1 + $0xf24] ss:$16 sps:$4 sm:$0xff]  }
  0xc0   :  { %5247 = vmatpush2.bf16.msra.mxu1 %v8027_v9  ;;  %5259 = vmatprep.subr.bf16.mxu0 %v8038_v10  ;;  %v8120_v9 = vld [vmem:[%s12101_s1 + $0xd20] ss:$16 sps:$4 sm:$0xff]  }
  0xc1   :  { %5302 = vmatprep.subr.bf16.mxu1 %v8041_v11  ;;  %v8123_v10 = vld [vmem:[%s12101_s1 + $0xf20] ss:$16 sps:$4 sm:$0xff]   ;;  %v9944_v11 = vshrl.u32 %v855_v6, 7  ;;  %v8197_v6 = vld [vmem:[%s12101_s1 + $0x13c4] ss:$16 sps:$4 sm:$0xff]  }
  0xc2   :  { %5206 = vmatmul.mubr.bf16.vlgmr.msra.gmra.mxu0 %v8030_v12  ;;  %v8128_v12 = vld [vmem:[%s12101_s1 + $0xd04] ss:$16 sps:$4 sm:$0xff]  }
  0xc3   :  { %5249 = vmatmul.mubr.bf16.vlgmr.msra.gmra.mxu1 %v8033_v13  ;;  %5260 = vmatpush1.bf16.msra.mxu0 %v8036_v14  ;;  %v8131_v13 = vld [vmem:[%s12101_s1 + $0xf04] ss:$16 sps:$4 sm:$0xff]   ;;  %v8126_v14 = vld [vmem:[%s12101_s1 + $0xd00] ss:$16 sps:$4 sm:$0xff]  }
  0xc4   :  { %5303 = vmatpush1.bf16.msra.mxu1 %v8039_v15  ;;  %5261 = vmatprep.subr.bf16.mxu0 %v8044_v16  ;;  %v8129_v15 = vld [vmem:[%s12101_s1 + $0xf00] ss:$16 sps:$4 sm:$0xff]  }
  0xc5   :  { %5304 = vmatprep.subr.bf16.mxu1 %v8047_v17  ;;  %5291 = vmatprep.mubr.bf16.mxu0 %v8134_v18  ;;  %v853_v16 = vld [vmem:[%s12103_s2] sm:$0xf]  ;;  %v857_v17 = vsub.s32 0, %v9944_v11  ;;  %v8140_v18 = vld [vmem:[%s12101_s1 + $0x10e4] ss:$16 sps:$4 sm:$0xff]  }
  0xc6   :  { %5334 = vmatprep.mubr.bf16.mxu1 %v8137_v19  ;;  %v8143_v19 = vld [vmem:[%s12101_s1 + $0x12e4] ss:$16 sps:$4 sm:$0xff]  }
  0xc7   :  { %5262 = vmatpush1.bf16.msra.mxu0 %v8042_v20  ;;  %v8132_v20 = vld [vmem:[%s12102_s0 + $0x30] ss:$100 sps:$4 sm:$0xff]  }
  0xc8   :  { %5305 = vmatpush1.bf16.msra.mxu1 %v8045_v21  ;;  %5263 = vmatprep.subr.bf16.mxu0 %v8050_v22  ;;  %v8135_v21 = vld [vmem:[%s12102_s0 + $0x38] ss:$100 sps:$4 sm:$0xff]   ;;  %v8138_v22 = vld [vmem:[%s12101_s1 + $0x10e0] ss:$16 sps:$4 sm:$0xff]  }
  0xc9   :  { %5306 = vmatprep.subr.bf16.mxu1 %v8053_v23  ;;  %v858_v23 = vrot.slane %v853_v16, %v857_v17  ;;  %v8204_v16 = vld [vmem:[%s12101_s1 + $0x1180] ss:$16 sps:$4 sm:$0xff]  }
  0xcb   :  { %5264 = vmatpush1.bf16.msra.mxu0 %v8048_v24  ;;  %v8141_v24 = vld [vmem:[%s12101_s1 + $0x12e0] ss:$16 sps:$4 sm:$0xff]  }
  0xcc   :  { %5307 = vmatpush1.bf16.msra.mxu1 %v8051_v25  ;;  %5265 = vmatprep.subr.bf16.mxu0 %v8056_v26  ;;  %v8146_v25 = vld [vmem:[%s12101_s1 + $0x10c4] ss:$16 sps:$4 sm:$0xff]  }
  0xcd   :  { %5308 = vmatprep.subr.bf16.mxu1 %v8059_v27  ;;  %v8149_v26 = vld [vmem:[%s12101_s1 + $0x12c4] ss:$16 sps:$4 sm:$0xff]  }
  0xce   :  { %v8236_v27 = vld [vmem:[%s12102_s0 + $0x44] ss:$100 sps:$4 sm:$0xff]  }
  0xcf   :  { %5266 = vmatpush1.bf16.msra.mxu0 %v8054_v28  ;;  %v8239_v28 = vld [vmem:[%s12102_s0 + $0x4c] ss:$100 sps:$4 sm:$0xff]  }
  0xd0   :  { %5309 = vmatpush1.bf16.msra.mxu1 %v8057_v29  ;;  %5267 = vmatprep.subr.bf16.mxu0 %v8062_v30 }
  0xd1   :  { %5310 = vmatprep.subr.bf16.mxu1 %v8065_v31  ;;  %v8144_v31 = vld [vmem:[%s12101_s1 + $0x10c0] ss:$16 sps:$4 sm:$0xff]  }
  0xd3   :  { %5268 = vmatpush1.bf16.msra.mxu0 %v8060_v32 }
  0xd4   :  { %5311 = vmatpush1.bf16.msra.mxu1 %v8063_v33  ;;  %5269 = vmatprep.subr.bf16.mxu0 %v8068_v34  ;;  %v8147_v33 = vld [vmem:[%s12101_s1 + $0x12c0] ss:$16 sps:$4 sm:$0xff]  }
  0xd5   :  { %5312 = vmatprep.subr.bf16.mxu1 %v8071_v35 }
  0xd7   :  { %5270 = vmatpush1.bf16.msra.mxu0 %v8066_v36  ;;  %v8152_v36 = vld [vmem:[%s12101_s1 + $0x10a4] ss:$16 sps:$4 sm:$0xff]  }
  0xd8   :  { %5313 = vmatpush1.bf16.msra.mxu1 %v8069_v37  ;;  %5271 = vmatprep.subr.bf16.mxu0 %v8074_v38  ;;  %v8155_v37 = vld [vmem:[%s12101_s1 + $0x12a4] ss:$16 sps:$4 sm:$0xff]  }
  0xd9   :  { %5314 = vmatprep.subr.bf16.mxu1 %v8077_v39 }
  0xdb   :  { %5272 = vmatpush1.bf16.msra.mxu0 %v8072_v40  ;;  %v8150_v40 = vld [vmem:[%s12101_s1 + $0x10a0] ss:$16 sps:$4 sm:$0xff]  }
  0xdc   :  { %5315 = vmatpush1.bf16.msra.mxu1 %v8075_v41  ;;  %5273 = vmatprep.subr.bf16.mxu0 %v8080_v42  ;;  %v8153_v42 = vld [vmem:[%s12101_s1 + $0x12a0] ss:$16 sps:$4 sm:$0xff]  }
  0xdd   :  { %5316 = vmatprep.subr.bf16.mxu1 %v8083_v43 }
  0xdf   :  { %5274 = vmatpush1.bf16.msra.mxu0 %v8078_v44  ;;  %v8158_v44 = vld [vmem:[%s12101_s1 + $0x1084] ss:$16 sps:$4 sm:$0xff]  }
  0xe0   :  { %5317 = vmatpush1.bf16.msra.mxu1 %v8081_v45  ;;  %5275 = vmatprep.subr.bf16.mxu0 %v8086_v46  ;;  %v8161_v45 = vld [vmem:[%s12101_s1 + $0x1284] ss:$16 sps:$4 sm:$0xff]  }
  0xe1   :  { %5318 = vmatprep.subr.bf16.mxu1 %v8089_v47  ;;  %v8156_v47 = vld [vmem:[%s12101_s1 + $0x1080] ss:$16 sps:$4 sm:$0xff]  }
  0xe3   :  { %5276 = vmatpush2.bf16.msra.mxu0 %v8084_v48  ;;  %v8159_v48 = vld [vmem:[%s12101_s1 + $0x1280] ss:$16 sps:$4 sm:$0xff]  }
  0xe4   :  { %5319 = vmatpush2.bf16.msra.mxu1 %v8087_v49  ;;  %5277 = vmatprep.subr.bf16.mxu0 %v8092_v50  ;;  %v8164_v49 = vld [vmem:[%s12101_s1 + $0x1064] ss:$16 sps:$4 sm:$0xff]  }
  0xe5   :  { %5320 = vmatprep.subr.bf16.mxu1 %v8095_v51  ;;  %v8167_v50 = vld [vmem:[%s12101_s1 + $0x1264] ss:$16 sps:$4 sm:$0xff]   ;;  %v8162_v51 = vld [vmem:[%s12101_s1 + $0x1060] ss:$16 sps:$4 sm:$0xff]  }
  0xe7   :  { %5278 = vmatpush2.bf16.msra.mxu0 %v8090_v52  ;;  %v8165_v52 = vld [vmem:[%s12101_s1 + $0x1260] ss:$16 sps:$4 sm:$0xff]  }
  0xe8   :  { %5321 = vmatpush2.bf16.msra.mxu1 %v8093_v53  ;;  %5279 = vmatprep.subr.bf16.mxu0 %v8098_v54  ;;  %v8170_v53 = vld [vmem:[%s12101_s1 + $0x1044] ss:$16 sps:$4 sm:$0xff]  }
  0xe9   :  { %5322 = vmatprep.subr.bf16.mxu1 %v8101_v55  ;;  %v8173_v54 = vld [vmem:[%s12101_s1 + $0x1244] ss:$16 sps:$4 sm:$0xff]   ;;  %v8168_v55 = vld [vmem:[%s12101_s1 + $0x1040] ss:$16 sps:$4 sm:$0xff]  }
  0xeb   :  { %5280 = vmatpush2.bf16.msra.mxu0 %v8096_v56  ;;  %v8171_v56 = vld [vmem:[%s12101_s1 + $0x1240] ss:$16 sps:$4 sm:$0xff]  }
  0xec   :  { %5323 = vmatpush2.bf16.msra.mxu1 %v8099_v57  ;;  %5281 = vmatprep.subr.bf16.mxu0 %v8104_v58  ;;  %v8176_v57 = vld [vmem:[%s12101_s1 + $0x1024] ss:$16 sps:$4 sm:$0xff]  }
  0xed   :  { %5324 = vmatprep.subr.bf16.mxu1 %v8107_v59  ;;  %v8179_v58 = vld [vmem:[%s12101_s1 + $0x1224] ss:$16 sps:$4 sm:$0xff]   ;;  %v8174_v59 = vld [vmem:[%s12101_s1 + $0x1020] ss:$16 sps:$4 sm:$0xff]  }
  0xef   :  { %5282 = vmatpush2.bf16.msra.mxu0 %v8102_v60  ;;  %v8177_v60 = vld [vmem:[%s12101_s1 + $0x1220] ss:$16 sps:$4 sm:$0xff]  }
  0xf0   :  { %5325 = vmatpush2.bf16.msra.mxu1 %v8105_v61  ;;  %5283 = vmatprep.subr.bf16.mxu0 %v8110_v62  ;;  %v8182_v61 = vld [vmem:[%s12101_s1 + $0x1004] ss:$16 sps:$4 sm:$0xff]  }
  0xf1   :  { %5326 = vmatprep.subr.bf16.mxu1 %v8113_v63  ;;  %v8185_v62 = vld [vmem:[%s12101_s1 + $0x1204] ss:$16 sps:$4 sm:$0xff]   ;;  %v8180_v63 = vld [vmem:[%s12101_s1 + $0x1000] ss:$16 sps:$4 sm:$0xff]  }
  0xf3   :  { %5284 = vmatpush2.bf16.msra.mxu0 %v8108_v0  ;;  %v8183_v0 = vld [vmem:[%s12101_s1 + $0x1200] ss:$16 sps:$4 sm:$0xff]  }
  0xf4   :  { %5327 = vmatpush2.bf16.msra.mxu1 %v8111_v1  ;;  %5285 = vmatprep.subr.bf16.mxu0 %v8116_v2  ;;  %v8188_v1 = vld [vmem:[%s12101_s1 + $0x11e4] ss:$16 sps:$4 sm:$0xff]  }
  0xf5   :  { %5328 = vmatprep.subr.bf16.mxu1 %v8119_v3  ;;  %v8191_v2 = vld [vmem:[%s12101_s1 + $0x13e4] ss:$16 sps:$4 sm:$0xff]   ;;  %v8186_v3 = vld [vmem:[%s12101_s1 + $0x11e0] ss:$16 sps:$4 sm:$0xff]  }
  0xf7   :  { %5286 = vmatpush2.bf16.msra.mxu0 %v8114_v4  ;;  %v8189_v4 = vld [vmem:[%s12101_s1 + $0x13e0] ss:$16 sps:$4 sm:$0xff]  }
  0xf8   :  { %5329 = vmatpush2.bf16.msra.mxu1 %v8117_v5  ;;  %5287 = vmatprep.subr.bf16.mxu0 %v8122_v7  ;;  %v8194_v5 = vld [vmem:[%s12101_s1 + $0x11c4] ss:$16 sps:$4 sm:$0xff]   ;;  %v8192_v7 = vld [vmem:[%s12101_s1 + $0x11c0] ss:$16 sps:$4 sm:$0xff]  }
  0xf9   :  { %5330 = vmatprep.subr.bf16.mxu1 %v8125_v8  ;;  %v8195_v8 = vld [vmem:[%s12101_s1 + $0x13c0] ss:$16 sps:$4 sm:$0xff]  }
  0xfb   :  { %5288 = vmatpush2.bf16.msra.mxu0 %v8120_v9  ;;  %v8200_v9 = vld [vmem:[%s12101_s1 + $0x11a4] ss:$16 sps:$4 sm:$0xff]  }
  0xfc   :  { %5331 = vmatpush2.bf16.msra.mxu1 %v8123_v10  ;;  %5289 = vmatprep.subr.bf16.mxu0 %v8128_v12  ;;  %v8203_v10 = vld [vmem:[%s12101_s1 + $0x13a4] ss:$16 sps:$4 sm:$0xff]   ;;  %v8198_v12 = vld [vmem:[%s12101_s1 + $0x11a0] ss:$16 sps:$4 sm:$0xff]  }
  0xfd   :  { %5332 = vmatprep.subr.bf16.mxu1 %v8131_v13  ;;  %v8201_v13 = vld [vmem:[%s12101_s1 + $0x13a0] ss:$16 sps:$4 sm:$0xff]  }
  0xff   :  { %5290 = vmatpush2.bf16.msra.mxu0 %v8126_v14  ;;  %v8206_v14 = vld [vmem:[%s12101_s1 + $0x1184] ss:$16 sps:$4 sm:$0xff]  }
 0x100   :  { %5333 = vmatpush2.bf16.msra.mxu1 %v8129_v15  ;;  %5345 = vmatprep.subr.bf16.mxu0 %v8140_v18  ;;  %v8209_v15 = vld [vmem:[%s12101_s1 + $0x1384] ss:$16 sps:$4 sm:$0xff]   ;;  %v8207_v18 = vld [vmem:[%s12101_s1 + $0x1380] ss:$16 sps:$4 sm:$0xff]  }
 0x101   :  { %5388 = vmatprep.subr.bf16.mxu1 %v8143_v19  ;;  %v8212_v19 = vld [vmem:[%s12101_s1 + $0x1164] ss:$16 sps:$4 sm:$0xff]  }
 0x102   :  { %v5035_v29 = vpop.f32.mrf.mxu0  ;;  %5292 = vmatmul.mubr.bf16.vlgmr.msra.gmra.mxu0 %v8132_v20  ;;  %v8215_v20 = vld [vmem:[%s12101_s1 + $0x1364] ss:$16 sps:$4 sm:$0xff]  }
 0x103   :  { %v5078_v30 = vpop.f32.mrf.mxu1  ;;  %5335 = vmatmul.mubr.bf16.vlgmr.msra.gmra.mxu1 %v8135_v21  ;;  %v5036_v32 = vadd.f32 %v5035_v29, %v858_v23  ;;  %5346 = vmatpush1.bf16.msra.mxu0 %v8138_v22  ;;  %v8210_v21 = vld [vmem:[%s12101_s1 + $0x1160] ss:$16 sps:$4 sm:$0xff]  }
 0x104   :  { %5389 = vmatpush1.bf16.msra.mxu1 %v8141_v24  ;;  %v10000_v34 = vpop.f32.mrf.mxu0  ;;  %5347 = vmatprep.subr.bf16.mxu0 %v8146_v25  ;;  %v8213_v22 = vld [vmem:[%s12101_s1 + $0x1360] ss:$16 sps:$4 sm:$0xff]   ;;  %v8221_v24 = vld [vmem:[%s12101_s1 + $0x1344] ss:$16 sps:$4 sm:$0xff]  }
 0x105   :  { %v10002_v35 = vpop.f32.mrf.mxu1  ;;  %5390 = vmatprep.subr.bf16.mxu1 %v8149_v26  ;;  %v10010_v38 = vadd.f32 %v5078_v30, %v5036_v32  ;;  %5377 = vmatprep.mubr.bf16.mxu0 %v8236_v27  ;;  %v8216_v25 = vld [vmem:[%s12101_s1 + $0x1140] ss:$16 sps:$4 sm:$0xff]   ;;  %v8224_v27 = vld [vmem:[%s12101_s1 + $0x1124] ss:$16 sps:$4 sm:$0xff]  }
 0x106   :  { %5420 = vmatprep.mubr.bf16.mxu1 %v8239_v28  ;;  %v5039_v39 = vpop.f32.mrf.mxu0  ;;  %v8219_v26 = vld [vmem:[%s12101_s1 + $0x1340] ss:$16 sps:$4 sm:$0xff]   ;;  %v8227_v28 = vld [vmem:[%s12101_s1 + $0x1324] ss:$16 sps:$4 sm:$0xff]  }
 0x107   :  { %v5040_v41 = vadd.f32 %v5039_v39, %v858_v23  ;;  %5348 = vmatpush1.bf16.msra.mxu0 %v8144_v31  ;;  %v5082_v43 = vpop.f32.mrf.mxu1  ;;  %v8218_v23 = vld [vmem:[%s12101_s1 + $0x1144] ss:$16 sps:$4 sm:$0xff]   ;;  %v8222_v29 = vld [vmem:[%s12101_s1 + $0x1120] ss:$16 sps:$4 sm:$0xff]   ;;  %v8237_v39 = vld [vmem:[%s12102_s0 + $0x48] ss:$100 sps:$4 sm:$0xff]  }
 0x108   :  { %5391 = vmatpush1.bf16.msra.mxu1 %v8147_v33  ;;  %5349 = vmatprep.subr.bf16.mxu0 %v8152_v36  ;;  %v8225_v30 = vld [vmem:[%s12101_s1 + $0x1320] ss:$16 sps:$4 sm:$0xff]   ;;  %v8230_v31 = vld [vmem:[%s12101_s1 + $0x1104] ss:$16 sps:$4 sm:$0xff]  }
 0x109   :  { %5392 = vmatprep.subr.bf16.mxu1 %v8155_v37  ;;  %v10024_v46 = vadd.f32 %v5082_v43, %v5040_v41  ;;  %v8233_v32 = vld [vmem:[%s12101_s1 + $0x1304] ss:$16 sps:$4 sm:$0xff]   ;;  %v8228_v33 = vld [vmem:[%s12101_s1 + $0x1100] ss:$16 sps:$4 sm:$0xff]  }
 0x10a   :  { %v8231_v36 = vld [vmem:[%s12101_s1 + $0x1300] ss:$16 sps:$4 sm:$0xff]   ;;  %v8245_v41 = vld [vmem:[%s12101_s1 + $0x16e4] ss:$16 sps:$4 sm:$0xff]  }
 0x10b   :  { %5350 = vmatpush1.bf16.msra.mxu0 %v8150_v40  ;;  %v8234_v37 = vld [vmem:[%s12102_s0 + $0x40] ss:$100 sps:$4 sm:$0xff]  }
 0x10c   :  { %5393 = vmatpush1.bf16.msra.mxu1 %v8153_v42  ;;  %5351 = vmatprep.subr.bf16.mxu0 %v8158_v44  ;;  %v8242_v40 = vld [vmem:[%s12101_s1 + $0x14e4] ss:$16 sps:$4 sm:$0xff]   ;;  %v8240_v42 = vld [vmem:[%s12101_s1 + $0x14e0] ss:$16 sps:$4 sm:$0xff]   ;;  %v10194_v44 = vpop.f32.mrf.mxu0 }
 0x10d   :  { %5394 = vmatprep.subr.bf16.mxu1 %v8161_v45  ;;  %v8243_v43 = vld [vmem:[%s12101_s1 + $0x16e0] ss:$16 sps:$4 sm:$0xff]   ;;  %v10196_v45 = vpop.f32.mrf.mxu1 }
 0x10f   :  { %5352 = vmatpush1.bf16.msra.mxu0 %v8156_v47  ;;  %v8248_v47 = vld [vmem:[%s12101_s1 + $0x14c4] ss:$16 sps:$4 sm:$0xff]  }
 0x110   :  { %5395 = vmatpush1.bf16.msra.mxu1 %v8159_v48  ;;  %5353 = vmatprep.subr.bf16.mxu0 %v8164_v49  ;;  %v8251_v48 = vld [vmem:[%s12101_s1 + $0x16c4] ss:$16 sps:$4 sm:$0xff]   ;;  %v8246_v49 = vld [vmem:[%s12101_s1 + $0x14c0] ss:$16 sps:$4 sm:$0xff]  }
 0x111   :  { %5396 = vmatprep.subr.bf16.mxu1 %v8167_v50  ;;  %v8249_v50 = vld [vmem:[%s12101_s1 + $0x16c0] ss:$16 sps:$4 sm:$0xff]  }
 0x113   :  { %5354 = vmatpush1.bf16.msra.mxu0 %v8162_v51  ;;  %v8338_v51 = vld [vmem:[%s12102_s0 + $0x54] ss:$100 sps:$4 sm:$0xff]  }
 0x114   :  { %5397 = vmatpush1.bf16.msra.mxu1 %v8165_v52  ;;  %5355 = vmatprep.subr.bf16.mxu0 %v8170_v53  ;;  %v8341_v52 = vld [vmem:[%s12102_s0 + $0x5c] ss:$100 sps:$4 sm:$0xff]  }
 0x115   :  { %5398 = vmatprep.subr.bf16.mxu1 %v8173_v54 }
 0x117   :  { %5356 = vmatpush1.bf16.msra.mxu0 %v8168_v55 }
 0x118   :  { %5399 = vmatpush1.bf16.msra.mxu1 %v8171_v56  ;;  %5357 = vmatprep.subr.bf16.mxu0 %v8176_v57 }
 0x119   :  { %5400 = vmatprep.subr.bf16.mxu1 %v8179_v58  ;;  %v8254_v58 = vld [vmem:[%s12101_s1 + $0x14a4] ss:$16 sps:$4 sm:$0xff]  }
 0x11b   :  { %5358 = vmatpush1.bf16.msra.mxu0 %v8174_v59  ;;  %v8257_v59 = vld [vmem:[%s12101_s1 + $0x16a4] ss:$16 sps:$4 sm:$0xff]  }
 0x11c   :  { %5401 = vmatpush1.bf16.msra.mxu1 %v8177_v60  ;;  %5359 = vmatprep.subr.bf16.mxu0 %v8182_v61  ;;  %v8255_v61 = vld [vmem:[%s12101_s1 + $0x16a0] ss:$16 sps:$4 sm:$0xff]  }
 0x11d   :  { %5402 = vmatprep.subr.bf16.mxu1 %v8185_v62 }
 0x11f   :  { %5360 = vmatpush1.bf16.msra.mxu0 %v8180_v63 }
 0x120   :  { %5403 = vmatpush1.bf16.msra.mxu1 %v8183_v0  ;;  %5361 = vmatprep.subr.bf16.mxu0 %v8188_v1  ;;  %v8260_v1 = vld [vmem:[%s12101_s1 + $0x1484] ss:$16 sps:$4 sm:$0xff]  }
 0x121   :  { %5404 = vmatprep.subr.bf16.mxu1 %v8191_v2  ;;  %v8263_v2 = vld [vmem:[%s12101_s1 + $0x1684] ss:$16 sps:$4 sm:$0xff]  }
 0x123   :  { %5362 = vmatpush2.bf16.msra.mxu0 %v8186_v3 }
 0x124   :  { %5405 = vmatpush2.bf16.msra.mxu1 %v8189_v4  ;;  %5363 = vmatprep.subr.bf16.mxu0 %v8194_v5  ;;  %v8261_v4 = vld [vmem:[%s12101_s1 + $0x1680] ss:$16 sps:$4 sm:$0xff]   ;;  %v8266_v5 = vld [vmem:[%s12101_s1 + $0x1464] ss:$16 sps:$4 sm:$0xff]  }
 0x125   :  { %5406 = vmatprep.subr.bf16.mxu1 %v8197_v6  ;;  %v8269_v6 = vld [vmem:[%s12101_s1 + $0x1664] ss:$16 sps:$4 sm:$0xff]  }
 0x127   :  { %5364 = vmatpush2.bf16.msra.mxu0 %v8192_v7  ;;  %v8264_v7 = vld [vmem:[%s12101_s1 + $0x1460] ss:$16 sps:$4 sm:$0xff]  }
 0x128   :  { %5407 = vmatpush2.bf16.msra.mxu1 %v8195_v8  ;;  %5365 = vmatprep.subr.bf16.mxu0 %v8200_v9  ;;  %v8267_v8 = vld [vmem:[%s12101_s1 + $0x1660] ss:$16 sps:$4 sm:$0xff]   ;;  %v8272_v9 = vld [vmem:[%s12101_s1 + $0x1444] ss:$16 sps:$4 sm:$0xff]  }
 0x129   :  { %5408 = vmatprep.subr.bf16.mxu1 %v8203_v10  ;;  %v8275_v10 = vld [vmem:[%s12101_s1 + $0x1644] ss:$16 sps:$4 sm:$0xff]  }
 0x12b   :  { %5366 = vmatpush2.bf16.msra.mxu0 %v8198_v12  ;;  %v8270_v12 = vld [vmem:[%s12101_s1 + $0x1440] ss:$16 sps:$4 sm:$0xff]  }
 0x12c   :  { %5409 = vmatpush2.bf16.msra.mxu1 %v8201_v13  ;;  %5367 = vmatprep.subr.bf16.mxu0 %v8206_v14  ;;  %v8273_v13 = vld [vmem:[%s12101_s1 + $0x1640] ss:$16 sps:$4 sm:$0xff]   ;;  %v8278_v14 = vld [vmem:[%s12101_s1 + $0x1424] ss:$16 sps:$4 sm:$0xff]  }
 0x12d   :  { %5410 = vmatprep.subr.bf16.mxu1 %v8209_v15  ;;  %v8281_v15 = vld [vmem:[%s12101_s1 + $0x1624] ss:$16 sps:$4 sm:$0xff]  }
 0x12f   :  { %5368 = vmatpush2.bf16.msra.mxu0 %v8204_v16  ;;  %v8276_v16 = vld [vmem:[%s12101_s1 + $0x1420] ss:$16 sps:$4 sm:$0xff]  }
 0x130   :  { %5411 = vmatpush2.bf16.msra.mxu1 %v8207_v18  ;;  %5369 = vmatprep.subr.bf16.mxu0 %v8212_v19  ;;  %v8279_v18 = vld [vmem:[%s12101_s1 + $0x1620] ss:$16 sps:$4 sm:$0xff]   ;;  %v8284_v19 = vld [vmem:[%s12101_s1 + $0x1404] ss:$16 sps:$4 sm:$0xff]  }
 0x131   :  { %5412 = vmatprep.subr.bf16.mxu1 %v8215_v20  ;;  %v8287_v20 = vld [vmem:[%s12101_s1 + $0x1604] ss:$16 sps:$4 sm:$0xff]  }
 0x133   :  { %5370 = vmatpush2.bf16.msra.mxu0 %v8210_v21  ;;  %v8282_v21 = vld [vmem:[%s12101_s1 + $0x1400] ss:$16 sps:$4 sm:$0xff]  }
 0x134   :  { %5413 = vmatpush2.bf16.msra.mxu1 %v8213_v22  ;;  %5371 = vmatprep.subr.bf16.mxu0 %v8218_v23  ;;  %v8285_v22 = vld [vmem:[%s12101_s1 + $0x1600] ss:$16 sps:$4 sm:$0xff]   ;;  %v8290_v23 = vld [vmem:[%s12101_s1 + $0x15e4] ss:$16 sps:$4 sm:$0xff]  }
 0x135   :  { %5414 = vmatprep.subr.bf16.mxu1 %v8221_v24  ;;  %v8293_v24 = vld [vmem:[%s12101_s1 + $0x17e4] ss:$16 sps:$4 sm:$0xff]  }
 0x137   :  { %5372 = vmatpush2.bf16.msra.mxu0 %v8216_v25  ;;  %v8288_v25 = vld [vmem:[%s12101_s1 + $0x15e0] ss:$16 sps:$4 sm:$0xff]  }
 0x138   :  { %5415 = vmatpush2.bf16.msra.mxu1 %v8219_v26  ;;  %5373 = vmatprep.subr.bf16.mxu0 %v8224_v27  ;;  %v8291_v26 = vld [vmem:[%s12101_s1 + $0x17e0] ss:$16 sps:$4 sm:$0xff]   ;;  %v8296_v27 = vld [vmem:[%s12101_s1 + $0x15c4] ss:$16 sps:$4 sm:$0xff]  }
 0x139   :  { %5416 = vmatprep.subr.bf16.mxu1 %v8227_v28  ;;  %v8299_v28 = vld [vmem:[%s12101_s1 + $0x17c4] ss:$16 sps:$4 sm:$0xff]  }
 0x13b   :  { %5374 = vmatpush2.bf16.msra.mxu0 %v8222_v29  ;;  %v8294_v29 = vld [vmem:[%s12101_s1 + $0x15c0] ss:$16 sps:$4 sm:$0xff]  }
 0x13c   :  { %5417 = vmatpush2.bf16.msra.mxu1 %v8225_v30  ;;  %5375 = vmatprep.subr.bf16.mxu0 %v8230_v31  ;;  %v8297_v30 = vld [vmem:[%s12101_s1 + $0x17c0] ss:$16 sps:$4 sm:$0xff]   ;;  %v8302_v31 = vld [vmem:[%s12101_s1 + $0x15a4] ss:$16 sps:$4 sm:$0xff]  }
 0x13d   :  { %5418 = vmatprep.subr.bf16.mxu1 %v8233_v32  ;;  %v8305_v32 = vld [vmem:[%s12101_s1 + $0x17a4] ss:$16 sps:$4 sm:$0xff]  }
 0x13f   :  { %5376 = vmatpush2.bf16.msra.mxu0 %v8228_v33  ;;  %v8300_v33 = vld [vmem:[%s12101_s1 + $0x15a0] ss:$16 sps:$4 sm:$0xff]  }
 0x140   :  { %5419 = vmatpush2.bf16.msra.mxu1 %v8231_v36  ;;  %5431 = vmatprep.subr.bf16.mxu0 %v8242_v40  ;;  %v8303_v36 = vld [vmem:[%s12101_s1 + $0x17a0] ss:$16 sps:$4 sm:$0xff]  }
 0x141   :  { %5474 = vmatprep.subr.bf16.mxu1 %v8245_v41  ;;  %v8306_v40 = vld [vmem:[%s12101_s1 + $0x1580] ss:$16 sps:$4 sm:$0xff]  }
 0x142   :  { %v5121_v53 = vpop.f32.mrf.mxu0  ;;  %5378 = vmatmul.mubr.bf16.vlgmr.msra.gmra.mxu0 %v8234_v37  ;;  %v8308_v37 = vld [vmem:[%s12101_s1 + $0x1584] ss:$16 sps:$4 sm:$0xff]   ;;  %v8309_v41 = vld [vmem:[%s12101_s1 + $0x1780] ss:$16 sps:$4 sm:$0xff]  }
 0x143   :  { %v5164_v54 = vpop.f32.mrf.mxu1  ;;  %5421 = vmatmul.mubr.bf16.vlgmr.msra.gmra.mxu1 %v8237_v39  ;;  %v5122_v55 = vadd.f32 %v5121_v53, %v10010_v38  ;;  %5432 = vmatpush1.bf16.msra.mxu0 %v8240_v42  ;;  %v8252_v38 = vld [vmem:[%s12101_s1 + $0x14a0] ss:$16 sps:$4 sm:$0xff]   ;;  %v8311_v39 = vld [vmem:[%s12101_s1 + $0x1784] ss:$16 sps:$4 sm:$0xff]  }
 0x144   :  { %5475 = vmatpush1.bf16.msra.mxu1 %v8243_v43  ;;  %v10217_v56 = vpop.f32.mrf.mxu0  ;;  %5433 = vmatprep.subr.bf16.mxu0 %v8248_v47  ;;  %v8314_v42 = vld [vmem:[%s12101_s1 + $0x1564] ss:$16 sps:$4 sm:$0xff]   ;;  %v8312_v47 = vld [vmem:[%s12101_s1 + $0x1560] ss:$16 sps:$4 sm:$0xff]  }
 0x145   :  { %v10219_v57 = vpop.f32.mrf.mxu1  ;;  %5476 = vmatprep.subr.bf16.mxu1 %v8251_v48  ;;  %v10227_v60 = vadd.f32 %v5164_v54, %v5122_v55  ;;  %5463 = vmatprep.mubr.bf16.mxu0 %v8338_v51  ;;  %v8317_v43 = vld [vmem:[%s12101_s1 + $0x1764] ss:$16 sps:$4 sm:$0xff]   ;;  %v8315_v48 = vld [vmem:[%s12101_s1 + $0x1760] ss:$16 sps:$4 sm:$0xff]  }
 0x146   :  { %5506 = vmatprep.mubr.bf16.mxu1 %v8341_v52  ;;  %v5125_v62 = vpop.f32.mrf.mxu0  ;;  %v8318_v51 = vld [vmem:[%s12101_s1 + $0x1540] ss:$16 sps:$4 sm:$0xff]   ;;  %v8326_v53 = vld [vmem:[%s12101_s1 + $0x1524] ss:$16 sps:$4 sm:$0xff]  }
 0x147   :  { %v5126_v63 = vadd.f32 %v5125_v62, %v10024_v46  ;;  %5434 = vmatpush1.bf16.msra.mxu0 %v8246_v49  ;;  %v5168_v0 = vpop.f32.mrf.mxu1  ;;  %v8258_v46 = vld [vmem:[%s12101_s1 + $0x1480] ss:$16 sps:$4 sm:$0xff]   ;;  %v8320_v49 = vld [vmem:[%s12101_s1 + $0x1544] ss:$16 sps:$4 sm:$0xff]  }
 0x148   :  { %5477 = vmatpush1.bf16.msra.mxu1 %v8249_v50  ;;  %5435 = vmatprep.subr.bf16.mxu0 %v8254_v58  ;;  %v8323_v50 = vld [vmem:[%s12101_s1 + $0x1744] ss:$16 sps:$4 sm:$0xff]   ;;  %v8321_v52 = vld [vmem:[%s12101_s1 + $0x1740] ss:$16 sps:$4 sm:$0xff]  }
 0x149   :  { %5478 = vmatprep.subr.bf16.mxu1 %v8257_v59  ;;  %v10242_v3 = vadd.f32 %v5168_v0, %v5126_v63  ;;  %v8329_v54 = vld [vmem:[%s12101_s1 + $0x1724] ss:$16 sps:$4 sm:$0xff]   ;;  %v8324_v55 = vld [vmem:[%s12101_s1 + $0x1520] ss:$16 sps:$4 sm:$0xff]   ;;  %v8339_v0 = vld [vmem:[%s12102_s0 + $0x58] ss:$100 sps:$4 sm:$0xff]  }
 0x14a   :  { %v8327_v58 = vld [vmem:[%s12101_s1 + $0x1720] ss:$16 sps:$4 sm:$0xff]   ;;  %v8332_v59 = vld [vmem:[%s12101_s1 + $0x1504] ss:$16 sps:$4 sm:$0xff]  }
 0x14b   :  { %5436 = vmatpush1.bf16.msra.mxu0 %v8252_v38  ;;  %v8335_v38 = vld [vmem:[%s12101_s1 + $0x1704] ss:$16 sps:$4 sm:$0xff]   ;;  %v8333_v62 = vld [vmem:[%s12101_s1 + $0x1700] ss:$16 sps:$4 sm:$0xff]  }
 0x14c   :  { %5479 = vmatpush1.bf16.msra.mxu1 %v8255_v61  ;;  %5437 = vmatprep.subr.bf16.mxu0 %v8260_v1  ;;  %v8330_v61 = vld [vmem:[%s12101_s1 + $0x1500] ss:$16 sps:$4 sm:$0xff]   ;;  %v8344_v1 = vld [vmem:[%s12101_s1 + $0x18e4] ss:$16 sps:$4 sm:$0xff]  }
 0x14d   :  { %5480 = vmatprep.subr.bf16.mxu1 %v8263_v2  ;;  %v8336_v63 = vld [vmem:[%s12102_s0 + $0x50] ss:$100 sps:$4 sm:$0xff]   ;;  %v8347_v2 = vld [vmem:[%s12101_s1 + $0xec] ss:$16 sps:$4 sm:$0xff]  }
 0x14f   :  { %5438 = vmatpush1.bf16.msra.mxu0 %v8258_v46  ;;  %v8342_v46 = vld [vmem:[%s12101_s1 + $0x18e0] ss:$16 sps:$4 sm:$0xff]  }
 0x150   :  { %5481 = vmatpush1.bf16.msra.mxu1 %v8261_v4  ;;  %5439 = vmatprep.subr.bf16.mxu0 %v8266_v5  ;;  %v8345_v4 = vld [vmem:[%s12101_s1 + $0xe8] ss:$16 sps:$4 sm:$0xff]   ;;  %v10412_v5 = vpop.f32.mrf.mxu0 }
 0x151   :  { %5482 = vmatprep.subr.bf16.mxu1 %v8269_v6  ;;  %v10414_v6 = vpop.f32.mrf.mxu1 }
 0x153   :  { %5440 = vmatpush1.bf16.msra.mxu0 %v8264_v7  ;;  %v8350_v7 = vld [vmem:[%s12101_s1 + $0x18c4] ss:$16 sps:$4 sm:$0xff]  }
 0x154   :  { %5483 = vmatpush1.bf16.msra.mxu1 %v8267_v8  ;;  %5441 = vmatprep.subr.bf16.mxu0 %v8272_v9  ;;  %v8353_v8 = vld [vmem:[%s12101_s1 + $0xcc] ss:$16 sps:$4 sm:$0xff]   ;;  %v8348_v9 = vld [vmem:[%s12101_s1 + $0x18c0] ss:$16 sps:$4 sm:$0xff]  }
 0x155   :  { %5484 = vmatprep.subr.bf16.mxu1 %v8275_v10  ;;  %v8351_v10 = vld [vmem:[%s12101_s1 + $0xc8] ss:$16 sps:$4 sm:$0xff]  }
 0x157   :  { %5442 = vmatpush1.bf16.msra.mxu0 %v8270_v12 }
 0x158   :  { %5485 = vmatpush1.bf16.msra.mxu1 %v8273_v13  ;;  %5443 = vmatprep.subr.bf16.mxu0 %v8278_v14 }
 0x159   :  { %5486 = vmatprep.subr.bf16.mxu1 %v8281_v15 }
 0x15b   :  { %5444 = vmatpush1.bf16.msra.mxu0 %v8276_v16 }
 0x15c   :  { %5487 = vmatpush1.bf16.msra.mxu1 %v8279_v18  ;;  %5445 = vmatprep.subr.bf16.mxu0 %v8284_v19  ;;  %v8356_v18 = vld [vmem:[%s12101_s1 + $0x18a4] ss:$16 sps:$4 sm:$0xff]   ;;  %v8359_v19 = vld [vmem:[%s12101_s1 + $0xac] ss:$16 sps:$4 sm:$0xff]  }
 0x15d   :  { %5488 = vmatprep.subr.bf16.mxu1 %v8287_v20 }
 0x15f   :  { %5446 = vmatpush1.bf16.msra.mxu0 %v8282_v21  ;;  %v8357_v21 = vld [vmem:[%s12101_s1 + $0xa8] ss:$16 sps:$4 sm:$0xff]  }
 0x160   :  { %5489 = vmatpush1.bf16.msra.mxu1 %v8285_v22  ;;  %5447 = vmatprep.subr.bf16.mxu0 %v8290_v23  ;;  %v9105_v22 = vmov 0   ;;  %v9079_v23 = vld [vmem:[%s12102_s0 + $0x4] ss:$100 sps:$4 sm:$0xff]  }
 0x161   :  { %5490 = vmatprep.subr.bf16.mxu1 %v8293_v24 }
 0x163   :  { %5448 = vmatpush2.bf16.msra.mxu0 %v8288_v25 }
 0x164   :  { %5491 = vmatpush2.bf16.msra.mxu1 %v8291_v26  ;;  %5449 = vmatprep.subr.bf16.mxu0 %v8296_v27  ;;  %v8362_v27 = vld [vmem:[%s12101_s1 + $0x1884] ss:$16 sps:$4 sm:$0xff]  }
 0x165   :  { %5492 = vmatprep.subr.bf16.mxu1 %v8299_v28  ;;  %v8365_v28 = vld [vmem:[%s12101_s1 + $0x8c] ss:$16 sps:$4 sm:$0xff]  }
 0x167   :  { %5450 = vmatpush2.bf16.msra.mxu0 %v8294_v29 }
 0x168   :  { %5493 = vmatpush2.bf16.msra.mxu1 %v8297_v30  ;;  %5451 = vmatprep.subr.bf16.mxu0 %v8302_v31  ;;  %v8363_v30 = vld [vmem:[%s12101_s1 + $0x88] ss:$16 sps:$4 sm:$0xff]   ;;  %v8368_v31 = vld [vmem:[%s12101_s1 + $0x1864] ss:$16 sps:$4 sm:$0xff]  }
 0x169   :  { %5494 = vmatprep.subr.bf16.mxu1 %v8305_v32  ;;  %v8371_v32 = vld [vmem:[%s12101_s1 + $0x6c] ss:$16 sps:$4 sm:$0xff]  }
 0x16b   :  { %5452 = vmatpush2.bf16.msra.mxu0 %v8300_v33  ;;  %v8366_v33 = vld [vmem:[%s12101_s1 + $0x1860] ss:$16 sps:$4 sm:$0xff]  }
 0x16c   :  { %5495 = vmatpush2.bf16.msra.mxu1 %v8303_v36  ;;  %5453 = vmatprep.subr.bf16.mxu0 %v8308_v37  ;;  %v8369_v36 = vld [vmem:[%s12101_s1 + $0x68] ss:$16 sps:$4 sm:$0xff]   ;;  %v8374_v37 = vld [vmem:[%s12101_s1 + $0x1844] ss:$16 sps:$4 sm:$0xff]  }
 0x16d   :  { %5496 = vmatprep.subr.bf16.mxu1 %v8311_v39  ;;  %v8377_v39 = vld [vmem:[%s12101_s1 + $0x4c] ss:$16 sps:$4 sm:$0xff]  }
 0x16f   :  { %5454 = vmatpush2.bf16.msra.mxu0 %v8306_v40  ;;  %v8372_v40 = vld [vmem:[%s12101_s1 + $0x1840] ss:$16 sps:$4 sm:$0xff]  }
 0x170   :  { %5497 = vmatpush2.bf16.msra.mxu1 %v8309_v41  ;;  %5455 = vmatprep.subr.bf16.mxu0 %v8314_v42  ;;  %v8375_v41 = vld [vmem:[%s12101_s1 + $0x48] ss:$16 sps:$4 sm:$0xff]   ;;  %v8380_v42 = vld [vmem:[%s12101_s1 + $0x1824] ss:$16 sps:$4 sm:$0xff]  }
 0x171   :  { %5498 = vmatprep.subr.bf16.mxu1 %v8317_v43  ;;  %v8383_v43 = vld [vmem:[%s12101_s1 + $0x2c] ss:$16 sps:$4 sm:$0xff]  }
 0x173   :  { %5456 = vmatpush2.bf16.msra.mxu0 %v8312_v47  ;;  %v8378_v47 = vld [vmem:[%s12101_s1 + $0x1820] ss:$16 sps:$4 sm:$0xff]  }
 0x174   :  { %5499 = vmatpush2.bf16.msra.mxu1 %v8315_v48  ;;  %5457 = vmatprep.subr.bf16.mxu0 %v8320_v49  ;;  %v8381_v48 = vld [vmem:[%s12101_s1 + $0x28] ss:$16 sps:$4 sm:$0xff]   ;;  %v8386_v49 = vld [vmem:[%s12101_s1 + $0x1804] ss:$16 sps:$4 sm:$0xff]  }
 0x175   :  { %5500 = vmatprep.subr.bf16.mxu1 %v8323_v50  ;;  %v8389_v50 = vld [vmem:[%s12101_s1 + $0xc] ss:$16 sps:$4 sm:$0xff]  }
 0x177   :  { %5458 = vmatpush2.bf16.msra.mxu0 %v8318_v51  ;;  %v8384_v51 = vld [vmem:[%s12101_s1 + $0x1800] ss:$16 sps:$4 sm:$0xff]  }
 0x178   :  { %5501 = vmatpush2.bf16.msra.mxu1 %v8321_v52  ;;  %5459 = vmatprep.subr.bf16.mxu0 %v8326_v53  ;;  %v8387_v52 = vld [vmem:[%s12101_s1 + $0x8] ss:$16 sps:$4 sm:$0xff]   ;;  %v8390_v53 = vld [vmem:[%s12102_s0 + $0x60] ss:$100 sps:$4 sm:$0xff]  }
 0x179   :  { %5502 = vmatprep.subr.bf16.mxu1 %v8329_v54  ;;  %v8393_v54 = vld [vmem:[%s12101_s1 + $0x1ec] ss:$16 sps:$4 sm:$0xff]  }
 0x17b   :  { %5460 = vmatpush2.bf16.msra.mxu0 %v8324_v55  ;;  %v8396_v55 = vld [vmem:[%s12101_s1 + $0x2ec] ss:$16 sps:$4 sm:$0xff]  }
 0x17c   :  { %5503 = vmatpush2.bf16.msra.mxu1 %v8327_v58  ;;  %5461 = vmatprep.subr.bf16.mxu0 %v8332_v59  ;;  %v8391_v58 = vld [vmem:[%s12101_s1 + $0x1e8] ss:$16 sps:$4 sm:$0xff]  }
 0x17d   :  { %5504 = vmatprep.subr.bf16.mxu1 %v8335_v38  ;;  %v8394_v59 = vld [vmem:[%s12101_s1 + $0x2e8] ss:$16 sps:$4 sm:$0xff]   ;;  %v8399_v38 = vld [vmem:[%s12101_s1 + $0x1cc] ss:$16 sps:$4 sm:$0xff]  }
 0x17f   :  { %5462 = vmatpush2.bf16.msra.mxu0 %v8330_v61  ;;  %v8402_v61 = vld [vmem:[%s12101_s1 + $0x2cc] ss:$16 sps:$4 sm:$0xff]  }
 0x180   :  { %5505 = vmatpush2.bf16.msra.mxu1 %v8333_v62  ;;  %5517 = vmatprep.subr.bf16.mxu0 %v8344_v1  ;;  %v8397_v62 = vld [vmem:[%s12101_s1 + $0x1c8] ss:$16 sps:$4 sm:$0xff]   ;;  %v8408_v1 = vld [vmem:[%s12101_s1 + $0x2ac] ss:$16 sps:$4 sm:$0xff]  }
 0x181   :  { %5560 = vmatprep.subr.bf16.mxu1 %v8347_v2  ;;  %v9080_v2 = vld [vmem:[%s12102_s0 + $0xc] ss:$100 sps:$4 sm:$0xff]  }
 0x182   :  { %v5207_v12 = vpop.f32.mrf.mxu0  ;;  %5464 = vmatmul.mubr.bf16.vlgmr.msra.gmra.mxu0 %v8336_v63  ;;  %v8400_v63 = vld [vmem:[%s12101_s1 + $0x2c8] ss:$16 sps:$4 sm:$0xff]  }
 0x183   :  { %v5250_v13 = vpop.f32.mrf.mxu1  ;;  %5507 = vmatmul.mubr.bf16.vlgmr.msra.gmra.mxu1 %v8339_v0  ;;  %v5208_v14 = vadd.f32 %v5207_v12, %v10227_v60  ;;  %5518 = vmatpush1.bf16.msra.mxu0 %v8342_v46  ;;  %v8354_v60 = vld [vmem:[%s12101_s1 + $0x18a0] ss:$16 sps:$4 sm:$0xff]   ;;  %v8405_v0 = vld [vmem:[%s12101_s1 + $0x1ac] ss:$16 sps:$4 sm:$0xff]   ;;  %v8403_v46 = vld [vmem:[%s12101_s1 + $0x1a8] ss:$16 sps:$4 sm:$0xff]  }
 0x184   :  { %5561 = vmatpush1.bf16.msra.mxu1 %v8345_v4  ;;  %v10429_v15 = vpop.f32.mrf.mxu0  ;;  %5519 = vmatprep.subr.bf16.mxu0 %v8350_v7  ;;  %v8406_v4 = vld [vmem:[%s12101_s1 + $0x2a8] ss:$16 sps:$4 sm:$0xff]   ;;  %v8411_v7 = vld [vmem:[%s12101_s1 + $0x18c] ss:$16 sps:$4 sm:$0xff]  }
 0x185   :  { %v10431_v16 = vpop.f32.mrf.mxu1  ;;  %5562 = vmatprep.subr.bf16.mxu1 %v8353_v8  ;;  %v10439_v20 = vadd.f32 %v5250_v13, %v5208_v14  ;;  %5549 = vmatprep.mubr.bf16.mxu0 %v9105_v22  ;;  %v8414_v8 = vld [vmem:[%s12101_s1 + $0x28c] ss:$16 sps:$4 sm:$0xff]   ;;  %v8415_v14 = vld [vmem:[%s12101_s1 + $0x168] ss:$16 sps:$4 sm:$0xff]  }
 0x186   :  { %5592 = vmatprep.mubr.bf16.mxu1 %v9079_v23  ;;  %v5211_v24 = vpop.f32.mrf.mxu0  ;;  %v8417_v12 = vld [vmem:[%s12101_s1 + $0x16c] ss:$16 sps:$4 sm:$0xff]   ;;  %v8424_v23 = vld [vmem:[%s12101_s1 + $0x248] ss:$16 sps:$4 sm:$0xff]  }
 0x187   :  { %v5212_v25 = vadd.f32 %v5211_v24, %v10242_v3  ;;  %5520 = vmatpush1.bf16.msra.mxu0 %v8348_v9  ;;  %v5254_v26 = vpop.f32.mrf.mxu1  ;;  %v8360_v3 = vld [vmem:[%s12101_s1 + $0x1880] ss:$16 sps:$4 sm:$0xff]   ;;  %v8409_v9 = vld [vmem:[%s12101_s1 + $0x188] ss:$16 sps:$4 sm:$0xff]   ;;  %v8420_v13 = vld [vmem:[%s12101_s1 + $0x26c] ss:$16 sps:$4 sm:$0xff]  }
 0x188   :  { %5563 = vmatpush1.bf16.msra.mxu1 %v8351_v10  ;;  %5521 = vmatprep.subr.bf16.mxu0 %v8356_v18  ;;  %v8412_v10 = vld [vmem:[%s12101_s1 + $0x288] ss:$16 sps:$4 sm:$0xff]   ;;  %v8429_v24 = vld [vmem:[%s12101_s1 + $0x12c] ss:$16 sps:$4 sm:$0xff]  }
 0x189   :  { %5564 = vmatprep.subr.bf16.mxu1 %v8359_v19  ;;  %v10458_v29 = vadd.f32 %v5254_v26, %v5212_v25  ;;  %v8418_v18 = vld [vmem:[%s12101_s1 + $0x268] ss:$16 sps:$4 sm:$0xff]   ;;  %v8423_v19 = vld [vmem:[%s12101_s1 + $0x14c] ss:$16 sps:$4 sm:$0xff]  }
 0x18a   :  { %v8432_v25 = vld [vmem:[%s12101_s1 + $0x22c] ss:$16 sps:$4 sm:$0xff]   ;;  %v8427_v26 = vld [vmem:[%s12101_s1 + $0x128] ss:$16 sps:$4 sm:$0xff]  }
 0x18b   :  { %5522 = vmatpush1.bf16.msra.mxu0 %v8354_v60  ;;  %v8426_v60 = vld [vmem:[%s12101_s1 + $0x24c] ss:$16 sps:$4 sm:$0xff]  }
 0x18c   :  { %5565 = vmatpush1.bf16.msra.mxu1 %v8357_v21  ;;  %5523 = vmatprep.subr.bf16.mxu0 %v8362_v27  ;;  %v8421_v21 = vld [vmem:[%s12101_s1 + $0x148] ss:$16 sps:$4 sm:$0xff]  }
 0x18d   :  { %5566 = vmatprep.subr.bf16.mxu1 %v8365_v28  ;;  %v8430_v27 = vld [vmem:[%s12101_s1 + $0x228] ss:$16 sps:$4 sm:$0xff]   ;;  %v8435_v28 = vld [vmem:[%s12101_s1 + $0x10c] ss:$16 sps:$4 sm:$0xff]  }
 0x18f   :  { %5524 = vmatpush1.bf16.msra.mxu0 %v8360_v3  ;;  %v8438_v3 = vld [vmem:[%s12101_s1 + $0x20c] ss:$16 sps:$4 sm:$0xff]  }
 0x190   :  { %5567 = vmatpush1.bf16.msra.mxu1 %v8363_v30  ;;  %5525 = vmatprep.subr.bf16.mxu0 %v8368_v31  ;;  %v8433_v30 = vld [vmem:[%s12101_s1 + $0x108] ss:$16 sps:$4 sm:$0xff]  }
 0x191   :  { %5568 = vmatprep.subr.bf16.mxu1 %v8371_v32  ;;  %v8436_v31 = vld [vmem:[%s12101_s1 + $0x208] ss:$16 sps:$4 sm:$0xff]   ;;  %v8441_v32 = vld [vmem:[%s12101_s1 + $0x3ec] ss:$16 sps:$4 sm:$0xff]  }
 0x193   :  { %5526 = vmatpush1.bf16.msra.mxu0 %v8366_v33  ;;  %v8444_v33 = vld [vmem:[%s12101_s1 + $0x4ec] ss:$16 sps:$4 sm:$0xff]  }
 0x194   :  { %5569 = vmatpush1.bf16.msra.mxu1 %v8369_v36  ;;  %5527 = vmatprep.subr.bf16.mxu0 %v8374_v37  ;;  %v8439_v36 = vld [vmem:[%s12101_s1 + $0x3e8] ss:$16 sps:$4 sm:$0xff]  }
 0x195   :  { %5570 = vmatprep.subr.bf16.mxu1 %v8377_v39  ;;  %v8442_v37 = vld [vmem:[%s12101_s1 + $0x4e8] ss:$16 sps:$4 sm:$0xff]   ;;  %v10628_v39 = vpop.f32.mrf.mxu0 }
 0x197   :  { %5528 = vmatpush1.bf16.msra.mxu0 %v8372_v40  ;;  %v10630_v40 = vpop.f32.mrf.mxu1 }
 0x198   :  { %5571 = vmatpush1.bf16.msra.mxu1 %v8375_v41  ;;  %5529 = vmatprep.subr.bf16.mxu0 %v8380_v42  ;;  %v8447_v41 = vld [vmem:[%s12101_s1 + $0x3cc] ss:$16 sps:$4 sm:$0xff]  }
 0x199   :  { %5572 = vmatprep.subr.bf16.mxu1 %v8383_v43  ;;  %v8450_v42 = vld [vmem:[%s12101_s1 + $0x4cc] ss:$16 sps:$4 sm:$0xff]   ;;  %v8445_v43 = vld [vmem:[%s12101_s1 + $0x3c8] ss:$16 sps:$4 sm:$0xff]  }
 0x19b   :  { %5530 = vmatpush1.bf16.msra.mxu0 %v8378_v47  ;;  %v8448_v47 = vld [vmem:[%s12101_s1 + $0x4c8] ss:$16 sps:$4 sm:$0xff]  }
 0x19c   :  { %5573 = vmatpush1.bf16.msra.mxu1 %v8381_v48  ;;  %5531 = vmatprep.subr.bf16.mxu0 %v8386_v49 }
 0x19d   :  { %5574 = vmatprep.subr.bf16.mxu1 %v8389_v50  ;;  %v9081_v50 = vld [vmem:[%s12102_s0] ss:$100 sps:$4 sm:$0xff]  }
 0x19f   :  { %5532 = vmatpush1.bf16.msra.mxu0 %v8384_v51 }
 0x1a0   :  { %5575 = vmatpush1.bf16.msra.mxu1 %v8387_v52  ;;  %5603 = vmatprep.subr.bf16.mxu0 %v8396_v55  ;;  %v8456_v55 = vld [vmem:[%s12101_s1 + $0x4ac] ss:$16 sps:$4 sm:$0xff]  }
 0x1a1   :  { %5576 = vmatprep.subr.bf16.mxu1 %v8393_v54  ;;  %v8453_v54 = vld [vmem:[%s12101_s1 + $0x3ac] ss:$16 sps:$4 sm:$0xff]  }
 0x1a2   :  { %5550 = vmatmul.mubr.bf16.vlgmr.msra.gmra.mxu0 %v8390_v53 }
 0x1a3   :  { %5604 = vmatpush1.bf16.msra.mxu0 %v8394_v59  ;;  %5635 = vmatprep.mubr.bf16.mxu0 %v9080_v2  ;;  %v8454_v59 = vld [vmem:[%s12101_s1 + $0x4a8] ss:$16 sps:$4 sm:$0xff]  }
 0x1a4   :  { %5577 = vmatpush2.bf16.msra.mxu1 %v8391_v58  ;;  %5605 = vmatprep.subr.bf16.mxu0 %v8402_v61 }
 0x1a5   :  { %5578 = vmatprep.subr.bf16.mxu1 %v8399_v38  ;;  %v9082_v38 = vld [vmem:[%s12102_s0 + $0x14] ss:$100 sps:$4 sm:$0xff]  }
 0x1a7   :  { %5606 = vmatpush1.bf16.msra.mxu0 %v8400_v63 }
 0x1a8   :  { %5579 = vmatpush2.bf16.msra.mxu1 %v8397_v62  ;;  %5607 = vmatprep.subr.bf16.mxu0 %v8408_v1  ;;  %v8462_v1 = vld [vmem:[%s12101_s1 + $0x48c] ss:$16 sps:$4 sm:$0xff]  }
 0x1a9   :  { %5580 = vmatprep.subr.bf16.mxu1 %v8405_v0  ;;  %v8459_v0 = vld [vmem:[%s12101_s1 + $0x38c] ss:$16 sps:$4 sm:$0xff]  }
 0x1ab   :  { %5608 = vmatpush1.bf16.msra.mxu0 %v8406_v4  ;;  %v8465_v4 = vld [vmem:[%s12101_s1 + $0x36c] ss:$16 sps:$4 sm:$0xff]  }
 0x1ac   :  { %5581 = vmatpush2.bf16.msra.mxu1 %v8403_v46  ;;  %5609 = vmatprep.subr.bf16.mxu0 %v8414_v8  ;;  %v8460_v46 = vld [vmem:[%s12101_s1 + $0x488] ss:$16 sps:$4 sm:$0xff]  }
 0x1ad   :  { %5582 = vmatprep.subr.bf16.mxu1 %v8411_v7  ;;  %v8468_v7 = vld [vmem:[%s12101_s1 + $0x46c] ss:$16 sps:$4 sm:$0xff]   ;;  %v8463_v8 = vld [vmem:[%s12101_s1 + $0x368] ss:$16 sps:$4 sm:$0xff]  }
 0x1af   :  { %5610 = vmatpush1.bf16.msra.mxu0 %v8412_v10  ;;  %v8471_v10 = vld [vmem:[%s12101_s1 + $0x34c] ss:$16 sps:$4 sm:$0xff]  }
 0x1b0   :  { %5583 = vmatpush2.bf16.msra.mxu1 %v8409_v9  ;;  %5611 = vmatprep.subr.bf16.mxu0 %v8420_v13  ;;  %v8466_v9 = vld [vmem:[%s12101_s1 + $0x468] ss:$16 sps:$4 sm:$0xff]  }
 0x1b1   :  { %5584 = vmatprep.subr.bf16.mxu1 %v8417_v12  ;;  %v8474_v12 = vld [vmem:[%s12101_s1 + $0x44c] ss:$16 sps:$4 sm:$0xff]   ;;  %v8469_v13 = vld [vmem:[%s12101_s1 + $0x348] ss:$16 sps:$4 sm:$0xff]  }
 0x1b3   :  { %5612 = vmatpush1.bf16.msra.mxu0 %v8418_v18  ;;  %v8477_v18 = vld [vmem:[%s12101_s1 + $0x32c] ss:$16 sps:$4 sm:$0xff]  }
 0x1b4   :  { %5585 = vmatpush2.bf16.msra.mxu1 %v8415_v14  ;;  %5613 = vmatprep.subr.bf16.mxu0 %v8426_v60  ;;  %v8472_v14 = vld [vmem:[%s12101_s1 + $0x448] ss:$16 sps:$4 sm:$0xff]  }
 0x1b5   :  { %5586 = vmatprep.subr.bf16.mxu1 %v8423_v19  ;;  %v8480_v19 = vld [vmem:[%s12101_s1 + $0x42c] ss:$16 sps:$4 sm:$0xff]   ;;  %v8475_v60 = vld [vmem:[%s12101_s1 + $0x328] ss:$16 sps:$4 sm:$0xff]  }
 0x1b7   :  { %5614 = vmatpush1.bf16.msra.mxu0 %v8424_v23  ;;  %v8483_v23 = vld [vmem:[%s12101_s1 + $0x30c] ss:$16 sps:$4 sm:$0xff]  }
 0x1b8   :  { %5587 = vmatpush2.bf16.msra.mxu1 %v8421_v21  ;;  %5615 = vmatprep.subr.bf16.mxu0 %v8432_v25  ;;  %v8478_v21 = vld [vmem:[%s12101_s1 + $0x428] ss:$16 sps:$4 sm:$0xff]  }
 0x1b9   :  { %5588 = vmatprep.subr.bf16.mxu1 %v8429_v24  ;;  %v8486_v24 = vld [vmem:[%s12101_s1 + $0x40c] ss:$16 sps:$4 sm:$0xff]   ;;  %v8481_v25 = vld [vmem:[%s12101_s1 + $0x308] ss:$16 sps:$4 sm:$0xff]  }
 0x1bb   :  { %5616 = vmatpush1.bf16.msra.mxu0 %v8430_v27  ;;  %v8489_v27 = vld [vmem:[%s12101_s1 + $0x5ec] ss:$16 sps:$4 sm:$0xff]  }
 0x1bc   :  { %5589 = vmatpush2.bf16.msra.mxu1 %v8427_v26  ;;  %5617 = vmatprep.subr.bf16.mxu0 %v8438_v3  ;;  %v8484_v26 = vld [vmem:[%s12101_s1 + $0x408] ss:$16 sps:$4 sm:$0xff]  }
 0x1bd   :  { %5590 = vmatprep.subr.bf16.mxu1 %v8435_v28  ;;  %v8492_v28 = vld [vmem:[%s12101_s1 + $0x6ec] ss:$16 sps:$4 sm:$0xff]   ;;  %v8487_v3 = vld [vmem:[%s12101_s1 + $0x5e8] ss:$16 sps:$4 sm:$0xff]  }
 0x1bf   :  { %5618 = vmatpush1.bf16.msra.mxu0 %v8436_v31  ;;  %v8495_v31 = vld [vmem:[%s12101_s1 + $0x5cc] ss:$16 sps:$4 sm:$0xff]  }
 0x1c0   :  { %5591 = vmatpush2.bf16.msra.mxu1 %v8433_v30  ;;  %5619 = vmatprep.subr.bf16.mxu0 %v8441_v32  ;;  %v8490_v30 = vld [vmem:[%s12101_s1 + $0x6e8] ss:$16 sps:$4 sm:$0xff]   ;;  %v8498_v32 = vld [vmem:[%s12101_s1 + $0x6cc] ss:$16 sps:$4 sm:$0xff]  }
 0x1c1   :  { %5646 = vmatprep.subr.bf16.mxu1 %v8444_v33  ;;  %v8493_v33 = vld [vmem:[%s12101_s1 + $0x5c8] ss:$16 sps:$4 sm:$0xff]  }
 0x1c2   :  { %v5293_v48 = vpop.f32.mrf.mxu0 }
 0x1c3   :  { %v5336_v49 = vpop.f32.mrf.mxu1  ;;  %5593 = vmatmul.mubr.bf16.vlgmr.msra.gmra.mxu1 %v9081_v50  ;;  %v5294_v51 = vadd.f32 %v5293_v48, %v10439_v20  ;;  %5620 = vmatpush2.bf16.msra.mxu0 %v8439_v36  ;;  %v8451_v20 = vld [vmem:[%s12101_s1 + $0x3a8] ss:$16 sps:$4 sm:$0xff]   ;;  %v9084_v48 = vld [vmem:[%s12102_s0 + $0x1c] ss:$100 sps:$4 sm:$0xff]  }
 0x1c4   :  { %5647 = vmatpush1.bf16.msra.mxu1 %v8442_v37  ;;  %v10648_v52 = vpop.f32.mrf.mxu0  ;;  %5621 = vmatprep.subr.bf16.mxu0 %v8447_v41  ;;  %v8496_v36 = vld [vmem:[%s12101_s1 + $0x6c8] ss:$16 sps:$4 sm:$0xff]   ;;  %v8501_v41 = vld [vmem:[%s12101_s1 + $0x5ac] ss:$16 sps:$4 sm:$0xff]  }
 0x1c5   :  { %v10650_v53 = vpop.f32.mrf.mxu1  ;;  %5648 = vmatprep.subr.bf16.mxu1 %v8450_v42  ;;  %v10658_v58 = vadd.f32 %v5336_v49, %v5294_v51  ;;  %5678 = vmatprep.mubr.bf16.mxu1 %v9082_v38  ;;  %v9083_v37 = vld [vmem:[%s12102_s0 + $0x8] ss:$100 sps:$4 sm:$0xff]  }
 0x1c6   :  { %v5297_v61 = vpop.f32.mrf.mxu0  ;;  %v8504_v42 = vld [vmem:[%s12101_s1 + $0x6ac] ss:$16 sps:$4 sm:$0xff]   ;;  %v8505_v51 = vld [vmem:[%s12101_s1 + $0x588] ss:$16 sps:$4 sm:$0xff]  }
 0x1c7   :  { %v5298_v62 = vadd.f32 %v5297_v61, %v10458_v29  ;;  %5622 = vmatpush2.bf16.msra.mxu0 %v8445_v43  ;;  %v5340_v63 = vpop.f32.mrf.mxu1  ;;  %v8457_v29 = vld [vmem:[%s12101_s1 + $0x388] ss:$16 sps:$4 sm:$0xff]   ;;  %v8507_v49 = vld [vmem:[%s12101_s1 + $0x58c] ss:$16 sps:$4 sm:$0xff]  }
 0x1c8   :  { %5649 = vmatpush1.bf16.msra.mxu1 %v8448_v47  ;;  %5623 = vmatprep.subr.bf16.mxu0 %v8453_v54  ;;  %v8499_v43 = vld [vmem:[%s12101_s1 + $0x5a8] ss:$16 sps:$4 sm:$0xff]   ;;  %v8510_v50 = vld [vmem:[%s12101_s1 + $0x68c] ss:$16 sps:$4 sm:$0xff]  }
 0x1c9   :  { %5650 = vmatprep.subr.bf16.mxu1 %v8456_v55  ;;  %v10676_v2 = vadd.f32 %v5340_v63, %v5298_v62  ;;  %v8502_v47 = vld [vmem:[%s12101_s1 + $0x6a8] ss:$16 sps:$4 sm:$0xff]   ;;  %v8513_v55 = vld [vmem:[%s12101_s1 + $0x56c] ss:$16 sps:$4 sm:$0xff]  }
 0x1ca   :  { %v8508_v54 = vld [vmem:[%s12101_s1 + $0x688] ss:$16 sps:$4 sm:$0xff]   ;;  %v8519_v61 = vld [vmem:[%s12101_s1 + $0x54c] ss:$16 sps:$4 sm:$0xff]  }
 0x1cb   :  { %5624 = vmatpush2.bf16.msra.mxu0 %v8451_v20  ;;  %v8516_v20 = vld [vmem:[%s12101_s1 + $0x66c] ss:$16 sps:$4 sm:$0xff]   ;;  %v8514_v38 = vld [vmem:[%s12101_s1 + $0x668] ss:$16 sps:$4 sm:$0xff]  }
 0x1cc   :  { %5651 = vmatpush1.bf16.msra.mxu1 %v8454_v59  ;;  %5625 = vmatprep.subr.bf16.mxu0 %v8459_v0  ;;  %v8511_v59 = vld [vmem:[%s12101_s1 + $0x568] ss:$16 sps:$4 sm:$0xff]   ;;  %v8522_v62 = vld [vmem:[%s12101_s1 + $0x64c] ss:$16 sps:$4 sm:$0xff]  }
 0x1cd   :  { %5652 = vmatprep.subr.bf16.mxu1 %v8462_v1  ;;  %v8517_v63 = vld [vmem:[%s12101_s1 + $0x548] ss:$16 sps:$4 sm:$0xff]   ;;  %v8525_v1 = vld [vmem:[%s12101_s1 + $0x52c] ss:$16 sps:$4 sm:$0xff]  }
 0x1ce   :  { %v8520_v0 = vld [vmem:[%s12101_s1 + $0x648] ss:$16 sps:$4 sm:$0xff]  }
 0x1cf   :  { %5626 = vmatpush2.bf16.msra.mxu0 %v8457_v29  ;;  %v8528_v29 = vld [vmem:[%s12101_s1 + $0x62c] ss:$16 sps:$4 sm:$0xff]  }
 0x1d0   :  { %5653 = vmatpush1.bf16.msra.mxu1 %v8460_v46  ;;  %5627 = vmatprep.subr.bf16.mxu0 %v8465_v4  ;;  %v8523_v46 = vld [vmem:[%s12101_s1 + $0x528] ss:$16 sps:$4 sm:$0xff]  }
 0x1d1   :  { %5654 = vmatprep.subr.bf16.mxu1 %v8468_v7  ;;  %v8526_v4 = vld [vmem:[%s12101_s1 + $0x628] ss:$16 sps:$4 sm:$0xff]   ;;  %v8531_v7 = vld [vmem:[%s12101_s1 + $0x50c] ss:$16 sps:$4 sm:$0xff]  }
 0x1d3   :  { %5628 = vmatpush2.bf16.msra.mxu0 %v8463_v8  ;;  %v8534_v8 = vld [vmem:[%s12101_s1 + $0x60c] ss:$16 sps:$4 sm:$0xff]  }
 0x1d4   :  { %5655 = vmatpush1.bf16.msra.mxu1 %v8466_v9  ;;  %5629 = vmatprep.subr.bf16.mxu0 %v8471_v10  ;;  %v8529_v9 = vld [vmem:[%s12101_s1 + $0x508] ss:$16 sps:$4 sm:$0xff]  }
 0x1d5   :  { %5656 = vmatprep.subr.bf16.mxu1 %v8474_v12  ;;  %v8532_v10 = vld [vmem:[%s12101_s1 + $0x608] ss:$16 sps:$4 sm:$0xff]   ;;  %v8537_v12 = vld [vmem:[%s12101_s1 + $0x7ec] ss:$16 sps:$4 sm:$0xff]  }
 0x1d7   :  { %5630 = vmatpush2.bf16.msra.mxu0 %v8469_v13  ;;  %v8540_v13 = vld [vmem:[%s12101_s1 + $0x8ec] ss:$16 sps:$4 sm:$0xff]  }
 0x1d8   :  { %5657 = vmatpush1.bf16.msra.mxu1 %v8472_v14  ;;  %5631 = vmatprep.subr.bf16.mxu0 %v8477_v18  ;;  %v8535_v14 = vld [vmem:[%s12101_s1 + $0x7e8] ss:$16 sps:$4 sm:$0xff]  }
 0x1d9   :  { %5658 = vmatprep.subr.bf16.mxu1 %v8480_v19  ;;  %v8538_v18 = vld [vmem:[%s12101_s1 + $0x8e8] ss:$16 sps:$4 sm:$0xff]   ;;  %v10846_v19 = vpop.f32.mrf.mxu0 }
 0x1db   :  { %5632 = vmatpush2.bf16.msra.mxu0 %v8475_v60  ;;  %v10848_v60 = vpop.f32.mrf.mxu1 }
 0x1dc   :  { %5659 = vmatpush1.bf16.msra.mxu1 %v8478_v21  ;;  %5633 = vmatprep.subr.bf16.mxu0 %v8483_v23  ;;  %v8543_v21 = vld [vmem:[%s12101_s1 + $0x7cc] ss:$16 sps:$4 sm:$0xff]  }
 0x1dd   :  { %5660 = vmatprep.subr.bf16.mxu1 %v8486_v24  ;;  %v8546_v23 = vld [vmem:[%s12101_s1 + $0x8cc] ss:$16 sps:$4 sm:$0xff]  }
 0x1df   :  { %5634 = vmatpush2.bf16.msra.mxu0 %v8481_v25 }
 0x1e0   :  { %5661 = vmatpush1.bf16.msra.mxu1 %v8484_v26  ;;  %5689 = vmatprep.subr.bf16.mxu0 %v8492_v28  ;;  %v9085_v26 = vld [vmem:[%s12102_s0 + $0x10] ss:$100 sps:$4 sm:$0xff]   ;;  %v8541_v28 = vld [vmem:[%s12101_s1 + $0x7c8] ss:$16 sps:$4 sm:$0xff]  }
 0x1e1   :  { %5662 = vmatprep.subr.bf16.mxu1 %v8489_v27 }
 0x1e2   :  { %5636 = vmatmul.mubr.bf16.vlgmr.msra.gmra.mxu0 %v9083_v37 }
 0x1e3   :  { %5690 = vmatpush1.bf16.msra.mxu0 %v8490_v30  ;;  %5721 = vmatprep.mubr.bf16.mxu0 %v9084_v48  ;;  %v8555_v48 = vld [vmem:[%s12101_s1 + $0x78c] ss:$16 sps:$4 sm:$0xff]  }
 0x1e4   :  { %5663 = vmatpush2.bf16.msra.mxu1 %v8487_v3  ;;  %5691 = vmatprep.subr.bf16.mxu0 %v8498_v32  ;;  %v8544_v3 = vld [vmem:[%s12101_s1 + $0x8c8] ss:$16 sps:$4 sm:$0xff]   ;;  %v8552_v32 = vld [vmem:[%s12101_s1 + $0x8ac] ss:$16 sps:$4 sm:$0xff]  }
 0x1e5   :  { %5664 = vmatprep.subr.bf16.mxu1 %v8495_v31 }
 0x1e7   :  { %5692 = vmatpush1.bf16.msra.mxu0 %v8496_v36  ;;  %v9086_v36 = vld [vmem:[%s12102_s0 + $0x24] ss:$100 sps:$4 sm:$0xff]  }
 0x1e8   :  { %5665 = vmatpush2.bf16.msra.mxu1 %v8493_v33  ;;  %5693 = vmatprep.subr.bf16.mxu0 %v8504_v42  ;;  %v8547_v42 = vld [vmem:[%s12101_s1 + $0x7a8] ss:$16 sps:$4 sm:$0xff]  }
 0x1e9   :  { %5666 = vmatprep.subr.bf16.mxu1 %v8501_v41 }
 0x1eb   :  { %5694 = vmatpush1.bf16.msra.mxu0 %v8502_v47 }
 0x1ec   :  { %5667 = vmatpush2.bf16.msra.mxu1 %v8499_v43  ;;  %5695 = vmatprep.subr.bf16.mxu0 %v8510_v50  ;;  %v8550_v43 = vld [vmem:[%s12101_s1 + $0x8a8] ss:$16 sps:$4 sm:$0xff]  }
 0x1ed   :  { %5668 = vmatprep.subr.bf16.mxu1 %v8507_v49  ;;  %v8553_v50 = vld [vmem:[%s12101_s1 + $0x788] ss:$16 sps:$4 sm:$0xff]  }
 0x1ef   :  { %5696 = vmatpush1.bf16.msra.mxu0 %v8508_v54  ;;  %v8561_v54 = vld [vmem:[%s12101_s1 + $0x76c] ss:$16 sps:$4 sm:$0xff]  }
 0x1f0   :  { %5669 = vmatpush2.bf16.msra.mxu1 %v8505_v51  ;;  %5697 = vmatprep.subr.bf16.mxu0 %v8516_v20  ;;  %v8556_v51 = vld [vmem:[%s12101_s1 + $0x888] ss:$16 sps:$4 sm:$0xff]  }
 0x1f1   :  { %5670 = vmatprep.subr.bf16.mxu1 %v8513_v55  ;;  %v8564_v55 = vld [vmem:[%s12101_s1 + $0x86c] ss:$16 sps:$4 sm:$0xff]   ;;  %v8559_v20 = vld [vmem:[%s12101_s1 + $0x768] ss:$16 sps:$4 sm:$0xff]  }
 0x1f3   :  { %5698 = vmatpush1.bf16.msra.mxu0 %v8514_v38  ;;  %v8567_v38 = vld [vmem:[%s12101_s1 + $0x74c] ss:$16 sps:$4 sm:$0xff]  }
 0x1f4   :  { %5671 = vmatpush2.bf16.msra.mxu1 %v8511_v59  ;;  %5699 = vmatprep.subr.bf16.mxu0 %v8522_v62  ;;  %v8562_v59 = vld [vmem:[%s12101_s1 + $0x868] ss:$16 sps:$4 sm:$0xff]  }
 0x1f5   :  { %5672 = vmatprep.subr.bf16.mxu1 %v8519_v61  ;;  %v8570_v61 = vld [vmem:[%s12101_s1 + $0x84c] ss:$16 sps:$4 sm:$0xff]   ;;  %v8565_v62 = vld [vmem:[%s12101_s1 + $0x748] ss:$16 sps:$4 sm:$0xff]  }
 0x1f7   :  { %5700 = vmatpush1.bf16.msra.mxu0 %v8520_v0  ;;  %v8573_v0 = vld [vmem:[%s12101_s1 + $0x72c] ss:$16 sps:$4 sm:$0xff]  }
 0x1f8   :  { %5673 = vmatpush2.bf16.msra.mxu1 %v8517_v63  ;;  %5701 = vmatprep.subr.bf16.mxu0 %v8528_v29  ;;  %v8568_v63 = vld [vmem:[%s12101_s1 + $0x848] ss:$16 sps:$4 sm:$0xff]  }
 0x1f9   :  { %5674 = vmatprep.subr.bf16.mxu1 %v8525_v1  ;;  %v8576_v1 = vld [vmem:[%s12101_s1 + $0x82c] ss:$16 sps:$4 sm:$0xff]   ;;  %v8571_v29 = vld [vmem:[%s12101_s1 + $0x728] ss:$16 sps:$4 sm:$0xff]  }
 0x1fb   :  { %5702 = vmatpush1.bf16.msra.mxu0 %v8526_v4  ;;  %v8579_v4 = vld [vmem:[%s12101_s1 + $0x70c] ss:$16 sps:$4 sm:$0xff]  }
 0x1fc   :  { %5675 = vmatpush2.bf16.msra.mxu1 %v8523_v46  ;;  %5703 = vmatprep.subr.bf16.mxu0 %v8534_v8  ;;  %v8574_v46 = vld [vmem:[%s12101_s1 + $0x828] ss:$16 sps:$4 sm:$0xff]  }
 0x1fd   :  { %5676 = vmatprep.subr.bf16.mxu1 %v8531_v7  ;;  %v8582_v7 = vld [vmem:[%s12101_s1 + $0x80c] ss:$16 sps:$4 sm:$0xff]   ;;  %v8577_v8 = vld [vmem:[%s12101_s1 + $0x708] ss:$16 sps:$4 sm:$0xff]  }
 0x1ff   :  { %5704 = vmatpush1.bf16.msra.mxu0 %v8532_v10  ;;  %v8585_v10 = vld [vmem:[%s12101_s1 + $0x9ec] ss:$16 sps:$4 sm:$0xff]  }
 0x200   :  { %5677 = vmatpush2.bf16.msra.mxu1 %v8529_v9  ;;  %5705 = vmatprep.subr.bf16.mxu0 %v8537_v12  ;;  %v8580_v9 = vld [vmem:[%s12101_s1 + $0x808] ss:$16 sps:$4 sm:$0xff]   ;;  %v8588_v12 = vld [vmem:[%s12101_s1 + $0xaec] ss:$16 sps:$4 sm:$0xff]  }
 0x201   :  { %5732 = vmatprep.subr.bf16.mxu1 %v8540_v13  ;;  %v8583_v13 = vld [vmem:[%s12101_s1 + $0x9e8] ss:$16 sps:$4 sm:$0xff]  }
 0x202   :  { %v5379_v24 = vpop.f32.mrf.mxu0 }
 0x203   :  { %v5422_v25 = vpop.f32.mrf.mxu1  ;;  %5679 = vmatmul.mubr.bf16.vlgmr.msra.gmra.mxu1 %v9085_v26  ;;  %v5380_v27 = vadd.f32 %v5379_v24, %v10658_v58  ;;  %5706 = vmatpush2.bf16.msra.mxu0 %v8535_v14  ;;  %v8549_v58 = vld [vmem:[%s12101_s1 + $0x7ac] ss:$16 sps:$4 sm:$0xff]   ;;  %v8586_v14 = vld [vmem:[%s12101_s1 + $0xae8] ss:$16 sps:$4 sm:$0xff]  }
 0x204   :  { %5733 = vmatpush1.bf16.msra.mxu1 %v8538_v18  ;;  %v10866_v30 = vpop.f32.mrf.mxu0  ;;  %5707 = vmatprep.subr.bf16.mxu0 %v8543_v21  ;;  %v8591_v18 = vld [vmem:[%s12101_s1 + $0x9cc] ss:$16 sps:$4 sm:$0xff]   ;;  %v8589_v24 = vld [vmem:[%s12101_s1 + $0x9c8] ss:$16 sps:$4 sm:$0xff]  }
 0x205   :  { %v10868_v31 = vpop.f32.mrf.mxu1  ;;  %5734 = vmatprep.subr.bf16.mxu1 %v8546_v23  ;;  %v10876_v33 = vadd.f32 %v5422_v25, %v5380_v27  ;;  %5764 = vmatprep.mubr.bf16.mxu1 %v9086_v36  ;;  %v8594_v21 = vld [vmem:[%s12101_s1 + $0xacc] ss:$16 sps:$4 sm:$0xff]   ;;  %v8592_v25 = vld [vmem:[%s12101_s1 + $0xac8] ss:$16 sps:$4 sm:$0xff]  }
 0x206   :  { %v5383_v37 = vpop.f32.mrf.mxu0  ;;  %v9087_v23 = vld [vmem:[%s12102_s0 + $0x18] ss:$100 sps:$4 sm:$0xff]  }
 0x207   :  { %v5384_v41 = vadd.f32 %v5383_v37, %v10676_v2  ;;  %5708 = vmatpush2.bf16.msra.mxu0 %v8541_v28  ;;  %v5426_v47 = vpop.f32.mrf.mxu1  ;;  %v8558_v2 = vld [vmem:[%s12101_s1 + $0x88c] ss:$16 sps:$4 sm:$0xff]   ;;  %v8601_v37 = vld [vmem:[%s12101_s1 + $0x988] ss:$16 sps:$4 sm:$0xff]  }
 0x208   :  { %5735 = vmatpush1.bf16.msra.mxu1 %v8544_v3  ;;  %5709 = vmatprep.subr.bf16.mxu0 %v8549_v58  ;;  %v8597_v26 = vld [vmem:[%s12101_s1 + $0x9ac] ss:$16 sps:$4 sm:$0xff]   ;;  %v8595_v3 = vld [vmem:[%s12101_s1 + $0x9a8] ss:$16 sps:$4 sm:$0xff]  }
 0x209   :  { %5736 = vmatprep.subr.bf16.mxu1 %v8552_v32  ;;  %v10894_v49 = vadd.f32 %v5426_v47, %v5384_v41  ;;  %v8600_v27 = vld [vmem:[%s12101_s1 + $0xaac] ss:$16 sps:$4 sm:$0xff]   ;;  %v8598_v58 = vld [vmem:[%s12101_s1 + $0xaa8] ss:$16 sps:$4 sm:$0xff]  }
 0x20a   :  { %v9088_v28 = vld [vmem:[%s12102_s0 + $0x2c] ss:$100 sps:$4 sm:$0xff]   ;;  %v8604_v41 = vld [vmem:[%s12101_s1 + $0xa88] ss:$16 sps:$4 sm:$0xff]  }
 0x20b   :  { %5710 = vmatpush2.bf16.msra.mxu0 %v8547_v42  ;;  %v8603_v32 = vld [vmem:[%s12101_s1 + $0x98c] ss:$16 sps:$4 sm:$0xff]   ;;  %v8607_v47 = vld [vmem:[%s12101_s1 + $0x968] ss:$16 sps:$4 sm:$0xff]  }
 0x20c   :  { %5737 = vmatpush1.bf16.msra.mxu1 %v8550_v43  ;;  %5711 = vmatprep.subr.bf16.mxu0 %v8555_v48  ;;  %v8606_v36 = vld [vmem:[%s12101_s1 + $0xa8c] ss:$16 sps:$4 sm:$0xff]   ;;  %v8610_v48 = vld [vmem:[%s12101_s1 + $0xa68] ss:$16 sps:$4 sm:$0xff]  }
 0x20d   :  { %5738 = vmatprep.subr.bf16.mxu1 %v8558_v2  ;;  %v8609_v42 = vld [vmem:[%s12101_s1 + $0x96c] ss:$16 sps:$4 sm:$0xff]  }
 0x20e   :  { %v8612_v43 = vld [vmem:[%s12101_s1 + $0xa6c] ss:$16 sps:$4 sm:$0xff]  }
 0x20f   :  { %5712 = vmatpush2.bf16.msra.mxu0 %v8553_v50  ;;  %v8615_v2 = vld [vmem:[%s12101_s1 + $0x94c] ss:$16 sps:$4 sm:$0xff]  }
 0x210   :  { %5739 = vmatpush1.bf16.msra.mxu1 %v8556_v51  ;;  %5713 = vmatprep.subr.bf16.mxu0 %v8561_v54  ;;  %v8618_v50 = vld [vmem:[%s12101_s1 + $0xa4c] ss:$16 sps:$4 sm:$0xff]   ;;  %v8613_v51 = vld [vmem:[%s12101_s1 + $0x948] ss:$16 sps:$4 sm:$0xff]  }
 0x211   :  { %5740 = vmatprep.subr.bf16.mxu1 %v8564_v55  ;;  %v8616_v54 = vld [vmem:[%s12101_s1 + $0xa48] ss:$16 sps:$4 sm:$0xff]   ;;  %v8621_v55 = vld [vmem:[%s12101_s1 + $0x92c] ss:$16 sps:$4 sm:$0xff]  }
 0x213   :  { %5714 = vmatpush2.bf16.msra.mxu0 %v8559_v20  ;;  %v8624_v20 = vld [vmem:[%s12101_s1 + $0xa2c] ss:$16 sps:$4 sm:$0xff]  }
 0x214   :  { %5741 = vmatpush1.bf16.msra.mxu1 %v8562_v59  ;;  %5715 = vmatprep.subr.bf16.mxu0 %v8567_v38  ;;  %v8619_v59 = vld [vmem:[%s12101_s1 + $0x928] ss:$16 sps:$4 sm:$0xff]  }
 0x215   :  { %5742 = vmatprep.subr.bf16.mxu1 %v8570_v61  ;;  %v8622_v38 = vld [vmem:[%s12101_s1 + $0xa28] ss:$16 sps:$4 sm:$0xff]   ;;  %v8627_v61 = vld [vmem:[%s12101_s1 + $0x90c] ss:$16 sps:$4 sm:$0xff]  }
 0x217   :  { %5716 = vmatpush2.bf16.msra.mxu0 %v8565_v62  ;;  %v8630_v62 = vld [vmem:[%s12101_s1 + $0xa0c] ss:$16 sps:$4 sm:$0xff]  }
 0x218   :  { %5743 = vmatpush1.bf16.msra.mxu1 %v8568_v63  ;;  %5717 = vmatprep.subr.bf16.mxu0 %v8573_v0  ;;  %v8625_v63 = vld [vmem:[%s12101_s1 + $0x908] ss:$16 sps:$4 sm:$0xff]  }
 0x219   :  { %5744 = vmatprep.subr.bf16.mxu1 %v8576_v1  ;;  %v8628_v0 = vld [vmem:[%s12101_s1 + $0xa08] ss:$16 sps:$4 sm:$0xff]   ;;  %v8633_v1 = vld [vmem:[%s12101_s1 + $0xbec] ss:$16 sps:$4 sm:$0xff]  }
 0x21b   :  { %5718 = vmatpush2.bf16.msra.mxu0 %v8571_v29  ;;  %v8636_v29 = vld [vmem:[%s12101_s1 + $0xcec] ss:$16 sps:$4 sm:$0xff]  }
 0x21c   :  { %5745 = vmatpush1.bf16.msra.mxu1 %v8574_v46  ;;  %5719 = vmatprep.subr.bf16.mxu0 %v8579_v4  ;;  %v8631_v46 = vld [vmem:[%s12101_s1 + $0xbe8] ss:$16 sps:$4 sm:$0xff]  }
 0x21d   :  { %5746 = vmatprep.subr.bf16.mxu1 %v8582_v7  ;;  %v8634_v4 = vld [vmem:[%s12101_s1 + $0xce8] ss:$16 sps:$4 sm:$0xff]   ;;  %v11064_v7 = vpop.f32.mrf.mxu0 }
 0x21f   :  { %5720 = vmatpush2.bf16.msra.mxu0 %v8577_v8  ;;  %v11066_v8 = vpop.f32.mrf.mxu1 }
 0x220   :  { %5747 = vmatpush1.bf16.msra.mxu1 %v8580_v9  ;;  %5775 = vmatprep.subr.bf16.mxu0 %v8588_v12  ;;  %v8639_v9 = vld [vmem:[%s12101_s1 + $0xbcc] ss:$16 sps:$4 sm:$0xff]  }
 0x221   :  { %5748 = vmatprep.subr.bf16.mxu1 %v8585_v10  ;;  %v8642_v10 = vld [vmem:[%s12101_s1 + $0xccc] ss:$16 sps:$4 sm:$0xff]  }
 0x222   :  { %5722 = vmatmul.mubr.bf16.vlgmr.msra.gmra.mxu0 %v9087_v23  ;;  %v8640_v23 = vld [vmem:[%s12101_s1 + $0xcc8] ss:$16 sps:$4 sm:$0xff]  }
 0x223   :  { %5776 = vmatpush1.bf16.msra.mxu0 %v8586_v14  ;;  %5807 = vmatprep.mubr.bf16.mxu0 %v9088_v28  ;;  %v9089_v14 = vld [vmem:[%s12102_s0 + $0x20] ss:$100 sps:$4 sm:$0xff]   ;;  %v9090_v28 = vld [vmem:[%s12102_s0 + $0x34] ss:$100 sps:$4 sm:$0xff]  }
 0x224   :  { %5749 = vmatpush2.bf16.msra.mxu1 %v8583_v13  ;;  %5777 = vmatprep.subr.bf16.mxu0 %v8594_v21  ;;  %v8637_v21 = vld [vmem:[%s12101_s1 + $0xbc8] ss:$16 sps:$4 sm:$0xff]  }
 0x225   :  { %5750 = vmatprep.subr.bf16.mxu1 %v8591_v18 }
 0x227   :  { %5778 = vmatpush1.bf16.msra.mxu0 %v8592_v25 }
 0x228   :  { %5751 = vmatpush2.bf16.msra.mxu1 %v8589_v24  ;;  %5779 = vmatprep.subr.bf16.mxu0 %v8600_v27 }
 0x229   :  { %5752 = vmatprep.subr.bf16.mxu1 %v8597_v26  ;;  %v8648_v26 = vld [vmem:[%s12101_s1 + $0xcac] ss:$16 sps:$4 sm:$0xff]  }
 0x22b   :  { %5780 = vmatpush1.bf16.msra.mxu0 %v8598_v58 }
 0x22c   :  { %5753 = vmatpush2.bf16.msra.mxu1 %v8595_v3  ;;  %5781 = vmatprep.subr.bf16.mxu0 %v8606_v36  ;;  %v8646_v36 = vld [vmem:[%s12101_s1 + $0xca8] ss:$16 sps:$4 sm:$0xff]  }
 0x22d   :  { %5754 = vmatprep.subr.bf16.mxu1 %v8603_v32  ;;  %v8643_v32 = vld [vmem:[%s12101_s1 + $0xba8] ss:$16 sps:$4 sm:$0xff]  }
 0x22f   :  { %5782 = vmatpush1.bf16.msra.mxu0 %v8604_v41  ;;  %v8651_v41 = vld [vmem:[%s12101_s1 + $0xb8c] ss:$16 sps:$4 sm:$0xff]  }
 0x230   :  { %5755 = vmatpush2.bf16.msra.mxu1 %v8601_v37  ;;  %5783 = vmatprep.subr.bf16.mxu0 %v8612_v43  ;;  %v8649_v43 = vld [vmem:[%s12101_s1 + $0xb88] ss:$16 sps:$4 sm:$0xff]  }
 0x231   :  { %5756 = vmatprep.subr.bf16.mxu1 %v8609_v42 }
 0x233   :  { %5784 = vmatpush1.bf16.msra.mxu0 %v8610_v48  ;;  %v8657_v48 = vld [vmem:[%s12101_s1 + $0xb6c] ss:$16 sps:$4 sm:$0xff]  }
 0x234   :  { %5757 = vmatpush2.bf16.msra.mxu1 %v8607_v47  ;;  %5785 = vmatprep.subr.bf16.mxu0 %v8618_v50  ;;  %v8652_v47 = vld [vmem:[%s12101_s1 + $0xc88] ss:$16 sps:$4 sm:$0xff]  }
 0x235   :  { %5758 = vmatprep.subr.bf16.mxu1 %v8615_v2  ;;  %v8660_v2 = vld [vmem:[%s12101_s1 + $0xc6c] ss:$16 sps:$4 sm:$0xff]   ;;  %v8655_v50 = vld [vmem:[%s12101_s1 + $0xb68] ss:$16 sps:$4 sm:$0xff]  }
 0x237   :  { %5786 = vmatpush1.bf16.msra.mxu0 %v8616_v54  ;;  %v8663_v54 = vld [vmem:[%s12101_s1 + $0xb4c] ss:$16 sps:$4 sm:$0xff]  }
 0x238   :  { %5759 = vmatpush2.bf16.msra.mxu1 %v8613_v51  ;;  %5787 = vmatprep.subr.bf16.mxu0 %v8624_v20  ;;  %v8658_v51 = vld [vmem:[%s12101_s1 + $0xc68] ss:$16 sps:$4 sm:$0xff]  }
 0x239   :  { %5760 = vmatprep.subr.bf16.mxu1 %v8621_v55  ;;  %v8666_v55 = vld [vmem:[%s12101_s1 + $0xc4c] ss:$16 sps:$4 sm:$0xff]   ;;  %v8661_v20 = vld [vmem:[%s12101_s1 + $0xb48] ss:$16 sps:$4 sm:$0xff]  }
 0x23b   :  { %5788 = vmatpush1.bf16.msra.mxu0 %v8622_v38  ;;  %v8669_v38 = vld [vmem:[%s12101_s1 + $0xb2c] ss:$16 sps:$4 sm:$0xff]  }
 0x23c   :  { %5761 = vmatpush2.bf16.msra.mxu1 %v8619_v59  ;;  %5789 = vmatprep.subr.bf16.mxu0 %v8630_v62  ;;  %v8664_v59 = vld [vmem:[%s12101_s1 + $0xc48] ss:$16 sps:$4 sm:$0xff]  }
 0x23d   :  { %5762 = vmatprep.subr.bf16.mxu1 %v8627_v61  ;;  %v8672_v61 = vld [vmem:[%s12101_s1 + $0xc2c] ss:$16 sps:$4 sm:$0xff]   ;;  %v8667_v62 = vld [vmem:[%s12101_s1 + $0xb28] ss:$16 sps:$4 sm:$0xff]  }
 0x23f   :  { %5790 = vmatpush1.bf16.msra.mxu0 %v8628_v0  ;;  %v8675_v0 = vld [vmem:[%s12101_s1 + $0xb0c] ss:$16 sps:$4 sm:$0xff]  }
 0x240   :  { %5763 = vmatpush2.bf16.msra.mxu1 %v8625_v63  ;;  %5791 = vmatprep.subr.bf16.mxu0 %v8633_v1  ;;  %v8670_v63 = vld [vmem:[%s12101_s1 + $0xc28] ss:$16 sps:$4 sm:$0xff]   ;;  %v8678_v1 = vld [vmem:[%s12101_s1 + $0xc0c] ss:$16 sps:$4 sm:$0xff]  }
 0x241   :  { %5818 = vmatprep.subr.bf16.mxu1 %v8636_v29  ;;  %v8673_v29 = vld [vmem:[%s12101_s1 + $0xb08] ss:$16 sps:$4 sm:$0xff]  }
 0x242   :  { %v5465_v12 = vpop.f32.mrf.mxu0 }
 0x243   :  { %v5508_v13 = vpop.f32.mrf.mxu1  ;;  %5765 = vmatmul.mubr.bf16.vlgmr.msra.gmra.mxu1 %v9089_v14  ;;  %v5466_v18 = vadd.f32 %v5465_v12, %v10876_v33  ;;  %5792 = vmatpush2.bf16.msra.mxu0 %v8631_v46  ;;  %v8645_v33 = vld [vmem:[%s12101_s1 + $0xbac] ss:$16 sps:$4 sm:$0xff]   ;;  %v8676_v46 = vld [vmem:[%s12101_s1 + $0xc08] ss:$16 sps:$4 sm:$0xff]  }
 0x244   :  { %5819 = vmatpush1.bf16.msra.mxu1 %v8634_v4  ;;  %v11084_v24 = vpop.f32.mrf.mxu0  ;;  %5793 = vmatprep.subr.bf16.mxu0 %v8639_v9  ;;  %v8681_v4 = vld [vmem:[%s12101_s1 + $0xdec] ss:$16 sps:$4 sm:$0xff]   ;;  %v8682_v12 = vld [vmem:[%s12101_s1 + $0xee8] ss:$16 sps:$4 sm:$0xff]  }
 0x245   :  { %v11086_v25 = vpop.f32.mrf.mxu1  ;;  %5820 = vmatprep.subr.bf16.mxu1 %v8642_v10  ;;  %v11094_v27 = vadd.f32 %v5508_v13, %v5466_v18  ;;  %5850 = vmatprep.mubr.bf16.mxu1 %v9090_v28  ;;  %v8684_v9 = vld [vmem:[%s12101_s1 + $0xeec] ss:$16 sps:$4 sm:$0xff]   ;;  %v8679_v10 = vld [vmem:[%s12101_s1 + $0xde8] ss:$16 sps:$4 sm:$0xff]  }
 0x246   :  { %v5469_v3 = vpop.f32.mrf.mxu0  ;;  %v8687_v14 = vld [vmem:[%s12101_s1 + $0xdcc] ss:$16 sps:$4 sm:$0xff]   ;;  %v8688_v28 = vld [vmem:[%s12101_s1 + $0xec8] ss:$16 sps:$4 sm:$0xff]  }
 0x247   :  { %v5470_v58 = vadd.f32 %v5469_v3, %v10894_v49  ;;  %5794 = vmatpush2.bf16.msra.mxu0 %v8637_v21  ;;  %v5512_v37 = vpop.f32.mrf.mxu1  ;;  %v8654_v49 = vld [vmem:[%s12101_s1 + $0xc8c] ss:$16 sps:$4 sm:$0xff]  }
 0x248   :  { %5821 = vmatpush1.bf16.msra.mxu1 %v8640_v23  ;;  %5795 = vmatprep.subr.bf16.mxu0 %v8645_v33  ;;  %v11180_v13 = vpop.f32.mrf.mxu0  ;;  %v8690_v18 = vld [vmem:[%s12101_s1 + $0xecc] ss:$16 sps:$4 sm:$0xff]  }
 0x249   :  { %5822 = vmatprep.subr.bf16.mxu1 %v8648_v26  ;;  %v11112_v42 = vadd.f32 %v5512_v37, %v5470_v58  ;;  %v9091_v23 = vld [vmem:[%s12102_s0 + $0x28] ss:$100 sps:$4 sm:$0xff]  }
 0x24a   :  { %v8685_v26 = vld [vmem:[%s12101_s1 + $0xdc8] ss:$16 sps:$4 sm:$0xff]   ;;  %v8693_v58 = vld [vmem:[%s12101_s1 + $0xdac] ss:$16 sps:$4 sm:$0xff]  }
 0x24b   :  { %5796 = vmatpush2.bf16.msra.mxu0 %v8643_v32  ;;  %v9092_v32 = vld [vmem:[%s12102_s0 + $0x3c] ss:$100 sps:$4 sm:$0xff]  }
 0x24c   :  { %5823 = vmatpush1.bf16.msra.mxu1 %v8646_v36  ;;  %5797 = vmatprep.subr.bf16.mxu0 %v8651_v41  ;;  %v8691_v41 = vld [vmem:[%s12101_s1 + $0xda8] ss:$16 sps:$4 sm:$0xff]  }
 0x24d   :  { %5824 = vmatprep.subr.bf16.mxu1 %v8654_v49  ;;  %v8694_v49 = vld [vmem:[%s12101_s1 + $0xea8] ss:$16 sps:$4 sm:$0xff]  }
 0x24f   :  { %5798 = vmatpush2.bf16.msra.mxu0 %v8649_v43  ;;  %v8699_v43 = vld [vmem:[%s12101_s1 + $0xd8c] ss:$16 sps:$4 sm:$0xff]  }
 0x250   :  { %5825 = vmatpush1.bf16.msra.mxu1 %v8652_v47  ;;  %5799 = vmatprep.subr.bf16.mxu0 %v8657_v48 }
 0x251   :  { %5826 = vmatprep.subr.bf16.mxu1 %v8660_v2 }
 0x253   :  { %5800 = vmatpush2.bf16.msra.mxu0 %v8655_v50  ;;  %v8697_v50 = vld [vmem:[%s12101_s1 + $0xd88] ss:$16 sps:$4 sm:$0xff]  }
 0x254   :  { %5827 = vmatpush1.bf16.msra.mxu1 %v8658_v51  ;;  %5801 = vmatprep.subr.bf16.mxu0 %v8663_v54  ;;  %v8700_v51 = vld [vmem:[%s12101_s1 + $0xe88] ss:$16 sps:$4 sm:$0xff]   ;;  %v8705_v54 = vld [vmem:[%s12101_s1 + $0xd6c] ss:$16 sps:$4 sm:$0xff]  }
 0x255   :  { %5828 = vmatprep.subr.bf16.mxu1 %v8666_v55  ;;  %v8708_v55 = vld [vmem:[%s12101_s1 + $0xe6c] ss:$16 sps:$4 sm:$0xff]  }
 0x257   :  { %5802 = vmatpush2.bf16.msra.mxu0 %v8661_v20  ;;  %v8703_v20 = vld [vmem:[%s12101_s1 + $0xd68] ss:$16 sps:$4 sm:$0xff]  }
 0x258   :  { %5829 = vmatpush1.bf16.msra.mxu1 %v8664_v59  ;;  %5803 = vmatprep.subr.bf16.mxu0 %v8669_v38  ;;  %v8706_v59 = vld [vmem:[%s12101_s1 + $0xe68] ss:$16 sps:$4 sm:$0xff]   ;;  %v8711_v38 = vld [vmem:[%s12101_s1 + $0xd4c] ss:$16 sps:$4 sm:$0xff]  }
 0x259   :  { %5830 = vmatprep.subr.bf16.mxu1 %v8672_v61  ;;  %v8714_v61 = vld [vmem:[%s12101_s1 + $0xe4c] ss:$16 sps:$4 sm:$0xff]  }
 0x25b   :  { %5804 = vmatpush2.bf16.msra.mxu0 %v8667_v62  ;;  %v8709_v62 = vld [vmem:[%s12101_s1 + $0xd48] ss:$16 sps:$4 sm:$0xff]  }
 0x25c   :  { %5831 = vmatpush1.bf16.msra.mxu1 %v8670_v63  ;;  %5805 = vmatprep.subr.bf16.mxu0 %v8675_v0  ;;  %v8712_v63 = vld [vmem:[%s12101_s1 + $0xe48] ss:$16 sps:$4 sm:$0xff]   ;;  %v8717_v0 = vld [vmem:[%s12101_s1 + $0xd2c] ss:$16 sps:$4 sm:$0xff]  }
 0x25d   :  { %5832 = vmatprep.subr.bf16.mxu1 %v8678_v1  ;;  %v8720_v1 = vld [vmem:[%s12101_s1 + $0xe2c] ss:$16 sps:$4 sm:$0xff]  }
 0x25f   :  { %5806 = vmatpush2.bf16.msra.mxu0 %v8673_v29  ;;  %v8715_v29 = vld [vmem:[%s12101_s1 + $0xd28] ss:$16 sps:$4 sm:$0xff]  }
 0x260   :  { %5833 = vmatpush1.bf16.msra.mxu1 %v8676_v46  ;;  %5861 = vmatprep.subr.bf16.mxu0 %v8684_v9  ;;  %v8718_v46 = vld [vmem:[%s12101_s1 + $0xe28] ss:$16 sps:$4 sm:$0xff]   ;;  %v8726_v9 = vld [vmem:[%s12101_s1 + $0xe0c] ss:$16 sps:$4 sm:$0xff]  }
 0x261   :  { %5834 = vmatprep.subr.bf16.mxu1 %v8681_v4  ;;  %v8723_v4 = vld [vmem:[%s12101_s1 + $0xd0c] ss:$16 sps:$4 sm:$0xff]  }
 0x262   :  { %v5551_v21 = vpop.f32.mrf.mxu0  ;;  %5808 = vmatmul.mubr.bf16.vlgmr.msra.gmra.mxu0 %v9091_v23  ;;  %v8730_v23 = vld [vmem:[%s12101_s1 + $0x10e8] ss:$16 sps:$4 sm:$0xff]  }
 0x263   :  { %v5552_v33 = vadd.f32 %v5551_v21, %v11094_v27  ;;  %5862 = vmatpush1.bf16.msra.mxu0 %v8682_v12  ;;  %v8696_v27 = vld [vmem:[%s12101_s1 + $0xeac] ss:$16 sps:$4 sm:$0xff]   ;;  %5893 = vmatprep.mubr.bf16.mxu0 %v9092_v32  ;;  %v8724_v12 = vld [vmem:[%s12101_s1 + $0xe08] ss:$16 sps:$4 sm:$0xff]  }
 0x264   :  { %5835 = vmatpush2.bf16.msra.mxu1 %v8679_v10  ;;  %v11198_v3 = vpop.f32.mrf.mxu0  ;;  %5863 = vmatprep.subr.bf16.mxu0 %v8690_v18  ;;  %v8721_v10 = vld [vmem:[%s12101_s1 + $0xd08] ss:$16 sps:$4 sm:$0xff]   ;;  %v8732_v18 = vld [vmem:[%s12101_s1 + $0x10ec] ss:$16 sps:$4 sm:$0xff]  }
 0x265   :  { %5836 = vmatprep.subr.bf16.mxu1 %v8687_v14  ;;  %v6119_v47 = vmax.f32 %v5552_v33, 0.0  ;;  %v8729_v14 = vld [vmem:[%s12101_s1 + $0xfec] ss:$16 sps:$4 sm:$0xff]   ;;  %v8727_v21 = vld [vmem:[%s12101_s1 + $0xfe8] ss:$16 sps:$4 sm:$0xff]  }
 0x266   :  { %v5555_v36 = vpop.f32.mrf.mxu0  ;;  %v8735_v33 = vld [vmem:[%s12101_s1 + $0xfcc] ss:$16 sps:$4 sm:$0xff]  }
 0x267   :  { %v5556_v37 = vadd.f32 %v5555_v36, %v11112_v42  ;;  %5864 = vmatpush1.bf16.msra.mxu0 %v8688_v28  ;;  %v8702_v42 = vld [vmem:[%s12101_s1 + $0xe8c] ss:$16 sps:$4 sm:$0xff]   ;;  %v9093_v28 = vld [vmem:[%s12102_s0 + $0x30] ss:$100 sps:$4 sm:$0xff]  }
 0x268   :  { %5837 = vmatpush2.bf16.msra.mxu1 %v8685_v26  ;;  %5865 = vmatprep.subr.bf16.mxu0 %v8696_v27  ;;  %v8738_v26 = vld [vmem:[%s12101_s1 + $0x10cc] ss:$16 sps:$4 sm:$0xff]   ;;  %v8736_v27 = vld [vmem:[%s12101_s1 + $0x10c8] ss:$16 sps:$4 sm:$0xff]  }
 0x269   :  { %5838 = vmatprep.subr.bf16.mxu1 %v8693_v58  ;;  %v6123_v48 = vmax.f32 %v5556_v37, 0.0  ;;  %v8733_v58 = vld [vmem:[%s12101_s1 + $0xfc8] ss:$16 sps:$4 sm:$0xff]   ;;  %v8741_v32 = vld [vmem:[%s12101_s1 + $0xfac] ss:$16 sps:$4 sm:$0xff]  }
 0x26a   :  { %v8744_v36 = vld [vmem:[%s12101_s1 + $0x10ac] ss:$16 sps:$4 sm:$0xff]   ;;  %v9094_v37 = vld [vmem:[%s12102_s0 + $0x44] ss:$100 sps:$4 sm:$0xff]  }
 0x26b   :  { %v11222_v2 = vpack.c.bf16 %v6123_v48, %v6119_v47  ;;  %5866 = vmatpush1.bf16.msra.mxu0 %v8694_v49  ;;  %v8742_v49 = vld [vmem:[%s12101_s1 + $0x10a8] ss:$16 sps:$4 sm:$0xff]  }
 0x26c   :  { %5839 = vmatpush2.bf16.msra.mxu1 %v8691_v41  ;;  %5867 = vmatprep.subr.bf16.mxu0 %v8702_v42  ;;  %v8739_v41 = vld [vmem:[%s12101_s1 + $0xfa8] ss:$16 sps:$4 sm:$0xff]   ;;  %v8750_v42 = vld [vmem:[%s12101_s1 + $0x108c] ss:$16 sps:$4 sm:$0xff]  }
 0x26d   :  { %5840 = vmatprep.subr.bf16.mxu1 %v8699_v43  ;;  %v8747_v43 = vld [vmem:[%s12101_s1 + $0xf8c] ss:$16 sps:$4 sm:$0xff]   ;;  %v8745_v47 = vld [vmem:[%s12101_s1 + $0xf88] ss:$16 sps:$4 sm:$0xff]  }
 0x26e   :  { %v8748_v48 = vld [vmem:[%s12101_s1 + $0x1088] ss:$16 sps:$4 sm:$0xff]  }
 0x26f   :  { %5868 = vmatpush1.bf16.msra.mxu0 %v8700_v51  ;;  %v8756_v51 = vld [vmem:[%s12101_s1 + $0x106c] ss:$16 sps:$4 sm:$0xff]  }
 0x270   :  { %5841 = vmatpush2.bf16.msra.mxu1 %v8697_v50  ;;  %5869 = vmatprep.subr.bf16.mxu0 %v8708_v55  ;;  %v8753_v50 = vld [vmem:[%s12101_s1 + $0xf6c] ss:$16 sps:$4 sm:$0xff]   ;;  %v8754_v55 = vld [vmem:[%s12101_s1 + $0x1068] ss:$16 sps:$4 sm:$0xff]  }
 0x271   :  { %5842 = vmatprep.subr.bf16.mxu1 %v8705_v54  ;;  %v8751_v54 = vld [vmem:[%s12101_s1 + $0xf68] ss:$16 sps:$4 sm:$0xff]  }
 0x273   :  { %5870 = vmatpush1.bf16.msra.mxu0 %v8706_v59  ;;  %v8762_v59 = vld [vmem:[%s12101_s1 + $0x104c] ss:$16 sps:$4 sm:$0xff]  }
 0x274   :  { %5843 = vmatpush2.bf16.msra.mxu1 %v8703_v20  ;;  %5871 = vmatprep.subr.bf16.mxu0 %v8714_v61  ;;  %v8759_v20 = vld [vmem:[%s12101_s1 + $0xf4c] ss:$16 sps:$4 sm:$0xff]   ;;  %v8760_v61 = vld [vmem:[%s12101_s1 + $0x1048] ss:$16 sps:$4 sm:$0xff]  }
 0x275   :  { %5844 = vmatprep.subr.bf16.mxu1 %v8711_v38  ;;  %v8757_v38 = vld [vmem:[%s12101_s1 + $0xf48] ss:$16 sps:$4 sm:$0xff]  }
 0x277   :  { %5872 = vmatpush1.bf16.msra.mxu0 %v8712_v63  ;;  %v8768_v63 = vld [vmem:[%s12101_s1 + $0x102c] ss:$16 sps:$4 sm:$0xff]  }
 0x278   :  { %5845 = vmatpush2.bf16.msra.mxu1 %v8709_v62  ;;  %5873 = vmatprep.subr.bf16.mxu0 %v8720_v1  ;;  %v8765_v62 = vld [vmem:[%s12101_s1 + $0xf2c] ss:$16 sps:$4 sm:$0xff]   ;;  %v8766_v1 = vld [vmem:[%s12101_s1 + $0x1028] ss:$16 sps:$4 sm:$0xff]  }
 0x279   :  { %5846 = vmatprep.subr.bf16.mxu1 %v8717_v0  ;;  %v8763_v0 = vld [vmem:[%s12101_s1 + $0xf28] ss:$16 sps:$4 sm:$0xff]  }
 0x27b   :  { %5874 = vmatpush1.bf16.msra.mxu0 %v8718_v46  ;;  %v8774_v46 = vld [vmem:[%s12101_s1 + $0x100c] ss:$16 sps:$4 sm:$0xff]  }
 0x27c   :  { %5847 = vmatpush2.bf16.msra.mxu1 %v8715_v29  ;;  %5875 = vmatprep.subr.bf16.mxu0 %v8726_v9  ;;  %v8771_v29 = vld [vmem:[%s12101_s1 + $0xf0c] ss:$16 sps:$4 sm:$0xff]   ;;  %v8772_v9 = vld [vmem:[%s12101_s1 + $0x1008] ss:$16 sps:$4 sm:$0xff]  }
 0x27d   :  { %5848 = vmatprep.subr.bf16.mxu1 %v8723_v4  ;;  %v8769_v4 = vld [vmem:[%s12101_s1 + $0xf08] ss:$16 sps:$4 sm:$0xff]  }
 0x27f   :  { %5876 = vmatpush1.bf16.msra.mxu0 %v8724_v12  ;;  %v8780_v12 = vld [vmem:[%s12101_s1 + $0x12ec] ss:$16 sps:$4 sm:$0xff]  }
 0x280   :  { %5849 = vmatpush2.bf16.msra.mxu1 %v8721_v10  ;;  %5877 = vmatprep.subr.bf16.mxu0 %v8729_v14  ;;  %v8777_v10 = vld [vmem:[%s12101_s1 + $0x11ec] ss:$16 sps:$4 sm:$0xff]   ;;  %v8775_v14 = vld [vmem:[%s12101_s1 + $0x11e8] ss:$16 sps:$4 sm:$0xff]  }
 0x281   :  { %5904 = vmatprep.subr.bf16.mxu1 %v8732_v18  ;;  %v8778_v18 = vld [vmem:[%s12101_s1 + $0x12e8] ss:$16 sps:$4 sm:$0xff]  }
 0x283   :  { %5851 = vmatmul.mubr.bf16.vlgmr.msra.gmra.mxu1 %v9093_v28  ;;  %5878 = vmatpush2.bf16.msra.mxu0 %v8727_v21  ;;  %v8783_v21 = vld [vmem:[%s12101_s1 + $0x11cc] ss:$16 sps:$4 sm:$0xff]  }
 0x284   :  { %5905 = vmatpush1.bf16.msra.mxu1 %v8730_v23  ;;  %5879 = vmatprep.subr.bf16.mxu0 %v8735_v33  ;;  %v8786_v23 = vld [vmem:[%s12101_s1 + $0x12cc] ss:$16 sps:$4 sm:$0xff]   ;;  %v8781_v33 = vld [vmem:[%s12101_s1 + $0x11c8] ss:$16 sps:$4 sm:$0xff]  }
 0x285   :  { %5906 = vmatprep.subr.bf16.mxu1 %v8738_v26  ;;  %5936 = vmatprep.mubr.bf16.mxu1 %v9094_v37  ;;  %v8784_v26 = vld [vmem:[%s12101_s1 + $0x12c8] ss:$16 sps:$4 sm:$0xff]   ;;  %v9096_v37 = vld [vmem:[%s12102_s0 + $0x4c] ss:$100 sps:$4 sm:$0xff]  }
 0x286   :  { %v9095_v28 = vld [vmem:[%s12102_s0 + $0x38] ss:$100 sps:$4 sm:$0xff]  }
 0x287   :  { %5880 = vmatpush2.bf16.msra.mxu0 %v8733_v58  ;;  %v8789_v58 = vld [vmem:[%s12101_s1 + $0x11ac] ss:$16 sps:$4 sm:$0xff]  }
 0x288   :  { %5907 = vmatpush1.bf16.msra.mxu1 %v8736_v27  ;;  %5881 = vmatprep.subr.bf16.mxu0 %v8741_v32  ;;  %v8792_v27 = vld [vmem:[%s12101_s1 + $0x12ac] ss:$16 sps:$4 sm:$0xff]   ;;  %v8787_v32 = vld [vmem:[%s12101_s1 + $0x11a8] ss:$16 sps:$4 sm:$0xff]  }
 0x289   :  { %5908 = vmatprep.subr.bf16.mxu1 %v8744_v36  ;;  %v8790_v36 = vld [vmem:[%s12101_s1 + $0x12a8] ss:$16 sps:$4 sm:$0xff]  }
 0x28b   :  { %5882 = vmatpush2.bf16.msra.mxu0 %v8739_v41  ;;  %v8795_v41 = vld [vmem:[%s12101_s1 + $0x118c] ss:$16 sps:$4 sm:$0xff]  }
 0x28c   :  { %5909 = vmatpush1.bf16.msra.mxu1 %v8742_v49  ;;  %5883 = vmatprep.subr.bf16.mxu0 %v8747_v43  ;;  %v8798_v49 = vld [vmem:[%s12101_s1 + $0x128c] ss:$16 sps:$4 sm:$0xff]   ;;  %v8793_v43 = vld [vmem:[%s12101_s1 + $0x1188] ss:$16 sps:$4 sm:$0xff]  }
 0x28d   :  { %5910 = vmatprep.subr.bf16.mxu1 %v8750_v42  ;;  %v8796_v42 = vld [vmem:[%s12101_s1 + $0x1288] ss:$16 sps:$4 sm:$0xff]  }
 0x28f   :  { %5884 = vmatpush2.bf16.msra.mxu0 %v8745_v47  ;;  %v8801_v47 = vld [vmem:[%s12101_s1 + $0x116c] ss:$16 sps:$4 sm:$0xff]  }
 0x290   :  { %5911 = vmatpush1.bf16.msra.mxu1 %v8748_v48  ;;  %5885 = vmatprep.subr.bf16.mxu0 %v8753_v50  ;;  %v8804_v48 = vld [vmem:[%s12101_s1 + $0x126c] ss:$16 sps:$4 sm:$0xff]   ;;  %v8799_v50 = vld [vmem:[%s12101_s1 + $0x1168] ss:$16 sps:$4 sm:$0xff]  }
 0x291   :  { %5912 = vmatprep.subr.bf16.mxu1 %v8756_v51  ;;  %v8802_v51 = vld [vmem:[%s12101_s1 + $0x1268] ss:$16 sps:$4 sm:$0xff]  }
 0x293   :  { %5886 = vmatpush2.bf16.msra.mxu0 %v8751_v54  ;;  %v8807_v54 = vld [vmem:[%s12101_s1 + $0x114c] ss:$16 sps:$4 sm:$0xff]  }
 0x294   :  { %5913 = vmatpush1.bf16.msra.mxu1 %v8754_v55  ;;  %5887 = vmatprep.subr.bf16.mxu0 %v8759_v20  ;;  %v8810_v55 = vld [vmem:[%s12101_s1 + $0x124c] ss:$16 sps:$4 sm:$0xff]   ;;  %v8805_v20 = vld [vmem:[%s12101_s1 + $0x1148] ss:$16 sps:$4 sm:$0xff]  }
 0x295   :  { %5914 = vmatprep.subr.bf16.mxu1 %v8762_v59  ;;  %v8808_v59 = vld [vmem:[%s12101_s1 + $0x1248] ss:$16 sps:$4 sm:$0xff]  }
 0x297   :  { %5888 = vmatpush2.bf16.msra.mxu0 %v8757_v38  ;;  %v8813_v38 = vld [vmem:[%s12101_s1 + $0x112c] ss:$16 sps:$4 sm:$0xff]  }
 0x298   :  { %5915 = vmatpush1.bf16.msra.mxu1 %v8760_v61  ;;  %5889 = vmatprep.subr.bf16.mxu0 %v8765_v62  ;;  %v8816_v61 = vld [vmem:[%s12101_s1 + $0x122c] ss:$16 sps:$4 sm:$0xff]   ;;  %v8811_v62 = vld [vmem:[%s12101_s1 + $0x1128] ss:$16 sps:$4 sm:$0xff]  }
 0x299   :  { %5916 = vmatprep.subr.bf16.mxu1 %v8768_v63  ;;  %v8814_v63 = vld [vmem:[%s12101_s1 + $0x1228] ss:$16 sps:$4 sm:$0xff]  }
 0x29b   :  { %5890 = vmatpush2.bf16.msra.mxu0 %v8763_v0  ;;  %v8819_v0 = vld [vmem:[%s12101_s1 + $0x110c] ss:$16 sps:$4 sm:$0xff]  }
 0x29c   :  { %5917 = vmatpush1.bf16.msra.mxu1 %v8766_v1  ;;  %5891 = vmatprep.subr.bf16.mxu0 %v8771_v29  ;;  %v8822_v1 = vld [vmem:[%s12101_s1 + $0x120c] ss:$16 sps:$4 sm:$0xff]   ;;  %v8817_v29 = vld [vmem:[%s12101_s1 + $0x1108] ss:$16 sps:$4 sm:$0xff]  }
 0x29d   :  { %5918 = vmatprep.subr.bf16.mxu1 %v8774_v46  ;;  %v8820_v46 = vld [vmem:[%s12101_s1 + $0x1208] ss:$16 sps:$4 sm:$0xff]  }
 0x29f   :  { %5892 = vmatpush2.bf16.msra.mxu0 %v8769_v4  ;;  %v8825_v4 = vld [vmem:[%s12101_s1 + $0x13ec] ss:$16 sps:$4 sm:$0xff]  }
 0x2a0   :  { %5919 = vmatpush1.bf16.msra.mxu1 %v8772_v9  ;;  %5947 = vmatprep.subr.bf16.mxu0 %v8780_v12  ;;  %v8828_v9 = vld [vmem:[%s12101_s1 + $0x14ec] ss:$16 sps:$4 sm:$0xff]   ;;  %v8826_v12 = vld [vmem:[%s12101_s1 + $0x14e8] ss:$16 sps:$4 sm:$0xff]  }
 0x2a1   :  { %5920 = vmatprep.subr.bf16.mxu1 %v8777_v10  ;;  %v8823_v10 = vld [vmem:[%s12101_s1 + $0x13e8] ss:$16 sps:$4 sm:$0xff]  }
 0x2a2   :  { %5894 = vmatmul.mubr.bf16.vlgmr.msra.gmra.mxu0 %v9095_v28  ;;  %v8840_v28 = vld [vmem:[%s12101_s1 + $0x14ac] ss:$16 sps:$4 sm:$0xff]  }
 0x2a3   :  { %5948 = vmatpush1.bf16.msra.mxu0 %v8778_v18  ;;  %5979 = vmatprep.mubr.bf16.mxu0 %v9096_v37  ;;  %v8834_v18 = vld [vmem:[%s12101_s1 + $0x14cc] ss:$16 sps:$4 sm:$0xff]  }
 0x2a4   :  { %5921 = vmatpush2.bf16.msra.mxu1 %v8775_v14  ;;  %5949 = vmatprep.subr.bf16.mxu0 %v8786_v23  ;;  %v8831_v14 = vld [vmem:[%s12101_s1 + $0x13cc] ss:$16 sps:$4 sm:$0xff]   ;;  %v8829_v23 = vld [vmem:[%s12101_s1 + $0x13c8] ss:$16 sps:$4 sm:$0xff]  }
 0x2a5   :  { %5922 = vmatprep.subr.bf16.mxu1 %v8783_v21  ;;  %v9097_v21 = vld [vmem:[%s12102_s0 + $0x40] ss:$100 sps:$4 sm:$0xff]   ;;  %v8846_v37 = vld [vmem:[%s12101_s1 + $0x148c] ss:$16 sps:$4 sm:$0xff]  }
 0x2a7   :  { %5950 = vmatpush1.bf16.msra.mxu0 %v8784_v26  ;;  %v8837_v26 = vld [vmem:[%s12101_s1 + $0x13ac] ss:$16 sps:$4 sm:$0xff]  }
 0x2a8   :  { %5923 = vmatpush2.bf16.msra.mxu1 %v8781_v33  ;;  %5951 = vmatprep.subr.bf16.mxu0 %v8792_v27  ;;  %v8832_v33 = vld [vmem:[%s12101_s1 + $0x14c8] ss:$16 sps:$4 sm:$0xff]  }
 0x2a9   :  { %5924 = vmatprep.subr.bf16.mxu1 %v8789_v58  ;;  %v9098_v58 = vld [vmem:[%s12102_s0 + $0x54] ss:$100 sps:$4 sm:$0xff]  }
 0x2aa   :  { %v8835_v27 = vld [vmem:[%s12101_s1 + $0x13a8] ss:$16 sps:$4 sm:$0xff]  }
 0x2ab   :  { %5952 = vmatpush1.bf16.msra.mxu0 %v8790_v36  ;;  %v8843_v36 = vld [vmem:[%s12101_s1 + $0x138c] ss:$16 sps:$4 sm:$0xff]  }
 0x2ac   :  { %5925 = vmatpush2.bf16.msra.mxu1 %v8787_v32  ;;  %5953 = vmatprep.subr.bf16.mxu0 %v8798_v49  ;;  %v8838_v32 = vld [vmem:[%s12101_s1 + $0x14a8] ss:$16 sps:$4 sm:$0xff]  }
 0x2ad   :  { %5926 = vmatprep.subr.bf16.mxu1 %v8795_v41  ;;  %v8841_v41 = vld [vmem:[%s12101_s1 + $0x1388] ss:$16 sps:$4 sm:$0xff]  }
 0x2ae   :  { %v8844_v49 = vld [vmem:[%s12101_s1 + $0x1488] ss:$16 sps:$4 sm:$0xff]  }
 0x2af   :  { %5954 = vmatpush1.bf16.msra.mxu0 %v8796_v42  ;;  %v8852_v42 = vld [vmem:[%s12101_s1 + $0x146c] ss:$16 sps:$4 sm:$0xff]  }
 0x2b0   :  { %5927 = vmatpush2.bf16.msra.mxu1 %v8793_v43  ;;  %5955 = vmatprep.subr.bf16.mxu0 %v8804_v48  ;;  %v8849_v43 = vld [vmem:[%s12101_s1 + $0x136c] ss:$16 sps:$4 sm:$0xff]   ;;  %v8850_v48 = vld [vmem:[%s12101_s1 + $0x1468] ss:$16 sps:$4 sm:$0xff]  }
 0x2b1   :  { %5928 = vmatprep.subr.bf16.mxu1 %v8801_v47  ;;  %v8847_v47 = vld [vmem:[%s12101_s1 + $0x1368] ss:$16 sps:$4 sm:$0xff]  }
 0x2b3   :  { %5956 = vmatpush1.bf16.msra.mxu0 %v8802_v51  ;;  %v8858_v51 = vld [vmem:[%s12101_s1 + $0x144c] ss:$16 sps:$4 sm:$0xff]  }
 0x2b4   :  { %5929 = vmatpush2.bf16.msra.mxu1 %v8799_v50  ;;  %5957 = vmatprep.subr.bf16.mxu0 %v8810_v55  ;;  %v8855_v50 = vld [vmem:[%s12101_s1 + $0x134c] ss:$16 sps:$4 sm:$0xff]   ;;  %v8856_v55 = vld [vmem:[%s12101_s1 + $0x1448] ss:$16 sps:$4 sm:$0xff]  }
 0x2b5   :  { %5930 = vmatprep.subr.bf16.mxu1 %v8807_v54  ;;  %v8853_v54 = vld [vmem:[%s12101_s1 + $0x1348] ss:$16 sps:$4 sm:$0xff]  }
 0x2b7   :  { %5958 = vmatpush1.bf16.msra.mxu0 %v8808_v59  ;;  %v8864_v59 = vld [vmem:[%s12101_s1 + $0x142c] ss:$16 sps:$4 sm:$0xff]  }
 0x2b8   :  { %5931 = vmatpush2.bf16.msra.mxu1 %v8805_v20  ;;  %5959 = vmatprep.subr.bf16.mxu0 %v8816_v61  ;;  %v8861_v20 = vld [vmem:[%s12101_s1 + $0x132c] ss:$16 sps:$4 sm:$0xff]   ;;  %v8862_v61 = vld [vmem:[%s12101_s1 + $0x1428] ss:$16 sps:$4 sm:$0xff]  }
 0x2b9   :  { %5932 = vmatprep.subr.bf16.mxu1 %v8813_v38  ;;  %v8859_v38 = vld [vmem:[%s12101_s1 + $0x1328] ss:$16 sps:$4 sm:$0xff]  }
 0x2bb   :  { %5960 = vmatpush1.bf16.msra.mxu0 %v8814_v63  ;;  %v8870_v63 = vld [vmem:[%s12101_s1 + $0x140c] ss:$16 sps:$4 sm:$0xff]  }
 0x2bc   :  { %5933 = vmatpush2.bf16.msra.mxu1 %v8811_v62  ;;  %5961 = vmatprep.subr.bf16.mxu0 %v8822_v1  ;;  %v8867_v62 = vld [vmem:[%s12101_s1 + $0x130c] ss:$16 sps:$4 sm:$0xff]   ;;  %v8868_v1 = vld [vmem:[%s12101_s1 + $0x1408] ss:$16 sps:$4 sm:$0xff]  }
 0x2bd   :  { %5934 = vmatprep.subr.bf16.mxu1 %v8819_v0  ;;  %v8865_v0 = vld [vmem:[%s12101_s1 + $0x1308] ss:$16 sps:$4 sm:$0xff]  }
 0x2bf   :  { %5962 = vmatpush1.bf16.msra.mxu0 %v8820_v46  ;;  %v8876_v46 = vld [vmem:[%s12101_s1 + $0x16ec] ss:$16 sps:$4 sm:$0xff]  }
 0x2c0   :  { %5935 = vmatpush2.bf16.msra.mxu1 %v8817_v29  ;;  %5963 = vmatprep.subr.bf16.mxu0 %v8825_v4  ;;  %v8873_v29 = vld [vmem:[%s12101_s1 + $0x15ec] ss:$16 sps:$4 sm:$0xff]   ;;  %v8871_v4 = vld [vmem:[%s12101_s1 + $0x15e8] ss:$16 sps:$4 sm:$0xff]  }
 0x2c1   :  { %5990 = vmatprep.subr.bf16.mxu1 %v8828_v9  ;;  %v8874_v9 = vld [vmem:[%s12101_s1 + $0x16e8] ss:$16 sps:$4 sm:$0xff]  }
 0x2c3   :  { %5937 = vmatmul.mubr.bf16.vlgmr.msra.gmra.mxu1 %v9097_v21  ;;  %5964 = vmatpush2.bf16.msra.mxu0 %v8823_v10  ;;  %v8879_v10 = vld [vmem:[%s12101_s1 + $0x15cc] ss:$16 sps:$4 sm:$0xff]   ;;  %v8880_v21 = vld [vmem:[%s12101_s1 + $0x16c8] ss:$16 sps:$4 sm:$0xff]  }
 0x2c4   :  { %5991 = vmatpush1.bf16.msra.mxu1 %v8826_v12  ;;  %5965 = vmatprep.subr.bf16.mxu0 %v8831_v14  ;;  %v8882_v12 = vld [vmem:[%s12101_s1 + $0x16cc] ss:$16 sps:$4 sm:$0xff]  }
 0x2c5   :  { %5992 = vmatprep.subr.bf16.mxu1 %v8834_v18  ;;  %6022 = vmatprep.mubr.bf16.mxu1 %v9098_v58  ;;  %v9099_v14 = vld [vmem:[%s12102_s0 + $0x48] ss:$100 sps:$4 sm:$0xff]  }
 0x2c6   :  { %v8877_v18 = vld [vmem:[%s12101_s1 + $0x15c8] ss:$16 sps:$4 sm:$0xff]  }
 0x2c7   :  { %5966 = vmatpush2.bf16.msra.mxu0 %v8829_v23  ;;  %v8885_v23 = vld [vmem:[%s12101_s1 + $0x15ac] ss:$16 sps:$4 sm:$0xff]   ;;  %v8886_v58 = vld [vmem:[%s12101_s1 + $0x16a8] ss:$16 sps:$4 sm:$0xff]  }
 0x2c8   :  { %5993 = vmatpush1.bf16.msra.mxu1 %v8832_v33  ;;  %5967 = vmatprep.subr.bf16.mxu0 %v8837_v26  ;;  %v8888_v33 = vld [vmem:[%s12101_s1 + $0x16ac] ss:$16 sps:$4 sm:$0xff]  }
 0x2c9   :  { %5994 = vmatprep.subr.bf16.mxu1 %v8840_v28  ;;  %v9100_v26 = vld [vmem:[%s12102_s0 + $0x5c] ss:$100 sps:$4 sm:$0xff]   ;;  %v8883_v28 = vld [vmem:[%s12101_s1 + $0x15a8] ss:$16 sps:$4 sm:$0xff]  }
 0x2cb   :  { %5968 = vmatpush2.bf16.msra.mxu0 %v8835_v27  ;;  %v8891_v27 = vld [vmem:[%s12101_s1 + $0x158c] ss:$16 sps:$4 sm:$0xff]  }
 0x2cc   :  { %5995 = vmatpush1.bf16.msra.mxu1 %v8838_v32  ;;  %5969 = vmatprep.subr.bf16.mxu0 %v8843_v36  ;;  %v8894_v32 = vld [vmem:[%s12101_s1 + $0x168c] ss:$16 sps:$4 sm:$0xff]   ;;  %v8889_v36 = vld [vmem:[%s12101_s1 + $0x1588] ss:$16 sps:$4 sm:$0xff]  }
 0x2cd   :  { %5996 = vmatprep.subr.bf16.mxu1 %v8846_v37  ;;  %v8892_v37 = vld [vmem:[%s12101_s1 + $0x1688] ss:$16 sps:$4 sm:$0xff]  }
 0x2cf   :  { %5970 = vmatpush2.bf16.msra.mxu0 %v8841_v41  ;;  %v8897_v41 = vld [vmem:[%s12101_s1 + $0x156c] ss:$16 sps:$4 sm:$0xff]  }
 0x2d0   :  { %5997 = vmatpush1.bf16.msra.mxu1 %v8844_v49  ;;  %5971 = vmatprep.subr.bf16.mxu0 %v8849_v43  ;;  %v8900_v49 = vld [vmem:[%s12101_s1 + $0x166c] ss:$16 sps:$4 sm:$0xff]   ;;  %v861_v43 = vsub.s32 1, %v9944_v11 }
 0x2d1   :  { %5998 = vmatprep.subr.bf16.mxu1 %v8852_v42  ;;  %v8895_v42 = vld [vmem:[%s12101_s1 + $0x1568] ss:$16 sps:$4 sm:$0xff]  }
 0x2d3   :  { %5972 = vmatpush2.bf16.msra.mxu0 %v8847_v47  ;;  %v8898_v47 = vld [vmem:[%s12101_s1 + $0x1668] ss:$16 sps:$4 sm:$0xff]  }
 0x2d4   :  { %5999 = vmatpush1.bf16.msra.mxu1 %v8850_v48  ;;  %5973 = vmatprep.subr.bf16.mxu0 %v8855_v50  ;;  %v8903_v48 = vld [vmem:[%s12101_s1 + $0x154c] ss:$16 sps:$4 sm:$0xff]  }
 0x2d5   :  { %6000 = vmatprep.subr.bf16.mxu1 %v8858_v51  ;;  %v8906_v50 = vld [vmem:[%s12101_s1 + $0x164c] ss:$16 sps:$4 sm:$0xff]   ;;  %v11660_v51 = vld [vmem:[%s12103_s2] sm:$0xf] }
 0x2d7   :  { %5974 = vmatpush2.bf16.msra.mxu0 %v8853_v54  ;;  %v862_v54 = vrot.slane %v11660_v51, %v861_v43 }
 0x2d8   :  { %6001 = vmatpush1.bf16.msra.mxu1 %v8856_v55  ;;  %5975 = vmatprep.subr.bf16.mxu0 %v8861_v20  ;;  %v8901_v55 = vld [vmem:[%s12101_s1 + $0x1548] ss:$16 sps:$4 sm:$0xff]  }
 0x2d9   :  { %6002 = vmatprep.subr.bf16.mxu1 %v8864_v59  ;;  %v8904_v20 = vld [vmem:[%s12101_s1 + $0x1648] ss:$16 sps:$4 sm:$0xff]   ;;  %v8909_v59 = vld [vmem:[%s12101_s1 + $0x152c] ss:$16 sps:$4 sm:$0xff]  }
 0x2db   :  { %5976 = vmatpush2.bf16.msra.mxu0 %v8859_v38  ;;  %v8912_v38 = vld [vmem:[%s12101_s1 + $0x162c] ss:$16 sps:$4 sm:$0xff]  }
 0x2dc   :  { %6003 = vmatpush1.bf16.msra.mxu1 %v8862_v61  ;;  %5977 = vmatprep.subr.bf16.mxu0 %v8867_v62  ;;  %v5042_v61 = vadd.f32 %v10194_v44, %v862_v54  ;;  %v5038_v62 = vadd.f32 %v10000_v34, %v862_v54  ;;  %v8918_v34 = vld [vmem:[%s12101_s1 + $0x160c] ss:$16 sps:$4 sm:$0xff]  }
 0x2dd   :  { %6004 = vmatprep.subr.bf16.mxu1 %v8870_v63  ;;  %v8907_v63 = vld [vmem:[%s12101_s1 + $0x1528] ss:$16 sps:$4 sm:$0xff]  }
 0x2de   :  { %v5085_v44 = vadd.f32 %v10196_v45, %v5042_v61  ;;  %v8921_v45 = vld [vmem:[%s12101_s1 + $0x17ec] ss:$16 sps:$4 sm:$0xff]   ;;  %v5557_v61 = vpop.f32.mrf.mxu0 }
 0x2df   :  { %5978 = vmatpush2.bf16.msra.mxu0 %v8865_v0  ;;  %v8910_v0 = vld [vmem:[%s12101_s1 + $0x1628] ss:$16 sps:$4 sm:$0xff]  }
 0x2e0   :  { %6005 = vmatpush1.bf16.msra.mxu1 %v8868_v1  ;;  %6033 = vmatprep.subr.bf16.mxu0 %v8876_v46  ;;  %v8915_v1 = vld [vmem:[%s12101_s1 + $0x150c] ss:$16 sps:$4 sm:$0xff]   ;;  %v5128_v46 = vadd.f32 %v10412_v5, %v5085_v44 }
 0x2e1   :  { %6006 = vmatprep.subr.bf16.mxu1 %v8873_v29  ;;  %v5081_v29 = vadd.f32 %v10002_v35, %v5038_v62  ;;  %v8924_v35 = vld [vmem:[%s12101_s1 + $0x18ec] ss:$16 sps:$4 sm:$0xff]  }
 0x2e2   :  { %5980 = vmatmul.mubr.bf16.vlgmr.msra.gmra.mxu0 %v9099_v14  ;;  %v8922_v14 = vld [vmem:[%s12101_s1 + $0x18e8] ss:$16 sps:$4 sm:$0xff]  }
 0x2e3   :  { %6034 = vmatpush1.bf16.msra.mxu0 %v8874_v9  ;;  %6065 = vmatprep.mubr.bf16.mxu0 %v9100_v26  ;;  %v8916_v9 = vld [vmem:[%s12101_s1 + $0x1608] ss:$16 sps:$4 sm:$0xff]   ;;  %v5124_v5 = vadd.f32 %v10217_v56, %v5081_v29  ;;  %v8930_v56 = vld [vmem:[%s12101_s1 + $0x18cc] ss:$16 sps:$4 sm:$0xff]  }
 0x2e4   :  { %6007 = vmatpush2.bf16.msra.mxu1 %v8871_v4  ;;  %6035 = vmatprep.subr.bf16.mxu0 %v8882_v12  ;;  %v8913_v4 = vld [vmem:[%s12101_s1 + $0x1508] ss:$16 sps:$4 sm:$0xff]  }
 0x2e5   :  { %6008 = vmatprep.subr.bf16.mxu1 %v8879_v10  ;;  %v5171_v10 = vadd.f32 %v10414_v6, %v5128_v46  ;;  %v8919_v12 = vld [vmem:[%s12101_s1 + $0x17e8] ss:$16 sps:$4 sm:$0xff]   ;;  %v5167_v6 = vadd.f32 %v10219_v57, %v5124_v5  ;;  %v8933_v57 = vld [vmem:[%s12101_s1 + $0x17ac] ss:$16 sps:$4 sm:$0xff]  }
 0x2e6   :  { %v8925_v26 = vld [vmem:[%s12101_s1 + $0x17c8] ss:$16 sps:$4 sm:$0xff]  }
 0x2e7   :  { %6036 = vmatpush1.bf16.msra.mxu0 %v8880_v21  ;;  %v5214_v21 = vadd.f32 %v10628_v39, %v5171_v10  ;;  %v8961_v46 = vld [vmem:[%s12101_s1 + $0x1708] ss:$16 sps:$4 sm:$0xff]  }
 0x2e8   :  { %6009 = vmatpush2.bf16.msra.mxu1 %v8877_v18  ;;  %6037 = vmatprep.subr.bf16.mxu0 %v8888_v33  ;;  %v8927_v18 = vld [vmem:[%s12101_s1 + $0x17cc] ss:$16 sps:$4 sm:$0xff]   ;;  %v5210_v33 = vadd.f32 %v10429_v15, %v5167_v6 }
 0x2e9   :  { %6010 = vmatprep.subr.bf16.mxu1 %v8885_v23  ;;  %v9102_v23 = vld [vmem:[%s12102_s0 + $0x50] ss:$100 sps:$4 sm:$0xff]   ;;  %v8936_v15 = vld [vmem:[%s12101_s1 + $0x18ac] ss:$16 sps:$4 sm:$0xff]   ;;  %v5257_v39 = vadd.f32 %v10630_v40, %v5214_v21 }
 0x2ea   :  { %v9103_v10 = vld [vmem:[%s12102_s0 + $0x58] ss:$100 sps:$4 sm:$0xff]   ;;  %v8978_v6 = vld [vmem:[%s12104_s3 + $0x44] ss:$8 sps:$4 sm:$0xff]  }
 0x2eb   :  { %6038 = vmatpush1.bf16.msra.mxu0 %v8886_v58  ;;  %v5253_v58 = vadd.f32 %v10431_v16, %v5210_v33  ;;  %v8942_v16 = vld [vmem:[%s12101_s1 + $0x188c] ss:$16 sps:$4 sm:$0xff]   ;;  %v9015_v21 = vld [vmem:[%s12104_s3 + $0x170] ss:$8 sps:$4 sm:$0xff]  }
 0x2ec   :  { %6011 = vmatpush2.bf16.msra.mxu1 %v8883_v28  ;;  %6039 = vmatprep.subr.bf16.mxu0 %v8894_v32  ;;  %v8928_v28 = vld [vmem:[%s12101_s1 + $0x18c8] ss:$16 sps:$4 sm:$0xff]   ;;  %v9020_v33 = vld [vmem:[%s12104_s3 + $0x164] ss:$8 sps:$4 sm:$0xff]  }
 0x2ed   :  { %6012 = vmatprep.subr.bf16.mxu1 %v8891_v27  ;;  %v5300_v27 = vadd.f32 %v10846_v19, %v5257_v39  ;;  %v8931_v32 = vld [vmem:[%s12101_s1 + $0x17a8] ss:$16 sps:$4 sm:$0xff]   ;;  %v5296_v40 = vadd.f32 %v10648_v52, %v5253_v58  ;;  %v8948_v52 = vld [vmem:[%s12101_s1 + $0x186c] ss:$16 sps:$4 sm:$0xff]  }
 0x2ee   :  { %v8979_v39 = vld [vmem:[%s12104_s3 + $0x30] ss:$8 sps:$4 sm:$0xff]   ;;  %v8984_v58 = vld [vmem:[%s12104_s3 + $0x24] ss:$8 sps:$4 sm:$0xff]  }
 0x2ef   :  { %6040 = vmatpush1.bf16.msra.mxu0 %v8892_v37  ;;  %v5343_v19 = vadd.f32 %v10848_v60, %v5300_v27  ;;  %v8937_v37 = vld [vmem:[%s12101_s1 + $0x1788] ss:$16 sps:$4 sm:$0xff]   ;;  %v5339_v60 = vadd.f32 %v10650_v53, %v5296_v40  ;;  %v8951_v53 = vld [vmem:[%s12101_s1 + $0x174c] ss:$16 sps:$4 sm:$0xff]  }
 0x2f0   :  { %6013 = vmatpush2.bf16.msra.mxu1 %v8889_v36  ;;  %6041 = vmatprep.subr.bf16.mxu0 %v8900_v49  ;;  %v8934_v36 = vld [vmem:[%s12101_s1 + $0x18a8] ss:$16 sps:$4 sm:$0xff]   ;;  %v8945_v49 = vld [vmem:[%s12101_s1 + $0x176c] ss:$16 sps:$4 sm:$0xff]  }
 0x2f1   :  { %6014 = vmatprep.subr.bf16.mxu1 %v8897_v41  ;;  %v8940_v41 = vld [vmem:[%s12101_s1 + $0x1888] ss:$16 sps:$4 sm:$0xff]  }
 0x2f2   :  { %v9021_v27 = vld [vmem:[%s12104_s3 + $0x150] ss:$8 sps:$4 sm:$0xff]  }
 0x2f3   :  { %6042 = vmatpush1.bf16.msra.mxu0 %v8898_v47  ;;  %v5382_v47 = vadd.f32 %v10866_v30, %v5339_v60  ;;  %v8954_v30 = vld [vmem:[%s12101_s1 + $0x184c] ss:$16 sps:$4 sm:$0xff]   ;;  %v8985_v40 = vld [vmem:[%s12104_s3 + $0x10] ss:$8 sps:$4 sm:$0xff]  }
 0x2f4   :  { %6015 = vmatpush2.bf16.msra.mxu1 %v8895_v42  ;;  %6043 = vmatprep.subr.bf16.mxu0 %v8906_v50  ;;  %v5386_v42 = vadd.f32 %v11064_v7, %v5343_v19  ;;  %v8946_v50 = vld [vmem:[%s12101_s1 + $0x1868] ss:$16 sps:$4 sm:$0xff]   ;;  %v8990_v19 = vld [vmem:[%s12104_s3 + $0x4] ss:$8 sps:$4 sm:$0xff]   ;;  %v9029_v60 = vld [vmem:[%s12104_s3 + $0x134] ss:$8 sps:$4 sm:$0xff]  }
 0x2f5   :  { %6016 = vmatprep.subr.bf16.mxu1 %v8903_v48  ;;  %v8943_v48 = vld [vmem:[%s12101_s1 + $0x1768] ss:$16 sps:$4 sm:$0xff]   ;;  %v5425_v54 = vadd.f32 %v10868_v31, %v5382_v47  ;;  %v8960_v31 = vld [vmem:[%s12101_s1 + $0x182c] ss:$16 sps:$4 sm:$0xff]  }
 0x2f6   :  { %v5429_v7 = vadd.f32 %v11066_v8, %v5386_v42  ;;  %v8957_v8 = vld [vmem:[%s12101_s1 + $0x172c] ss:$16 sps:$4 sm:$0xff]   ;;  %v9027_v42 = vld [vmem:[%s12104_s3 + $0x130] ss:$8 sps:$4 sm:$0xff]   ;;  %v8994_v47 = vld [vmem:[%s12104_s3 + $0xe0] ss:$8 sps:$4 sm:$0xff]  }
 0x2f7   :  { %6044 = vmatpush1.bf16.msra.mxu0 %v8904_v20  ;;  %v8949_v20 = vld [vmem:[%s12101_s1 + $0x1748] ss:$16 sps:$4 sm:$0xff]  }
 0x2f8   :  { %6017 = vmatpush2.bf16.msra.mxu1 %v8901_v55  ;;  %6045 = vmatprep.subr.bf16.mxu0 %v8912_v38  ;;  %v5472_v55 = vadd.f32 %v11180_v13, %v5429_v7  ;;  %v5468_v13 = vadd.f32 %v11084_v24, %v5425_v54  ;;  %v5514_v38 = vpop.f32.mrf.mxu1  ;;  %v8966_v24 = vld [vmem:[%s12101_s1 + $0x180c] ss:$16 sps:$4 sm:$0xff]  }
 0x2f9   :  { %6018 = vmatprep.subr.bf16.mxu1 %v8909_v59  ;;  %v8952_v59 = vld [vmem:[%s12101_s1 + $0x1848] ss:$16 sps:$4 sm:$0xff]   ;;  %v9002_v7 = vld [vmem:[%s12104_s3 + $0xc4] ss:$8 sps:$4 sm:$0xff]   ;;  %v9035_v54 = vld [vmem:[%s12104_s3 + $0x114] ss:$8 sps:$4 sm:$0xff]  }
 0x2fa   :  { %v5515_v62 = vadd.f32 %v5514_v38, %v5472_v55  ;;  %v9033_v55 = vld [vmem:[%s12104_s3 + $0x110] ss:$8 sps:$4 sm:$0xff]  }
 0x2fb   :  { %6046 = vmatpush1.bf16.msra.mxu0 %v8910_v0  ;;  %v8958_v0 = vld [vmem:[%s12101_s1 + $0x1828] ss:$16 sps:$4 sm:$0xff]  }
 0x2fc   :  { %6019 = vmatpush2.bf16.msra.mxu1 %v8907_v63  ;;  %6047 = vmatprep.subr.bf16.mxu0 %v8918_v34  ;;  %v8955_v63 = vld [vmem:[%s12101_s1 + $0x1728] ss:$16 sps:$4 sm:$0xff]   ;;  %v5511_v34 = vadd.f32 %v11086_v25, %v5468_v13  ;;  %v5558_v44 = vadd.f32 %v5557_v61, %v5515_v62  ;;  %v9041_v13 = vld [vmem:[%s12104_s3 + $0x1f4] ss:$8 sps:$4 sm:$0xff]   ;;  %v9008_v62 = vld [vmem:[%s12104_s3 + $0xa4] ss:$8 sps:$4 sm:$0xff]  }
 0x2fd   :  { %6020 = vmatprep.subr.bf16.mxu1 %v8915_v1  ;;  %v8963_v1 = vld [vmem:[%s12101_s1 + $0x170c] ss:$16 sps:$4 sm:$0xff]   ;;  %v9003_v38 = vld [vmem:[%s12104_s3 + $0xb0] ss:$8 sps:$4 sm:$0xff]  }
 0x2fe   :  { %v5554_v29 = vadd.f32 %v11198_v3, %v5511_v34  ;;  %v6124_v25 = vmax.f32 %v5558_v44, 0.0  ;;  %v8967_v3 = vld [vmem:[%s12104_s3 + $0x70] ss:$8 sps:$4 sm:$0xff]   ;;  %v9047_v34 = vld [vmem:[%s12104_s3 + $0x1d4] ss:$8 sps:$4 sm:$0xff]  }
 0x2ff   :  { %6048 = vmatpush1.bf16.msra.mxu0 %v8916_v9  ;;  %v8969_v9 = vld [vmem:[%s12104_s3 + $0x74] ss:$8 sps:$4 sm:$0xff]   ;;  %v9039_v61 = vld [vmem:[%s12104_s3 + $0x1f0] ss:$8 sps:$4 sm:$0xff]  }
 0x300   :  { %6021 = vmatpush2.bf16.msra.mxu1 %v8913_v4  ;;  %6049 = vmatprep.subr.bf16.mxu0 %v8921_v45  ;;  %v8964_v4 = vld [vmem:[%s12101_s1 + $0x1808] ss:$16 sps:$4 sm:$0xff]   ;;  %v6120_v45 = vmax.f32 %v5554_v29, 0.0 }
 0x301   :  { %6076 = vmatprep.subr.bf16.mxu1 %v8924_v35  ;;  %v8972_v35 = vld [vmem:[%s12104_s3 + $0x64] ss:$8 sps:$4 sm:$0xff]   ;;  %v9009_v44 = vld [vmem:[%s12104_s3 + $0x90] ss:$8 sps:$4 sm:$0xff]  }
 0x302   :  { %v6128_v5 = vpack.c.bf16 %v6124_v25, %v6120_v45  ;;  %v9045_v29 = vld [vmem:[%s12104_s3 + $0x1d0] ss:$8 sps:$4 sm:$0xff]   ;;  %v9048_v25 = vld [vmem:[%s12104_s3 + $0x1c0] ss:$8 sps:$4 sm:$0xff]   ;;  %v9053_v45 = vld [vmem:[%s12104_s3 + $0x1b4] ss:$8 sps:$4 sm:$0xff]  }
 0x303   :  { %6023 = vmatmul.mubr.bf16.vlgmr.msra.gmra.mxu1 %v9102_v23  ;;  %6050 = vmatpush2.bf16.msra.mxu0 %v8919_v12  ;;  %v9104_v12 = vld [vmem:[%s12102_s0 + $0x60] ss:$100 sps:$4 sm:$0xff]   ;;  %v9017_v23 = vld [vmem:[%s12104_s3 + $0x174] ss:$8 sps:$4 sm:$0xff]  }
 0x304   :  { %6077 = vmatpush1.bf16.msra.mxu1 %v8922_v14  ;;  %6051 = vmatprep.subr.bf16.mxu0 %v8927_v18  ;;  %v8970_v14 = vld [vmem:[%s12104_s3 + $0x60] ss:$8 sps:$4 sm:$0xff]   ;;  %v8975_v18 = vld [vmem:[%s12104_s3 + $0x54] ss:$8 sps:$4 sm:$0xff]  }
 0x305   :  { %6078 = vmatprep.subr.bf16.mxu1 %v8930_v56  ;;  %6108 = vmatprep.mubr.bf16.mxu1 %v9105_v22  ;;  %v8939_v22 = vld [vmem:[%s12101_s1 + $0x178c] ss:$16 sps:$4 sm:$0xff]   ;;  %v8973_v56 = vld [vmem:[%s12104_s3 + $0x50] ss:$8 sps:$4 sm:$0xff]  }
 0x307   :  { %6052 = vmatpush2.bf16.msra.mxu0 %v8925_v26  ;;  %v8976_v26 = vld [vmem:[%s12104_s3 + $0x40] ss:$8 sps:$4 sm:$0xff]  }
 0x308   :  { %6079 = vmatpush1.bf16.msra.mxu1 %v8928_v28  ;;  %6053 = vmatprep.subr.bf16.mxu0 %v8933_v57  ;;  %v8981_v28 = vld [vmem:[%s12104_s3 + $0x34] ss:$8 sps:$4 sm:$0xff]   ;;  %v9018_v57 = vld [vmem:[%s12104_s3 + $0x160] ss:$8 sps:$4 sm:$0xff]  }
 0x309   :  { %6080 = vmatprep.subr.bf16.mxu1 %v8936_v15  ;;  %v9023_v15 = vld [vmem:[%s12104_s3 + $0x154] ss:$8 sps:$4 sm:$0xff]  }
 0x30b   :  { %6054 = vmatpush2.bf16.msra.mxu0 %v8931_v32  ;;  %v9026_v32 = vld [vmem:[%s12104_s3 + $0x144] ss:$8 sps:$4 sm:$0xff]  }
 0x30c   :  { %6081 = vmatpush1.bf16.msra.mxu1 %v8934_v36  ;;  %6055 = vmatprep.subr.bf16.mxu0 %v8939_v22  ;;  %v8982_v36 = vld [vmem:[%s12104_s3 + $0x20] ss:$8 sps:$4 sm:$0xff]   ;;  %v8987_v22 = vld [vmem:[%s12104_s3 + $0x14] ss:$8 sps:$4 sm:$0xff]  }
 0x30d   :  { %6082 = vmatprep.subr.bf16.mxu1 %v8942_v16  ;;  %v9024_v16 = vld [vmem:[%s12104_s3 + $0x140] ss:$8 sps:$4 sm:$0xff]  }
 0x30f   :  { %6056 = vmatpush2.bf16.msra.mxu0 %v8937_v37  ;;  %v8988_v37 = vld [vmem:[%s12104_s3] ss:$8 sps:$4 sm:$0xff]  }
 0x310   :  { %6083 = vmatpush1.bf16.msra.mxu1 %v8940_v41  ;;  %6057 = vmatprep.subr.bf16.mxu0 %v8945_v49  ;;  %v8993_v41 = vld [vmem:[%s12104_s3 + $0xf4] ss:$8 sps:$4 sm:$0xff]   ;;  %v8991_v49 = vld [vmem:[%s12104_s3 + $0xf0] ss:$8 sps:$4 sm:$0xff]  }
 0x311   :  { %6084 = vmatprep.subr.bf16.mxu1 %v8948_v52  ;;  %v8996_v52 = vld [vmem:[%s12104_s3 + $0xe4] ss:$8 sps:$4 sm:$0xff]  }
 0x313   :  { %6058 = vmatpush2.bf16.msra.mxu0 %v8943_v48  ;;  %v8999_v48 = vld [vmem:[%s12104_s3 + $0xd4] ss:$8 sps:$4 sm:$0xff]  }
 0x314   :  { %6085 = vmatpush1.bf16.msra.mxu1 %v8946_v50  ;;  %6059 = vmatprep.subr.bf16.mxu0 %v8951_v53  ;;  %v9032_v50 = vld [vmem:[%s12104_s3 + $0x124] ss:$8 sps:$4 sm:$0xff]   ;;  %v9030_v53 = vld [vmem:[%s12104_s3 + $0x120] ss:$8 sps:$4 sm:$0xff]  }
 0x315   :  { %6086 = vmatprep.subr.bf16.mxu1 %v8954_v30  ;;  %v8997_v30 = vld [vmem:[%s12104_s3 + $0xd0] ss:$8 sps:$4 sm:$0xff]  }
 0x317   :  { %6060 = vmatpush2.bf16.msra.mxu0 %v8949_v20  ;;  %v9038_v20 = vld [vmem:[%s12104_s3 + $0x104] ss:$8 sps:$4 sm:$0xff]  }
 0x318   :  { %6087 = vmatpush1.bf16.msra.mxu1 %v8952_v59  ;;  %6061 = vmatprep.subr.bf16.mxu0 %v8957_v8  ;;  %v9000_v59 = vld [vmem:[%s12104_s3 + $0xc0] ss:$8 sps:$4 sm:$0xff]  }
 0x319   :  { %6088 = vmatprep.subr.bf16.mxu1 %v8960_v31  ;;  %v9036_v8 = vld [vmem:[%s12104_s3 + $0x100] ss:$8 sps:$4 sm:$0xff]   ;;  %v9005_v31 = vld [vmem:[%s12104_s3 + $0xb4] ss:$8 sps:$4 sm:$0xff]  }
 0x31b   :  { %6062 = vmatpush2.bf16.msra.mxu0 %v8955_v63  ;;  %v9044_v63 = vld [vmem:[%s12104_s3 + $0x1e4] ss:$8 sps:$4 sm:$0xff]  }
 0x31c   :  { %6089 = vmatpush1.bf16.msra.mxu1 %v8958_v0  ;;  %6063 = vmatprep.subr.bf16.mxu0 %v8963_v1  ;;  %v9006_v0 = vld [vmem:[%s12104_s3 + $0xa0] ss:$8 sps:$4 sm:$0xff]  }
 0x31d   :  { %6090 = vmatprep.subr.bf16.mxu1 %v8966_v24  ;;  %v9042_v1 = vld [vmem:[%s12104_s3 + $0x1e0] ss:$8 sps:$4 sm:$0xff]   ;;  %v9011_v24 = vld [vmem:[%s12104_s3 + $0x94] ss:$8 sps:$4 sm:$0xff]  }
 0x31f   :  { %6064 = vmatpush2.bf16.msra.mxu0 %v8961_v46  ;;  %v9014_v46 = vld [vmem:[%s12104_s3 + $0x84] ss:$8 sps:$4 sm:$0xff]  }
 0x320   :  { %6091 = vmatpush1.bf16.msra.mxu1 %v8964_v4  ;;  %6527 = vmatprep.subr.bf16.mxu0 %v8969_v9  ;;  %v9050_v4 = vld [vmem:[%s12104_s3 + $0x1c4] ss:$8 sps:$4 sm:$0xff]   ;;  %v9012_v9 = vld [vmem:[%s12104_s3 + $0x80] ss:$8 sps:$4 sm:$0xff]  }
 0x321   :  { %6570 = vmatprep.subr.bf16.mxu1 %v9017_v23  ;;  %v5637_v23 = vpop.f32.mrf.mxu0 }
 0x322   :  { %6066 = vmatmul.mubr.bf16.vlgmr.msra.gmra.mxu0 %v9103_v10  ;;  %v9059_v10 = vld [vmem:[%s12104_s3 + $0x194] ss:$8 sps:$4 sm:$0xff]  }
 0x323   :  { %6109 = vmatmul.mubr.bf16.vlgmr.msra.gmra.mxu1 %v9104_v12  ;;  %6528 = vmatpush1.bf16.msra.mxu0 %v8967_v3  ;;  %v9051_v3 = vld [vmem:[%s12104_s3 + $0x1b0] ss:$8 sps:$4 sm:$0xff]   ;;  %v9062_v12 = vld [vmem:[%s12104_s3 + $0x184] ss:$8 sps:$4 sm:$0xff]  }
 0x324   :  { %6559 = vmatprep.mubr.bf16.mxu0 %v6128_v5  ;;  %6529 = vmatprep.subr.bf16.mxu0 %v8972_v35  ;;  %v9056_v35 = vld [vmem:[%s12104_s3 + $0x1a4] ss:$8 sps:$4 sm:$0xff]   ;;  %v9054_v5 = vld [vmem:[%s12104_s3 + $0x1a0] ss:$8 sps:$4 sm:$0xff]  }
 0x325   :  { %6571 = vmatpush1.bf16.msra.mxu1 %v9015_v21 }
 0x326   :  { %6572 = vmatprep.subr.bf16.mxu1 %v9020_v33 }
 0x327   :  { %6530 = vmatpush1.bf16.msra.mxu0 %v8970_v14  ;;  %v9060_v14 = vld [vmem:[%s12104_s3 + $0x180] ss:$8 sps:$4 sm:$0xff]  }
 0x328   :  { %6531 = vmatprep.subr.bf16.mxu0 %v8975_v18  ;;  %v5594_v18 = vpop.f32.mrf.mxu1 }
 0x329   :  { %6573 = vmatpush1.bf16.msra.mxu1 %v9018_v57 }
 0x32a   :  { %6574 = vmatprep.subr.bf16.mxu1 %v9023_v15 }
 0x32b   :  { %6532 = vmatpush1.bf16.msra.mxu0 %v8973_v56  ;;  %v5596_v56 = vpop.f32.mrf.mxu1 }
 0x32c   :  { %6533 = vmatprep.subr.bf16.mxu0 %v8978_v6 }
 0x32d   :  { %6575 = vmatpush1.bf16.msra.mxu1 %v9021_v27  ;;  %v5598_v6 = vpop.f32.mrf.mxu1 }
 0x32e   :  { %6576 = vmatprep.subr.bf16.mxu1 %v9026_v32 }
 0x32f   :  { %6534 = vmatpush1.bf16.msra.mxu0 %v8976_v26  ;;  %v12018_v21 = vpop.f32.mrf.mxu1  ;;  %v5639_v26 = vpop.f32.mrf.mxu0 }
 0x330   :  { %6535 = vmatprep.subr.bf16.mxu0 %v8981_v28 }
 0x331   :  { %6577 = vmatpush1.bf16.msra.mxu1 %v9024_v16  ;;  %v12020_v33 = vpop.f32.mrf.mxu1  ;;  %v5641_v57 = vpop.f32.mrf.mxu0  ;;  %v9065_v16 = vld [vmem:[%s12105_s5 + $0x70] sm:$0xff]  }
 0x332   :  { %6578 = vmatprep.subr.bf16.mxu1 %v9029_v60 }
 0x333   :  { %6536 = vmatpush1.bf16.msra.mxu0 %v8979_v39  ;;  %v5682_v28 = vpop.f32.mrf.mxu1  ;;  %v5643_v39 = vpop.f32.mrf.mxu0 }
 0x334   :  { %6537 = vmatprep.subr.bf16.mxu0 %v8984_v58 }
 0x335   :  { %6579 = vmatpush1.bf16.msra.mxu1 %v9027_v42  ;;  %v12022_v15 = vpop.f32.mrf.mxu1  ;;  %v5723_v27 = vpop.f32.mrf.mxu0  ;;  %v9069_v42 = vld [vmem:[%s12105_s5 + $0x60] sm:$0xff]  }
 0x336   :  { %6580 = vmatprep.subr.bf16.mxu1 %v9032_v50 }
 0x337   :  { %6538 = vmatpush1.bf16.msra.mxu0 %v8982_v36  ;;  %v12024_v58 = vpop.f32.mrf.mxu1  ;;  %v9063_v36 = vld [vmem:[%s12105_s5 + $0x78] sm:$0xff]  }
 0x338   :  { %6539 = vmatprep.subr.bf16.mxu0 %v8987_v22  ;;  %v9064_v22 = vld [vmem:[%s12105_s5 + $0x38] sm:$0xff]  }
 0x339   :  { %6581 = vmatpush1.bf16.msra.mxu1 %v9030_v53  ;;  %v12026_v32 = vpop.f32.mrf.mxu1 }
 0x33a   :  { %6582 = vmatprep.subr.bf16.mxu1 %v9035_v54  ;;  %v9072_v54 = vld [vmem:[%s12105_s5 + $0x18] sm:$0xff]  }
 0x33b   :  { %6540 = vmatpush1.bf16.msra.mxu0 %v8985_v40  ;;  %v9066_v40 = vld [vmem:[%s12105_s5 + $0x30] sm:$0xff]  }
 0x33c   :  { %6541 = vmatprep.subr.bf16.mxu0 %v8990_v19  ;;  %v5725_v19 = vpop.f32.mrf.mxu0 }
 0x33d   :  { %6583 = vmatpush1.bf16.msra.mxu1 %v9033_v55 }
 0x33e   :  { %6584 = vmatprep.subr.bf16.mxu1 %v9038_v20 }
 0x33f   :  { %6542 = vmatpush1.bf16.msra.mxu0 %v8988_v37  ;;  %v5768_v37 = vpop.f32.mrf.mxu1 }
 0x340   :  { %6543 = vmatprep.subr.bf16.mxu0 %v8993_v41  ;;  %v9067_v41 = vld [vmem:[%s12105_s5 + $0x68] sm:$0xff]  }
 0x341   :  { %6585 = vmatpush1.bf16.msra.mxu1 %v9036_v8  ;;  %v5770_v60 = vpop.f32.mrf.mxu1 }
 0x342   :  { %6586 = vmatprep.subr.bf16.mxu1 %v9041_v13 }
 0x343   :  { %6544 = vmatpush2.bf16.msra.mxu0 %v8991_v49  ;;  %v9068_v49 = vld [vmem:[%s12105_s5 + $0x28] sm:$0xff]   ;;  %v5772_v53 = vpop.f32.mrf.mxu1 }
 0x344   :  { %6545 = vmatprep.subr.bf16.mxu0 %v8996_v52  ;;  %v5727_v52 = vpop.f32.mrf.mxu0 }
 0x345   :  { %6587 = vmatpush2.bf16.msra.mxu1 %v9039_v61 }
 0x346   :  { %6588 = vmatprep.subr.bf16.mxu1 %v9044_v63  ;;  %v5729_v50 = vpop.f32.mrf.mxu0  ;;  %v865_v63 = vsub.s32 2, %v9944_v11 }
 0x347   :  { %6546 = vmatpush2.bf16.msra.mxu0 %v8994_v47  ;;  %v9070_v47 = vld [vmem:[%s12105_s5 + $0x20] sm:$0xff]  }
 0x348   :  { %6547 = vmatprep.subr.bf16.mxu0 %v8999_v48  ;;  %v9071_v48 = vld [vmem:[%s12105_s5 + $0x58] sm:$0xff]  }
 0x349   :  { %6589 = vmatpush2.bf16.msra.mxu1 %v9042_v1 }
 0x34a   :  { %6590 = vmatprep.subr.bf16.mxu1 %v9047_v34  ;;  %v866_v34 = vrot.slane %v11660_v51, %v865_v63 }
 0x34b   :  { %6548 = vmatpush2.bf16.msra.mxu0 %v8997_v30  ;;  %v5809_v30 = vpop.f32.mrf.mxu0 }
 0x34c   :  { %6549 = vmatprep.subr.bf16.mxu0 %v9002_v7  ;;  %v5852_v7 = vpop.f32.mrf.mxu1 }
 0x34d   :  { %6591 = vmatpush2.bf16.msra.mxu1 %v9045_v29  ;;  %v5811_v55 = vpop.f32.mrf.mxu0 }
 0x34e   :  { %6592 = vmatprep.subr.bf16.mxu1 %v9050_v4  ;;  %v5854_v20 = vpop.f32.mrf.mxu1  ;;  %v5595_v4 = vadd.f32 %v5594_v18, %v866_v34 }
 0x34f   :  { %6550 = vmatpush2.bf16.msra.mxu0 %v9000_v59  ;;  %v5813_v59 = vpop.f32.mrf.mxu0 }
 0x350   :  { %6551 = vmatprep.subr.bf16.mxu0 %v9005_v31  ;;  %v5856_v8 = vpop.f32.mrf.mxu1 }
 0x351   :  { %6593 = vmatpush2.bf16.msra.mxu1 %v9048_v25  ;;  %v5815_v31 = vpop.f32.mrf.mxu0 }
 0x352   :  { %6594 = vmatprep.subr.bf16.mxu1 %v9053_v45  ;;  %v5858_v13 = vpop.f32.mrf.mxu1  ;;  %v5638_v45 = vadd.f32 %v5637_v23, %v5595_v4 }
 0x353   :  { %6552 = vmatpush2.bf16.msra.mxu0 %v9003_v38 }
 0x354   :  { %6553 = vmatprep.subr.bf16.mxu0 %v9008_v62  ;;  %v869_v62 = vsub.s32 3, %v9944_v11 }
 0x355   :  { %6595 = vmatpush2.bf16.msra.mxu1 %v9051_v3 }
 0x356   :  { %6596 = vmatprep.subr.bf16.mxu1 %v9056_v35 }
 0x357   :  { %6554 = vmatpush2.bf16.msra.mxu0 %v9006_v0 }
 0x358   :  { %6555 = vmatprep.subr.bf16.mxu0 %v9011_v24  ;;  %v870_v24 = vrot.slane %v11660_v51, %v869_v62 }
 0x359   :  { %6597 = vmatpush2.bf16.msra.mxu1 %v9054_v5 }
 0x35a   :  { %6598 = vmatprep.subr.bf16.mxu1 %v9059_v10  ;;  %v5601_v5 = vadd.f32 %v12018_v21, %v870_v24 }
 0x35b   :  { %6556 = vmatpush2.bf16.msra.mxu0 %v9009_v44 }
 0x35c   :  { %6557 = vmatprep.subr.bf16.mxu0 %v9014_v46  ;;  %v5597_v46 = vadd.f32 %v5596_v56, %v870_v24 }
 0x35e   :  { %v5640_v25 = vadd.f32 %v5639_v26, %v5597_v46 }
 0x35f   :  { %6558 = vmatpush2.bf16.msra.mxu0 %v9012_v9  ;;  %v5599_v9 = vadd.f32 %v5598_v6, %v866_v34 }
 0x360   :  { %7707 = vmatprep.subr.bf16.mxu0 %v9063_v36 }
 0x361   :  { %v5642_v10 = vadd.f32 %v5641_v57, %v5599_v9 }
 0x362   :  { %6560 = vmatmul.mubr.bf16.vlgmr.msra.gmra.mxu0 %v11222_v2  ;;  %v9057_v2 = vld [vmem:[%s12104_s3 + $0x190] ss:$8 sps:$4 sm:$0xff]   ;;  %v5895_v38 = vpop.f32.mrf.mxu0 }
 0x363   :  { %6599 = vmatpush2.bf16.msra.mxu1 %v9057_v2  ;;  %7708 = vmatpush3.bf16.msra.mxu0 %v9064_v22  ;;  %v5683_v2 = vadd.f32 %v5682_v28, %v5640_v25  ;;  %v5644_v22 = vadd.f32 %v5643_v39, %v5601_v5  ;;  %v5685_v51 = vadd.f32 %v12022_v15, %v5642_v10 }
 0x364   :  { %6600 = vmatprep.subr.bf16.mxu1 %v9062_v12  ;;  %7709 = vmatprep.subr.bf16.mxu0 %v9065_v16  ;;  %v5897_v0 = vpop.f32.mrf.mxu0  ;;  %v5681_v12 = vadd.f32 %v12020_v33, %v5638_v45 }
 0x365   :  { %v5726_v16 = vadd.f32 %v5725_v19, %v5683_v2  ;;  %v5687_v18 = vadd.f32 %v12024_v58, %v5644_v22  ;;  %v5728_v56 = vadd.f32 %v5727_v52, %v5685_v51 }
 0x366   :  { %v5899_v44 = vpop.f32.mrf.mxu0 }
 0x367   :  { %6601 = vmatpush2.bf16.msra.mxu1 %v9060_v14  ;;  %7710 = vmatpush3.bf16.msra.mxu0 %v9066_v40  ;;  %v5724_v40 = vadd.f32 %v5723_v27, %v5681_v12  ;;  %v5769_v6 = vadd.f32 %v5768_v37, %v5726_v16  ;;  %v5730_v21 = vadd.f32 %v5729_v50, %v5687_v18  ;;  %v9073_v16 = vld [vmem:[%s12105_s5 + $0x50] sm:$0xff]   ;;  %v9075_v18 = vld [vmem:[%s12105_s5 + $0x48] sm:$0xff]  }
 0x368   :  { %7711 = vmatprep.subr.bf16.mxu0 %v9067_v41  ;;  %v5901_v3 = vpop.f32.mrf.mxu0  ;;  %v5771_v57 = vadd.f32 %v5770_v60, %v5728_v56  ;;  %v9076_v56 = vld [vmem:[%s12105_s5 + $0x8] sm:$0xff]  }
 0x369   :  { %v5767_v23 = vadd.f32 %v12026_v32, %v5724_v40  ;;  %v5812_v28 = vadd.f32 %v5811_v55, %v5769_v6  ;;  %v5773_v33 = vadd.f32 %v5772_v53, %v5730_v21  ;;  %v9074_v40 = vld [vmem:[%s12105_s5 + $0x10] sm:$0xff]   ;;  %v9077_v6 = vld [vmem:[%s12105_s5 + $0x40] sm:$0xff]  }
 0x36a   :  { %v6195_v21 = vld [vmem:[%s12106_s4] sm:$0x3] }
 0x36b   :  { %7712 = vmatpush3.bf16.msra.mxu0 %v9068_v49  ;;  %v5810_v49 = vadd.f32 %v5809_v30, %v5767_v23  ;;  %v5816_v19 = vadd.f32 %v5815_v31, %v5773_v33  ;;  %v9078_v23 = vld [vmem:[%s12105_s5] sm:$0xff]  }
 0x36c   :  { %7713 = vmatprep.subr.bf16.mxu0 %v9069_v42  ;;  %v5814_v42 = vadd.f32 %v5813_v59, %v5771_v57 }
 0x36d   :  { %v5853_v39 = vadd.f32 %v5852_v7, %v5810_v49  ;;  %v5859_v52 = vadd.f32 %v5858_v13, %v5816_v19  ;;  %v6200_v49 = vrot.slane %v6195_v21, %v857_v17 }
 0x36e   :  { %v5857_v27 = vadd.f32 %v5856_v8, %v5814_v42 }
 0x36f   :  { %7714 = vmatpush3.bf16.msra.mxu0 %v9070_v47  ;;  %v5855_v47 = vadd.f32 %v5854_v20, %v5812_v28  ;;  %v5896_v58 = vadd.f32 %v5895_v38, %v5853_v39  ;;  %v5902_v50 = vadd.f32 %v5901_v3, %v5859_v52  ;;  %v6204_v28 = vrot.slane %v6195_v21, %v861_v43 }
 0x370   :  { %7715 = vmatprep.subr.bf16.mxu0 %v9071_v48  ;;  %v5900_v37 = vadd.f32 %v5899_v44, %v5857_v27 }
 0x373   :  { %7716 = vmatpush3.bf16.msra.mxu0 %v9072_v54  ;;  %v5898_v54 = vadd.f32 %v5897_v0, %v5855_v47 }
 0x374   :  { %7717 = vmatprep.subr.bf16.mxu0 %v9073_v16 }
 0x377   :  { %7718 = vmatpush3.bf16.msra.mxu0 %v9074_v40 }
 0x378   :  { %7719 = vmatprep.subr.bf16.mxu0 %v9075_v18 }
 0x37b   :  { %7720 = vmatpush3.bf16.msra.mxu0 %v9076_v56 }
 0x37c   :  { %7721 = vmatprep.subr.bf16.mxu0 %v9077_v6 }
 0x37f   :  { %7722 = vmatpush3.bf16.msra.mxu0 %v9078_v23 }
 0x383   :  { %v5938_v61 = vpop.f32.mrf.mxu1 }
 0x384   :  { %v5939_v32 = vadd.f32 %v5938_v61, %v5896_v58 }
 0x385   :  { %v5940_v1 = vpop.f32.mrf.mxu1 }
 0x386   :  { %v5941_v62 = vadd.f32 %v5940_v1, %v5898_v54 }
 0x387   :  { %v5942_v29 = vpop.f32.mrf.mxu1 }
 0x388   :  { %v5943_v60 = vadd.f32 %v5942_v29, %v5900_v37 }
 0x389   :  { %v5944_v35 = vpop.f32.mrf.mxu1 }
 0x38a   :  { %v5945_v20 = vadd.f32 %v5944_v35, %v5902_v50 }
 0x3a2   :  { %v5981_v14 = vpop.f32.mrf.mxu0 }
 0x3a3   :  { %v5982_v30 = vadd.f32 %v5981_v14, %v5939_v32 }
 0x3a4   :  { %v5983_v26 = vpop.f32.mrf.mxu0 }
 0x3a5   :  { %v5984_v55 = vadd.f32 %v5983_v26, %v5941_v62 }
 0x3a6   :  { %v5985_v48 = vpop.f32.mrf.mxu0 }
 0x3a7   :  { %v5986_v7 = vadd.f32 %v5985_v48, %v5943_v60  ;;  %v7690_v60 = vld [vmem:[%s12107_s6] ss:$0 sm:$0xff] }
 0x3a8   :  { %v5987_v63 = vpop.f32.mrf.mxu0 }
 0x3a9   :  { %v5988_v0 = vadd.f32 %v5987_v63, %v5945_v20 }
 0x3c3   :  { %v6024_v36 = vpop.f32.mrf.mxu1 }
 0x3c4   :  { %v6025_v46 = vadd.f32 %v6024_v36, %v5982_v30 }
 0x3c5   :  { %v6026_v41 = vpop.f32.mrf.mxu1 }
 0x3c6   :  { %v6027_v34 = vadd.f32 %v6026_v41, %v5984_v55 }
 0x3c7   :  { %v6028_v15 = vpop.f32.mrf.mxu1 }
 0x3c8   :  { %v6029_v38 = vadd.f32 %v6028_v15, %v5986_v7 }
 0x3c9   :  { %v6030_v24 = vpop.f32.mrf.mxu1 }
 0x3ca   :  { %v6031_v4 = vadd.f32 %v6030_v24, %v5988_v0 }
 0x3e2   :  { %v6067_v53 = vpop.f32.mrf.mxu0 }
 0x3e3   :  { %v6110_v59 = vpop.f32.mrf.mxu1  ;;  %v6068_v44 = vadd.f32 %v6067_v53, %v6025_v46 }
 0x3e4   :  { %v6069_v31 = vpop.f32.mrf.mxu0 }
 0x3e5   :  { %v6112_v8 = vpop.f32.mrf.mxu1  ;;  %v6070_v13 = vadd.f32 %v6069_v31, %v6027_v34  ;;  %v6111_v5 = vadd.f32 %v6110_v59, %v6068_v44 }
 0x3e6   :  { %v6071_v1 = vpop.f32.mrf.mxu0 }
 0x3e7   :  { %v6114_v61 = vpop.f32.mrf.mxu1  ;;  %v6072_v9 = vadd.f32 %v6071_v1, %v6029_v38  ;;  %v6113_v29 = vadd.f32 %v6112_v8, %v6070_v13  ;;  %v6121_v36 = vmax.f32 %v6111_v5, 0.0 }
 0x3e8   :  { %v6073_v25 = vpop.f32.mrf.mxu0 }
 0x3e9   :  { %v6115_v45 = vadd.f32 %v6114_v61, %v6072_v9  ;;  %v6074_v3 = vadd.f32 %v6073_v25, %v6031_v4  ;;  %v6116_v10 = vpop.f32.mrf.mxu1  ;;  %v6122_v12 = vmax.f32 %v6113_v29, 0.0 }
 0x3eb   :  { %v6117_v35 = vadd.f32 %v6116_v10, %v6074_v3  ;;  %v6125_v2 = vmax.f32 %v6115_v45, 0.0 }
 0x3ed   :  { %v6126_v14 = vmax.f32 %v6117_v35, 0.0  ;;  %v6129_v51 = vpack.c.bf16 %v6125_v2, %v6121_v36 }
 0x3ef   :  { %v6130_v22 = vpack.c.bf16 %v6126_v14, %v6122_v12 }
 0x3f1   :  { %6602 = vmatprep.mubr.bf16.mxu1 %v6130_v22 }
 0x3f2   :  { %6603 = vmatmul.mubr.bf16.vlgmr.msra.gmra.mxu1 %v6129_v51 }
 0x422   :  { %v6561_v26 = vpop.f32.mrf.mxu0 }
 0x423   :  { %v6562_v15 = vadd.f32 %v6561_v26, %v6200_v49 }
 0x424   :  { %v6563_v41 = vpop.f32.mrf.mxu0 }
 0x425   :  { %v6564_v39 = vadd.f32 %v6563_v41, %v6204_v28 }
 0x426   :  { %v6565_v57 = vpop.f32.mrf.mxu0 }
 0x427   :  { %v6566_v48 = vadd.f32 %v6565_v57, %v6200_v49 }
 0x428   :  { %v6567_v42 = vpop.f32.mrf.mxu0 }
 0x429   :  { %v6568_v27 = vadd.f32 %v6567_v42, %v6204_v28 }
 0x4b2   :  { %v6604_v33 = vpop.f32.mrf.mxu1 }
 0x4b3   :  { %v6605_v52 = vadd.f32 %v6604_v33, %v6562_v15 }
 0x4b4   :  { %v6606_v47 = vpop.f32.mrf.mxu1 }
 0x4b5   :  { %v6607_v54 = vadd.f32 %v6606_v47, %v6564_v39  ;;  %v6613_v43 = vmax.f32 %v6605_v52, 0.0 }
 0x4b6   :  { %v6608_v19 = vpop.f32.mrf.mxu1 }
 0x4b7   :  { %v6609_v58 = vadd.f32 %v6608_v19, %v6566_v48  ;;  %v6614_v63 = vmax.f32 %v6607_v54, 0.0 }
 0x4b8   :  { %v6610_v37 = vpop.f32.mrf.mxu1 }
 0x4b9   :  { %v6611_v62 = vadd.f32 %v6610_v37, %v6568_v27  ;;  %v6615_v32 = vmax.f32 %v6609_v58, 0.0 }
 0x4bb   :  { %v6616_v24 = vmax.f32 %v6611_v62, 0.0  ;;  %v6617_v11 = vpack.c.bf16 %v6615_v32, %v6613_v43 }
 0x4bd   :  { %v6618_v50 = vpack.c.bf16 %v6616_v24, %v6614_v63 }
 0x4bf   :  { %6786 = vmatprep.mubr.bf16.mxu0 %v6618_v50 }
 0x4c0   :  { %6787 = vmatmul.mubr.bf16.vlgmr.msra.gmra.mxu0 %v6617_v11 }
 0x580   :  { %v7723_v17 = vpop.f32.mrf.mxu0 }
 0x582   :  { %v7724_v55 = vpop.f32.mrf.mxu0 }
 0x583   :  { %v7725_v30 = vadd.f32 %v7724_v55, %v7723_v17 }
 0x584   :  { %v7726_v53 = vpop.f32.mrf.mxu0 }
 0x585   :  { %v6789_v59 = vadd.f32 %v7725_v30, %v7690_v60 }
 0x586   :  { %v7727_v20 = vpop.f32.mrf.mxu0 }
 0x587   :  { %6795 = vst [vmem:[%s12108_s7] sm:$0xff] %v6789_v59  ;;  %v7728_v7 = vadd.f32 %v7727_v20, %v7726_v53 }
 0x589   :  { %v6792_v34 = vadd.f32 %v7728_v7, %v7690_v60 }
 0x58b   :  { %6796 = vst [vmem:[%s12108_s7 + $0x8] sm:$0xff] %v6792_v34 }

</bundles_post_ra>
